<compile_context>
chip_gen: v7x
topology: tpu7x:2x2x1
jax: 0.10.0
libtpu: 0.0.40
codegen_flags: <defaults>
</compile_context>

<pallas_src>
import functools
import math

import jax
import jax.numpy as jnp
from jax import lax
from jax.experimental import pallas as pl
from jax.experimental.pallas import tpu as pltpu

# ----------------- tiny BERT config -----------------
VOCAB = 50
HIDDEN = 32
N_LAYERS = 2
N_HEADS = 2
HEAD_DIM = HIDDEN // N_HEADS
INTER = 64
MAX_POS = 32
TYPE_VOCAB = 2
NUM_TAGS = 3
LN_EPS = 1e-12
LANES = 128

# ----------------- packed weight slab layout (rows, 128) -----------------
WORD_OFF = 0
WORD_ROWS = 56                       # VOCAB=50 padded to a multiple of 8
POS_OFF = WORD_OFF + WORD_ROWS       # 56
TYPE_OFF = POS_OFF + MAX_POS         # 88
TYPE_ROWS = 8                        # TYPE_VOCAB=2 padded
LAYER_OFF = TYPE_OFF + TYPE_ROWS     # 96
QKV_ROFF = 0                         # (H, 3H)
WO_ROFF = HIDDEN                     # (H, H)
W1_ROFF = 2 * HIDDEN                 # (H, INTER)
W2_ROFF = 3 * HIDDEN                 # (INTER, H)
LAYER_ROWS = 3 * HIDDEN + INTER      # 160
CLS_OFF = LAYER_OFF + N_LAYERS * LAYER_ROWS   # 416
W_ROWS = CLS_OFF + HIDDEN            # 448

# ----------------- packed vector slab layout (rows, 128) -----------------
V_EMB_G, V_EMB_B = 0, 1
V_LAYER0 = 2
V_PER_LAYER = 8        # +0 bqkv, +1 bo, +2 ln1g, +3 ln1b, +4 b1, +5 b2, +6 ln2g, +7 ln2b
V_CLS_B = V_LAYER0 + N_LAYERS * V_PER_LAYER    # 18
V_CRF_START = V_CLS_B + 1                      # 19
V_CRF_END = V_CRF_START + 1                    # 20
V_CRF_TRANS = V_CRF_END + 1                    # 21..23
V_ROWS = V_CRF_TRANS + NUM_TAGS                # 24


# ======================= in-kernel helpers =======================

def _layer_norm(x, g, b, eps=LN_EPS):
    mu = jnp.mean(x, axis=-1, keepdims=True)
    var = jnp.mean((x - mu) ** 2, axis=-1, keepdims=True)
    return (x - mu) * lax.rsqrt(var + eps) * g + b


def _erf_approx(x):
    # Abramowitz & Stegun 7.1.26 (max abs err ~1.5e-7): exact-GELU's erf without
    # relying on an erf lowering inside Mosaic.
    a1, a2, a3, a4, a5 = 0.254829592, -0.284496736, 1.421413741, -1.453152027, 1.061405429
    pc = 0.3275911
    sgn = jnp.where(x >= 0.0, 1.0, -1.0)
    ax = jnp.abs(x)
    t = 1.0 / (1.0 + pc * ax)
    poly = ((((a5 * t + a4) * t + a3) * t + a2) * t + a1) * t
    return sgn * (1.0 - poly * jnp.exp(-ax * ax))


def _gelu_exact(x):
    # HF BERT uses the exact (erf-based) GELU.
    return 0.5 * x * (1.0 + _erf_approx(x * 0.7071067811865475))


# ======================= fused BERT + CRF kernel =======================

def _bert_crf_kernel(tok_ref, mt_ref, w_ref, vec_ref, llh_ref, tags_ref, *,
                     batch, seq_len, num_heads):
    # tok_ref : (B*L, 2) int32   [col 0 = input_ids, col 1 = token_type_ids]
    # mt_ref  : (B, 2L) int32    [cols 0:L = attention_mask, cols L:2L = gold tags]
    # w_ref   : (W_ROWS, 128) f32 packed matmul weights + embedding tables
    # vec_ref : (V_ROWS, 128) f32 packed biases / LayerNorm / classifier / CRF params
    B, L = batch, seq_len
    BL = B * L
    H = HIDDEN
    dh = H // num_heads
    T = NUM_TAGS
    S = L - 2
    scale = 1.0 / math.sqrt(dh)

    def vrow(r, width):
        return vec_ref[r:r + 1, 0:width]                                  # (1, width)

    # ---------------- embeddings (one-hot matmul gather from VMEM tables) ----------------
    ids = tok_ref[:, 0:1]                                                 # (BL, 1) int32
    typ = tok_ref[:, 1:2]
    oh_tok = (ids == lax.broadcasted_iota(jnp.int32, (BL, WORD_ROWS), 1)).astype(jnp.float32)
    x = jnp.dot(oh_tok, w_ref[WORD_OFF:WORD_OFF + WORD_ROWS, 0:H],
                preferred_element_type=jnp.float32)
    oh_typ = (typ == lax.broadcasted_iota(jnp.int32, (BL, TYPE_ROWS), 1)).astype(jnp.float32)
    x = x + jnp.dot(oh_typ, w_ref[TYPE_OFF:TYPE_OFF + TYPE_ROWS, 0:H],
                    preferred_element_type=jnp.float32)
    pos = w_ref[POS_OFF:POS_OFF + L, 0:H]                                 # (L, H)
    x = (x.reshape(B, L, H) + pos.reshape(1, L, H)).reshape(BL, H)
    x = _layer_norm(x, vrow(V_EMB_G, H), vrow(V_EMB_B, H))

    # additive attention bias from the padding mask
    am = mt_ref[:, 0:L].astype(jnp.float32)                               # (B, L)
    attn_bias = ((1.0 - am) * -10000.0).reshape(B, 1, L)                  # (B, 1, L)

    # ---------------- transformer encoder (fully unrolled) ----------------
    for layer in range(N_LAYERS):
        base = LAYER_OFF + layer * LAYER_ROWS
        vb = V_LAYER0 + layer * V_PER_LAYER

        # fused QKV projection: one MXU matmul
        qkv = jnp.dot(x, w_ref[base + QKV_ROFF:base + QKV_ROFF + H, 0:3 * H],
                      preferred_element_type=jnp.float32) + vrow(vb + 0, 3 * H)

        attn = jnp.zeros((BL, H), jnp.float32)
        for h in range(num_heads):
            c = h * dh
            qh = qkv[:, c:c + dh].reshape(B, L, dh)
            kh = qkv[:, H + c:H + c + dh].reshape(B, L, dh)
            vh = qkv[:, 2 * H + c:2 * H + c + dh].reshape(B, L, dh)
            s = jnp.einsum('bqd,bkd->bqk', qh, kh,
                           preferred_element_type=jnp.float32) * scale + attn_bias
            s = s - jnp.max(s, axis=-1, keepdims=True)
            p = jnp.exp(s)
            p = p * pl.reciprocal(jnp.sum(p, axis=-1, keepdims=True), approx=True)
            ctx = jnp.einsum('bqk,bkd->bqd', p, vh, preferred_element_type=jnp.float32)
            # fold the output projection per head: no concatenate is ever materialized
            attn = attn + jnp.dot(
                ctx.reshape(BL, dh),
                w_ref[base + WO_ROFF + c:base + WO_ROFF + c + dh, 0:H],
                preferred_element_type=jnp.float32)
        attn = attn + vrow(vb + 1, H)
        x = _layer_norm(x + attn, vrow(vb + 2, H), vrow(vb + 3, H))

        inter = _gelu_exact(
            jnp.dot(x, w_ref[base + W1_ROFF:base + W1_ROFF + H, 0:INTER],
                    preferred_element_type=jnp.float32) + vrow(vb + 4, INTER))
        ffn = jnp.dot(inter, w_ref[base + W2_ROFF:base + W2_ROFF + INTER, 0:H],
                      preferred_element_type=jnp.float32) + vrow(vb + 5, H)
        x = _layer_norm(x + ffn, vrow(vb + 6, H), vrow(vb + 7, H))

    # ---------------- token-classification head (dropout == identity in eval) ----------------
    logits = jnp.dot(x, w_ref[CLS_OFF:CLS_OFF + H, 0:T],
                     preferred_element_type=jnp.float32) + vrow(V_CLS_B, T)   # (BL, T)
    logits3 = logits.reshape(B, L, T)

    # ---------------- CRF (torchcrf semantics) on emissions[:,1:-1] / mask[:,2:] ----------------
    start = vrow(V_CRF_START, T)                                          # (1, T)
    end = vrow(V_CRF_END, T)                                              # (1, T)
    trans = vec_ref[V_CRF_TRANS:V_CRF_TRANS + T, 0:T]                     # (T, T)

    tg = mt_ref[:, L + 1:2 * L - 1]                                       # (B, S) trimmed gold tags
    m_f = am[:, 2:L]                                                      # (B, S) trimmed mask
    tag_iota = lax.broadcasted_iota(jnp.int32, (B, T), 1)

    def em_at(t):
        return logits3[:, t + 1, :]                                       # (B, T)

    def oh_at(t):
        return (tg[:, t:t + 1] == tag_iota).astype(jnp.float32)           # (B, T)

    def mask_at(t):
        return m_f[:, t:t + 1]                                            # (B, 1)

    # NOTE: driver guarantees effective length >= 1 after the [:, 2:] trim
    # (torchcrf requires mask[:, 0] == 1).
    seq_end = jnp.sum(m_f, axis=1, keepdims=True).astype(jnp.int32) - 1   # (B, 1)

    em0 = em_at(0)
    oh0 = oh_at(0)

    # ---- numerator: score of the gold tag path (unrolled) ----
    num = jnp.sum((start + em0) * oh0, axis=1, keepdims=True)             # (B, 1)
    last_oh = jnp.where(seq_end == 0, 1.0, 0.0) * oh0                     # (B, T)
    oh_prev = oh0
    for t in range(1, S):
        em_t = em_at(t)
        oh_t = oh_at(t)
        m_t = mask_at(t)
        trans_sc = jnp.sum(
            jnp.dot(oh_prev, trans, preferred_element_type=jnp.float32) * oh_t,
            axis=1, keepdims=True)                                        # (B, 1)
        em_sc = jnp.sum(em_t * oh_t, axis=1, keepdims=True)               # (B, 1)
        num = num + m_t * (trans_sc + em_sc)
        is_end = jnp.where(seq_end == t, 1.0, 0.0)
        last_oh = is_end * oh_t + (1.0 - is_end) * last_oh
        oh_prev = oh_t
    num = num + jnp.sum(end * last_oh, axis=1, keepdims=True)             # (B, 1)

    # ---- normalizer (log partition, forward algorithm, unrolled) ----
    alpha = start + em0
    for t in range(1, S):
        em_t = em_at(t)
        m_t = mask_at(t)
        nxt = alpha[:, :, None] + trans[None, :, :] + em_t[:, None, :]    # (B, T, T)
        mx = jnp.max(nxt, axis=1, keepdims=True)
        lse = mx[:, 0, :] + jnp.log(jnp.sum(jnp.exp(nxt - mx), axis=1))   # (B, T)
        alpha = jnp.where(m_t > 0.0, lse, alpha)
    alpha = alpha + end
    amax = jnp.max(alpha, axis=1, keepdims=True)
    norm = amax + jnp.log(jnp.sum(jnp.exp(alpha - amax), axis=1, keepdims=True))
    llh_ref[...] = num - norm                                             # (B, 1)

    # ---- Viterbi forward (history kept in registers, unrolled) ----
    hist = []
    score = start + em0
    idx3 = lax.broadcasted_iota(jnp.int32, (B, T, T), 1)
    for t in range(1, S):
        em_t = em_at(t)
        m_t = mask_at(t)
        cand = score[:, :, None] + trans[None, :, :] + em_t[:, None, :]   # (B, T, T)
        best = jnp.max(cand, axis=1)                                      # (B, T)
        # first-occurrence argmax over previous tag (matches torch.max semantics)
        bp = jnp.min(jnp.where(cand == best[:, None, :], idx3, T),
                     axis=1).astype(jnp.int32)                            # (B, T)
        hist.append(bp)
        score = jnp.where(m_t > 0.0, best, score)
    score = score + end

    fmax = jnp.max(score, axis=1, keepdims=True)
    best_last = jnp.min(jnp.where(score == fmax, tag_iota, T),
                        axis=1, keepdims=True).astype(jnp.int32)          # (B, 1)

    # ---- Viterbi backtrack (unrolled) ----
    col = lax.broadcasted_iota(jnp.int32, (B, S), 1)
    cur = jnp.zeros((B, 1), jnp.int32)
    out = jnp.zeros((B, S), jnp.int32)
    for t in range(S - 1, -1, -1):
        at_end = seq_end == t
        cur = jnp.where(at_end, best_last, cur)
        valid = t <= seq_end
        out = jnp.where(jnp.logical_and(col == t, valid), cur, out)
        if t >= 1:
            prev = jnp.sum(jnp.where(tag_iota == cur, hist[t - 1], 0),
                           axis=1, keepdims=True)
            cur = jnp.where(valid, prev, cur)
    tags_ref[...] = out


# ======================= top-level forward =======================

def bert_crf_forward(packed, input_ids, tags, attention_mask, token_type_ids):
    """Replicates BertCrf.forward(..., decode=True, reduction='mean') in ONE pallas_call."""
    B, L = input_ids.shape
    tok_type = jnp.concatenate(
        [input_ids.reshape(B * L, 1), token_type_ids.reshape(B * L, 1)],
        axis=1).astype(jnp.int32)                                         # (B*L, 2)
    mask_tags = jnp.concatenate(
        [attention_mask.astype(jnp.int32), tags.astype(jnp.int32)], axis=1)   # (B, 2L)

    kernel = functools.partial(_bert_crf_kernel, batch=B, seq_len=L, num_heads=N_HEADS)
    llh, best_tags = pl.pallas_call(
        kernel,
        out_shape=(jax.ShapeDtypeStruct((B, 1), jnp.float32),
                   jax.ShapeDtypeStruct((B, L - 2), jnp.int32)),
        in_specs=[pl.BlockSpec(memory_space=pltpu.MemorySpace.VMEM)] * 4,
        out_specs=(pl.BlockSpec(memory_space=pltpu.MemorySpace.VMEM),
                   pl.BlockSpec(memory_space=pltpu.MemorySpace.VMEM)),
        compiler_params=pltpu.CompilerParams(vmem_limit_bytes=32 * 1024 * 1024),
    )(tok_type, mask_tags, packed["w_slab"], packed["v_slab"])

    # torchcrf CRF.forward with reduction='mean' returns llh.mean() (positive
    # log-likelihood), which is exactly what BertCrf.forward returns as `loss`.
    loss = jnp.mean(llh[:, 0])
    # torchcrf decode returns a list of variable-length tag lists; here decoded
    # tags come back padded with 0 in a (B, L-2) int32 array; lengths = new_mask.sum(-1).
    seq_lens = jnp.sum(attention_mask[:, 2:], axis=-1)
    return loss, best_tags, seq_lens


# ======================= deterministic parameter init + packing =======================

def init_params(key):
    def nrm(k, shape):
        return 0.02 * jax.random.normal(k, shape, dtype=jnp.float32)
    keys = iter(jax.random.split(key, 64))
    layers = []
    for _ in range(N_LAYERS):
        wq = nrm(next(keys), (HIDDEN, HIDDEN))
        wk = nrm(next(keys), (HIDDEN, HIDDEN))
        wv = nrm(next(keys), (HIDDEN, HIDDEN))
        layers.append(dict(
            wqkv=jnp.concatenate([wq, wk, wv], axis=1),        # fused QKV weight (H, 3H)
            bqkv=jnp.zeros((3 * HIDDEN,), jnp.float32),
            wo=nrm(next(keys), (HIDDEN, HIDDEN)),
            bo=jnp.zeros((HIDDEN,), jnp.float32),
            ln1_g=jnp.ones((HIDDEN,), jnp.float32),
            ln1_b=jnp.zeros((HIDDEN,), jnp.float32),
            w1=nrm(next(keys), (HIDDEN, INTER)),
            b1=jnp.zeros((INTER,), jnp.float32),
            w2=nrm(next(keys), (INTER, HIDDEN)),
            b2=jnp.zeros((HIDDEN,), jnp.float32),
            ln2_g=jnp.ones((HIDDEN,), jnp.float32),
            ln2_b=jnp.zeros((HIDDEN,), jnp.float32),
        ))
    return {
        "word_emb": nrm(next(keys), (VOCAB, HIDDEN)),
        "pos_emb": nrm(next(keys), (MAX_POS, HIDDEN)),
        "type_emb": nrm(next(keys), (TYPE_VOCAB, HIDDEN)),
        "emb_ln_g": jnp.ones((HIDDEN,), jnp.float32),
        "emb_ln_b": jnp.zeros((HIDDEN,), jnp.float32),
        "layers": layers,
        "cls_w": nrm(next(keys), (HIDDEN, NUM_TAGS)),
        "cls_b": jnp.zeros((NUM_TAGS,), jnp.float32),
        # torchcrf init: uniform(-0.1, 0.1)
        "crf_start": jax.random.uniform(next(keys), (NUM_TAGS,), jnp.float32, -0.1, 0.1),
        "crf_end": jax.random.uniform(next(keys), (NUM_TAGS,), jnp.float32, -0.1, 0.1),
        "crf_trans": jax.random.uniform(next(keys), (NUM_TAGS, NUM_TAGS), jnp.float32, -0.1, 0.1),
    }


def pack_params(p):
    """Pack all parameters into two lane-dense (rows, 128) f32 slabs (done once at init)."""
    w = jnp.zeros((W_ROWS, LANES), jnp.float32)
    w = w.at[WORD_OFF:WORD_OFF + VOCAB, 0:HIDDEN].set(p["word_emb"])
    w = w.at[POS_OFF:POS_OFF + MAX_POS, 0:HIDDEN].set(p["pos_emb"])
    w = w.at[TYPE_OFF:TYPE_OFF + TYPE_VOCAB, 0:HIDDEN].set(p["type_emb"])

    v = jnp.zeros((V_ROWS, LANES), jnp.float32)
    v = v.at[V_EMB_G, 0:HIDDEN].set(p["emb_ln_g"])
    v = v.at[V_EMB_B, 0:HIDDEN].set(p["emb_ln_b"])

    for l, lay in enumerate(p["layers"]):
        base = LAYER_OFF + l * LAYER_ROWS
        w = w.at[base + QKV_ROFF:base + QKV_ROFF + HIDDEN, 0:3 * HIDDEN].set(lay["wqkv"])
        w = w.at[base + WO_ROFF:base + WO_ROFF + HIDDEN, 0:HIDDEN].set(lay["wo"])
        w = w.at[base + W1_ROFF:base + W1_ROFF + HIDDEN, 0:INTER].set(lay["w1"])
        w = w.at[base + W2_ROFF:base + W2_ROFF + INTER, 0:HIDDEN].set(lay["w2"])
        vb = V_LAYER0 + l * V_PER_LAYER
        v = v.at[vb + 0, 0:3 * HIDDEN].set(lay["bqkv"])
        v = v.at[vb + 1, 0:HIDDEN].set(lay["bo"])
        v = v.at[vb + 2, 0:HIDDEN].set(lay["ln1_g"])
        v = v.at[vb + 3, 0:HIDDEN].set(lay["ln1_b"])
        v = v.at[vb + 4, 0:INTER].set(lay["b1"])
        v = v.at[vb + 5, 0:HIDDEN].set(lay["b2"])
        v = v.at[vb + 6, 0:HIDDEN].set(lay["ln2_g"])
        v = v.at[vb + 7, 0:HIDDEN].set(lay["ln2_b"])

    w = w.at[CLS_OFF:CLS_OFF + HIDDEN, 0:NUM_TAGS].set(p["cls_w"])
    v = v.at[V_CLS_B, 0:NUM_TAGS].set(p["cls_b"])
    v = v.at[V_CRF_START, 0:NUM_TAGS].set(p["crf_start"])
    v = v.at[V_CRF_END, 0:NUM_TAGS].set(p["crf_end"])
    v = v.at[V_CRF_TRANS:V_CRF_TRANS + NUM_TAGS, 0:NUM_TAGS].set(p["crf_trans"])
    return {"w_slab": w, "v_slab": v}


if __name__ == "__main__":
    params = pack_params(init_params(jax.random.PRNGKey(42)))

    B, L = 2, 8
    key = jax.random.PRNGKey(0)
    k1, k2 = jax.random.split(key, 2)
    input_ids = jax.random.randint(k1, (B, L), 0, VOCAB, dtype=jnp.int32)
    token_type_ids = jnp.zeros((B, L), jnp.int32)
    lengths = jnp.array([L, L - 2], jnp.int32)          # second sequence is padded
    attention_mask = (jnp.arange(L)[None, :] < lengths[:, None]).astype(jnp.int32)
    tags = jax.random.randint(k2, (B, L), 0, NUM_TAGS, dtype=jnp.int32)

    fwd = jax.jit(bert_crf_forward)
    loss, decoded_tags, seq_lens = fwd(params, input_ids, tags,
                                       attention_mask, token_type_ids)
    jax.block_until_ready((loss, decoded_tags, seq_lens))
    print("KERNEL_OK")
</pallas_src>

<mosaic_0001>
module attributes {stable_mosaic.version = 11 : i64} {
  func.func @_bert_crf_kernel(%arg0: memref<16x2xi32, #tpu.memory_space<vmem>>, %arg1: memref<2x16xi32, #tpu.memory_space<vmem>>, %arg2: memref<448x128xf32, #tpu.memory_space<vmem>>, %arg3: memref<24x128xf32, #tpu.memory_space<vmem>>, %arg4: memref<2x1xf32, #tpu.memory_space<vmem>>, %arg5: memref<2x6xi32, #tpu.memory_space<vmem>>) attributes {dimension_semantics = [], scalar_prefetch = 0 : i64, scratch_operands = 0 : i64, tpu.core_type = #tpu.core_type<tc>} {
    %c0 = arith.constant 0 : index
    %c0_0 = arith.constant 0 : index
    %0 = vector.load %arg0[%c0, %c0_0] : memref<16x2xi32, #tpu.memory_space<vmem>>, vector<16x1xi32>
    %c0_1 = arith.constant 0 : index
    %c1 = arith.constant 1 : index
    %1 = vector.load %arg0[%c0_1, %c1] : memref<16x2xi32, #tpu.memory_space<vmem>>, vector<16x1xi32>
    %2 = tpu.iota {dimensions = array<i32: 1>} : vector<16x56xi32>
    %3 = vector.broadcast %0 : vector<16x1xi32> to vector<16x56xi32>
    %4 = arith.cmpi eq, %3, %2 : vector<16x56xi32>
    %5 = arith.extui %4 : vector<16x56xi1> to vector<16x56xi32>
    %6 = arith.sitofp %5 : vector<16x56xi32> to vector<16x56xf32>
    %c0_2 = arith.constant 0 : index
    %c0_3 = arith.constant 0 : index
    %7 = vector.load %arg2[%c0_2, %c0_3] : memref<448x128xf32, #tpu.memory_space<vmem>>, vector<56x32xf32>
    %cst = arith.constant dense<0.000000e+00> : vector<16x32xf32>
    %8 = tpu.matmul %6, %7, %cst {dimension_numbers = #tpu.dot_dimension_numbers<[1], [0], [0], [1], [0, 0, 1, 1], [], []>} : vector<16x56xf32>, vector<56x32xf32>, vector<16x32xf32> -> vector<16x32xf32>
    %9 = tpu.iota {dimensions = array<i32: 1>} : vector<16x8xi32>
    %10 = vector.broadcast %1 : vector<16x1xi32> to vector<16x8xi32>
    %11 = arith.cmpi eq, %10, %9 : vector<16x8xi32>
    %12 = arith.extui %11 : vector<16x8xi1> to vector<16x8xi32>
    %13 = arith.sitofp %12 : vector<16x8xi32> to vector<16x8xf32>
    %c88 = arith.constant 88 : index
    %c0_4 = arith.constant 0 : index
    %14 = vector.load %arg2[%c88, %c0_4] : memref<448x128xf32, #tpu.memory_space<vmem>>, vector<8x32xf32>
    %cst_5 = arith.constant dense<0.000000e+00> : vector<16x32xf32>
    %15 = tpu.matmul %13, %14, %cst_5 {dimension_numbers = #tpu.dot_dimension_numbers<[1], [0], [0], [1], [0, 0, 1, 1], [], []>} : vector<16x8xf32>, vector<8x32xf32>, vector<16x32xf32> -> vector<16x32xf32>
    %16 = arith.addf %8, %15 : vector<16x32xf32>
    %c56 = arith.constant 56 : index
    %c0_6 = arith.constant 0 : index
    %17 = vector.load %arg2[%c56, %c0_6] : memref<448x128xf32, #tpu.memory_space<vmem>>, vector<8x32xf32>
    %18 = vector.shape_cast %16 : vector<16x32xf32> to vector<2x8x32xf32>
    %19 = vector.shape_cast %17 : vector<8x32xf32> to vector<1x8x32xf32>
    %20 = vector.broadcast %19 : vector<1x8x32xf32> to vector<2x8x32xf32>
    %21 = arith.addf %18, %20 : vector<2x8x32xf32>
    %22 = vector.shape_cast %21 : vector<2x8x32xf32> to vector<16x32xf32>
    %c0_7 = arith.constant 0 : index
    %c0_8 = arith.constant 0 : index
    %23 = vector.load %arg3[%c0_7, %c0_8] : memref<24x128xf32, #tpu.memory_space<vmem>>, vector<1x32xf32>
    %c1_9 = arith.constant 1 : index
    %c0_10 = arith.constant 0 : index
    %24 = vector.load %arg3[%c1_9, %c0_10] : memref<24x128xf32, #tpu.memory_space<vmem>>, vector<1x32xf32>
    %cst_11 = arith.constant dense<0.000000e+00> : vector<16xf32>
    %25 = vector.multi_reduction <add>, %22, %cst_11 [1] : vector<16x32xf32> to vector<16xf32>
    %26 = vector.shape_cast %25 : vector<16xf32> to vector<16x1xf32>
    %cst_12 = arith.constant 3.200000e+01 : f32
    %27 = vector.broadcast %cst_12 : f32 to vector<16x1xf32>
    %28 = arith.divf %26, %27 : vector<16x1xf32>
    %29 = vector.broadcast %28 : vector<16x1xf32> to vector<16x32xf32>
    %30 = arith.subf %22, %29 : vector<16x32xf32>
    %31 = arith.mulf %30, %30 : vector<16x32xf32>
    %cst_13 = arith.constant dense<0.000000e+00> : vector<16xf32>
    %32 = vector.multi_reduction <add>, %31, %cst_13 [1] : vector<16x32xf32> to vector<16xf32>
    %33 = vector.shape_cast %32 : vector<16xf32> to vector<16x1xf32>
    %cst_14 = arith.constant 3.200000e+01 : f32
    %34 = vector.broadcast %cst_14 : f32 to vector<16x1xf32>
    %35 = arith.divf %33, %34 : vector<16x1xf32>
    %36 = vector.broadcast %28 : vector<16x1xf32> to vector<16x32xf32>
    %37 = arith.subf %22, %36 : vector<16x32xf32>
    %cst_15 = arith.constant 9.99999996E-13 : f32
    %38 = vector.broadcast %cst_15 : f32 to vector<16x1xf32>
    %39 = arith.addf %35, %38 : vector<16x1xf32>
    %40 = math.rsqrt %39 : vector<16x1xf32>
    %41 = vector.broadcast %40 : vector<16x1xf32> to vector<16x32xf32>
    %42 = arith.mulf %37, %41 : vector<16x32xf32>
    %43 = vector.broadcast %23 : vector<1x32xf32> to vector<16x32xf32>
    %44 = arith.mulf %42, %43 : vector<16x32xf32>
    %45 = vector.broadcast %24 : vector<1x32xf32> to vector<16x32xf32>
    %46 = arith.addf %44, %45 : vector<16x32xf32>
    %c0_16 = arith.constant 0 : index
    %c0_17 = arith.constant 0 : index
    %47 = vector.load %arg1[%c0_16, %c0_17] : memref<2x16xi32, #tpu.memory_space<vmem>>, vector<2x8xi32>
    %48 = arith.sitofp %47 : vector<2x8xi32> to vector<2x8xf32>
    %cst_18 = arith.constant 1.000000e+00 : f32
    %49 = vector.broadcast %cst_18 : f32 to vector<2x8xf32>
    %50 = arith.subf %49, %48 : vector<2x8xf32>
    %cst_19 = arith.constant -1.000000e+04 : f32
    %51 = vector.broadcast %cst_19 : f32 to vector<2x8xf32>
    %52 = arith.mulf %50, %51 : vector<2x8xf32>
    %53 = vector.shape_cast %52 : vector<2x8xf32> to vector<2x1x8xf32>
    %c96 = arith.constant 96 : index
    %c0_20 = arith.constant 0 : index
    %54 = vector.load %arg2[%c96, %c0_20] : memref<448x128xf32, #tpu.memory_space<vmem>>, vector<32x96xf32>
    %cst_21 = arith.constant dense<0.000000e+00> : vector<16x96xf32>
    %55 = tpu.matmul %46, %54, %cst_21 {dimension_numbers = #tpu.dot_dimension_numbers<[1], [0], [0], [1], [0, 0, 1, 1], [], []>} : vector<16x32xf32>, vector<32x96xf32>, vector<16x96xf32> -> vector<16x96xf32>
    %c2 = arith.constant 2 : index
    %c0_22 = arith.constant 0 : index
    %56 = vector.load %arg3[%c2, %c0_22] : memref<24x128xf32, #tpu.memory_space<vmem>>, vector<1x96xf32>
    %57 = vector.broadcast %56 : vector<1x96xf32> to vector<16x96xf32>
    %58 = arith.addf %55, %57 : vector<16x96xf32>
    %cst_23 = arith.constant 0.000000e+00 : f32
    %59 = vector.broadcast %cst_23 : f32 to vector<16x32xf32>
    %60 = vector.extract_strided_slice %58 {offsets = [0, 0], sizes = [16, 16], strides = [1, 1]} : vector<16x96xf32> to vector<16x16xf32>
    %61 = vector.shape_cast %60 : vector<16x16xf32> to vector<2x8x16xf32>
    %62 = vector.extract_strided_slice %58 {offsets = [0, 32], sizes = [16, 16], strides = [1, 1]} : vector<16x96xf32> to vector<16x16xf32>
    %63 = vector.shape_cast %62 : vector<16x16xf32> to vector<2x8x16xf32>
    %64 = vector.extract_strided_slice %58 {offsets = [0, 64], sizes = [16, 16], strides = [1, 1]} : vector<16x96xf32> to vector<16x16xf32>
    %65 = vector.shape_cast %64 : vector<16x16xf32> to vector<2x8x16xf32>
    "tpu.trace_start"() <{level = 10 : i32, message = "bqd,bkd->bqk"}> : () -> ()
    %cst_24 = arith.constant dense<0.000000e+00> : vector<2x8x8xf32>
    %66 = tpu.matmul %61, %63, %cst_24 {dimension_numbers = #tpu.dot_dimension_numbers<[2], [2], [1], [1], [0, 0, 0, 1, 1, 1], [0], [0]>} : vector<2x8x16xf32>, vector<2x8x16xf32>, vector<2x8x8xf32> -> vector<2x8x8xf32>
    "tpu.trace_stop"() : () -> ()
    %cst_25 = arith.constant 2.500000e-01 : f32
    %67 = vector.broadcast %cst_25 : f32 to vector<2x8x8xf32>
    %68 = arith.mulf %66, %67 : vector<2x8x8xf32>
    %69 = vector.broadcast %53 : vector<2x1x8xf32> to vector<2x8x8xf32>
    %70 = arith.addf %68, %69 : vector<2x8x8xf32>
    %cst_26 = arith.constant dense<0xFF800000> : vector<2x8xf32>
    %71 = vector.multi_reduction <maximumf>, %70, %cst_26 [2] : vector<2x8x8xf32> to vector<2x8xf32>
    %72 = vector.shape_cast %71 : vector<2x8xf32> to vector<2x8x1xf32>
    %73 = vector.broadcast %72 : vector<2x8x1xf32> to vector<2x8x8xf32>
    %74 = arith.subf %70, %73 : vector<2x8x8xf32>
    %75 = math.exp %74 : vector<2x8x8xf32>
    %cst_27 = arith.constant dense<0.000000e+00> : vector<2x8xf32>
    %76 = vector.multi_reduction <add>, %75, %cst_27 [2] : vector<2x8x8xf32> to vector<2x8xf32>
    %77 = vector.shape_cast %76 : vector<2x8xf32> to vector<2x8x1xf32>
    %78 = tpu.reciprocal %77 {approx = true} : vector<2x8x1xf32> -> vector<2x8x1xf32>
    %79 = vector.broadcast %78 : vector<2x8x1xf32> to vector<2x8x8xf32>
    %80 = arith.mulf %75, %79 : vector<2x8x8xf32>
    "tpu.trace_start"() <{level = 10 : i32, message = "bqk,bkd->bqd"}> : () -> ()
    %cst_28 = arith.constant dense<0.000000e+00> : vector<2x8x16xf32>
    %81 = tpu.matmul %80, %65, %cst_28 {dimension_numbers = #tpu.dot_dimension_numbers<[2], [1], [1], [2], [0, 0, 0, 1, 1, 2], [0], [0]>} : vector<2x8x8xf32>, vector<2x8x16xf32>, vector<2x8x16xf32> -> vector<2x8x16xf32>
    "tpu.trace_stop"() : () -> ()
    %82 = vector.shape_cast %81 : vector<2x8x16xf32> to vector<16x16xf32>
    %c128 = arith.constant 128 : index
    %c0_29 = arith.constant 0 : index
    %83 = vector.load %arg2[%c128, %c0_29] : memref<448x128xf32, #tpu.memory_space<vmem>>, vector<16x32xf32>
    %cst_30 = arith.constant dense<0.000000e+00> : vector<16x32xf32>
    %84 = tpu.matmul %82, %83, %cst_30 {dimension_numbers = #tpu.dot_dimension_numbers<[1], [0], [0], [1], [0, 0, 1, 1], [], []>} : vector<16x16xf32>, vector<16x32xf32>, vector<16x32xf32> -> vector<16x32xf32>
    %85 = arith.addf %59, %84 : vector<16x32xf32>
    %86 = vector.extract_strided_slice %58 {offsets = [0, 16], sizes = [16, 16], strides = [1, 1]} : vector<16x96xf32> to vector<16x16xf32>
    %87 = vector.shape_cast %86 : vector<16x16xf32> to vector<2x8x16xf32>
    %88 = vector.extract_strided_slice %58 {offsets = [0, 48], sizes = [16, 16], strides = [1, 1]} : vector<16x96xf32> to vector<16x16xf32>
    %89 = vector.shape_cast %88 : vector<16x16xf32> to vector<2x8x16xf32>
    %90 = vector.extract_strided_slice %58 {offsets = [0, 80], sizes = [16, 16], strides = [1, 1]} : vector<16x96xf32> to vector<16x16xf32>
    %91 = vector.shape_cast %90 : vector<16x16xf32> to vector<2x8x16xf32>
    "tpu.trace_start"() <{level = 10 : i32, message = "bqd,bkd->bqk"}> : () -> ()
    %cst_31 = arith.constant dense<0.000000e+00> : vector<2x8x8xf32>
    %92 = tpu.matmul %87, %89, %cst_31 {dimension_numbers = #tpu.dot_dimension_numbers<[2], [2], [1], [1], [0, 0, 0, 1, 1, 1], [0], [0]>} : vector<2x8x16xf32>, vector<2x8x16xf32>, vector<2x8x8xf32> -> vector<2x8x8xf32>
    "tpu.trace_stop"() : () -> ()
    %cst_32 = arith.constant 2.500000e-01 : f32
    %93 = vector.broadcast %cst_32 : f32 to vector<2x8x8xf32>
    %94 = arith.mulf %92, %93 : vector<2x8x8xf32>
    %95 = vector.broadcast %53 : vector<2x1x8xf32> to vector<2x8x8xf32>
    %96 = arith.addf %94, %95 : vector<2x8x8xf32>
    %cst_33 = arith.constant dense<0xFF800000> : vector<2x8xf32>
    %97 = vector.multi_reduction <maximumf>, %96, %cst_33 [2] : vector<2x8x8xf32> to vector<2x8xf32>
    %98 = vector.shape_cast %97 : vector<2x8xf32> to vector<2x8x1xf32>
    %99 = vector.broadcast %98 : vector<2x8x1xf32> to vector<2x8x8xf32>
    %100 = arith.subf %96, %99 : vector<2x8x8xf32>
    %101 = math.exp %100 : vector<2x8x8xf32>
    %cst_34 = arith.constant dense<0.000000e+00> : vector<2x8xf32>
    %102 = vector.multi_reduction <add>, %101, %cst_34 [2] : vector<2x8x8xf32> to vector<2x8xf32>
    %103 = vector.shape_cast %102 : vector<2x8xf32> to vector<2x8x1xf32>
    %104 = tpu.reciprocal %103 {approx = true} : vector<2x8x1xf32> -> vector<2x8x1xf32>
    %105 = vector.broadcast %104 : vector<2x8x1xf32> to vector<2x8x8xf32>
    %106 = arith.mulf %101, %105 : vector<2x8x8xf32>
    "tpu.trace_start"() <{level = 10 : i32, message = "bqk,bkd->bqd"}> : () -> ()
    %cst_35 = arith.constant dense<0.000000e+00> : vector<2x8x16xf32>
    %107 = tpu.matmul %106, %91, %cst_35 {dimension_numbers = #tpu.dot_dimension_numbers<[2], [1], [1], [2], [0, 0, 0, 1, 1, 2], [0], [0]>} : vector<2x8x8xf32>, vector<2x8x16xf32>, vector<2x8x16xf32> -> vector<2x8x16xf32>
    "tpu.trace_stop"() : () -> ()
    %108 = vector.shape_cast %107 : vector<2x8x16xf32> to vector<16x16xf32>
    %c144 = arith.constant 144 : index
    %c0_36 = arith.constant 0 : index
    %109 = vector.load %arg2[%c144, %c0_36] : memref<448x128xf32, #tpu.memory_space<vmem>>, vector<16x32xf32>
    %cst_37 = arith.constant dense<0.000000e+00> : vector<16x32xf32>
    %110 = tpu.matmul %108, %109, %cst_37 {dimension_numbers = #tpu.dot_dimension_numbers<[1], [0], [0], [1], [0, 0, 1, 1], [], []>} : vector<16x16xf32>, vector<16x32xf32>, vector<16x32xf32> -> vector<16x32xf32>
    %111 = arith.addf %85, %110 : vector<16x32xf32>
    %c3 = arith.constant 3 : index
    %c0_38 = arith.constant 0 : index
    %112 = vector.load %arg3[%c3, %c0_38] : memref<24x128xf32, #tpu.memory_space<vmem>>, vector<1x32xf32>
    %113 = vector.broadcast %112 : vector<1x32xf32> to vector<16x32xf32>
    %114 = arith.addf %111, %113 : vector<16x32xf32>
    %115 = arith.addf %46, %114 : vector<16x32xf32>
    %c4 = arith.constant 4 : index
    %c0_39 = arith.constant 0 : index
    %116 = vector.load %arg3[%c4, %c0_39] : memref<24x128xf32, #tpu.memory_space<vmem>>, vector<1x32xf32>
    %c5 = arith.constant 5 : index
    %c0_40 = arith.constant 0 : index
    %117 = vector.load %arg3[%c5, %c0_40] : memref<24x128xf32, #tpu.memory_space<vmem>>, vector<1x32xf32>
    %cst_41 = arith.constant dense<0.000000e+00> : vector<16xf32>
    %118 = vector.multi_reduction <add>, %115, %cst_41 [1] : vector<16x32xf32> to vector<16xf32>
    %119 = vector.shape_cast %118 : vector<16xf32> to vector<16x1xf32>
    %cst_42 = arith.constant 3.200000e+01 : f32
    %120 = vector.broadcast %cst_42 : f32 to vector<16x1xf32>
    %121 = arith.divf %119, %120 : vector<16x1xf32>
    %122 = vector.broadcast %121 : vector<16x1xf32> to vector<16x32xf32>
    %123 = arith.subf %115, %122 : vector<16x32xf32>
    %124 = arith.mulf %123, %123 : vector<16x32xf32>
    %cst_43 = arith.constant dense<0.000000e+00> : vector<16xf32>
    %125 = vector.multi_reduction <add>, %124, %cst_43 [1] : vector<16x32xf32> to vector<16xf32>
    %126 = vector.shape_cast %125 : vector<16xf32> to vector<16x1xf32>
    %cst_44 = arith.constant 3.200000e+01 : f32
    %127 = vector.broadcast %cst_44 : f32 to vector<16x1xf32>
    %128 = arith.divf %126, %127 : vector<16x1xf32>
    %129 = vector.broadcast %121 : vector<16x1xf32> to vector<16x32xf32>
    %130 = arith.subf %115, %129 : vector<16x32xf32>
    %cst_45 = arith.constant 9.99999996E-13 : f32
    %131 = vector.broadcast %cst_45 : f32 to vector<16x1xf32>
    %132 = arith.addf %128, %131 : vector<16x1xf32>
    %133 = math.rsqrt %132 : vector<16x1xf32>
    %134 = vector.broadcast %133 : vector<16x1xf32> to vector<16x32xf32>
    %135 = arith.mulf %130, %134 : vector<16x32xf32>
    %136 = vector.broadcast %116 : vector<1x32xf32> to vector<16x32xf32>
    %137 = arith.mulf %135, %136 : vector<16x32xf32>
    %138 = vector.broadcast %117 : vector<1x32xf32> to vector<16x32xf32>
    %139 = arith.addf %137, %138 : vector<16x32xf32>
    %c160 = arith.constant 160 : index
    %c0_46 = arith.constant 0 : index
    %140 = vector.load %arg2[%c160, %c0_46] : memref<448x128xf32, #tpu.memory_space<vmem>>, vector<32x64xf32>
    %cst_47 = arith.constant dense<0.000000e+00> : vector<16x64xf32>
    %141 = tpu.matmul %139, %140, %cst_47 {dimension_numbers = #tpu.dot_dimension_numbers<[1], [0], [0], [1], [0, 0, 1, 1], [], []>} : vector<16x32xf32>, vector<32x64xf32>, vector<16x64xf32> -> vector<16x64xf32>
    %c6 = arith.constant 6 : index
    %c0_48 = arith.constant 0 : index
    %142 = vector.load %arg3[%c6, %c0_48] : memref<24x128xf32, #tpu.memory_space<vmem>>, vector<1x64xf32>
    %143 = vector.broadcast %142 : vector<1x64xf32> to vector<16x64xf32>
    %144 = arith.addf %141, %143 : vector<16x64xf32>
    %cst_49 = arith.constant 5.000000e-01 : f32
    %145 = vector.broadcast %cst_49 : f32 to vector<16x64xf32>
    %146 = arith.mulf %145, %144 : vector<16x64xf32>
    %cst_50 = arith.constant 0.707106769 : f32
    %147 = vector.broadcast %cst_50 : f32 to vector<16x64xf32>
    %148 = arith.mulf %144, %147 : vector<16x64xf32>
    %cst_51 = arith.constant 0.000000e+00 : f32
    %149 = vector.broadcast %cst_51 : f32 to vector<16x64xf32>
    %150 = arith.cmpf oge, %148, %149 : vector<16x64xf32>
    %cst_52 = arith.constant 1.000000e+00 : f32
    %cst_53 = arith.constant -1.000000e+00 : f32
    %151 = vector.broadcast %cst_52 : f32 to vector<16x64xf32>
    %152 = vector.broadcast %cst_53 : f32 to vector<16x64xf32>
    %153 = arith.select %150, %151, %152 : vector<16x64xi1>, vector<16x64xf32>
    %154 = math.absf %148 : vector<16x64xf32>
    %cst_54 = arith.constant 0.327591091 : f32
    %155 = vector.broadcast %cst_54 : f32 to vector<16x64xf32>
    %156 = arith.mulf %155, %154 : vector<16x64xf32>
    %cst_55 = arith.constant 1.000000e+00 : f32
    %157 = vector.broadcast %cst_55 : f32 to vector<16x64xf32>
    %158 = arith.addf %157, %156 : vector<16x64xf32>
    %cst_56 = arith.constant 1.000000e+00 : f32
    %159 = vector.broadcast %cst_56 : f32 to vector<16x64xf32>
    %160 = arith.divf %159, %158 : vector<16x64xf32>
    %cst_57 = arith.constant 1.06140542 : f32
    %161 = vector.broadcast %cst_57 : f32 to vector<16x64xf32>
    %162 = arith.mulf %161, %160 : vector<16x64xf32>
    %cst_58 = arith.constant -1.45315206 : f32
    %163 = vector.broadcast %cst_58 : f32 to vector<16x64xf32>
    %164 = arith.addf %162, %163 : vector<16x64xf32>
    %165 = arith.mulf %164, %160 : vector<16x64xf32>
    %cst_59 = arith.constant 1.42141378 : f32
    %166 = vector.broadcast %cst_59 : f32 to vector<16x64xf32>
    %167 = arith.addf %165, %166 : vector<16x64xf32>
    %168 = arith.mulf %167, %160 : vector<16x64xf32>
    %cst_60 = arith.constant -0.284496725 : f32
    %169 = vector.broadcast %cst_60 : f32 to vector<16x64xf32>
    %170 = arith.addf %168, %169 : vector<16x64xf32>
    %171 = arith.mulf %170, %160 : vector<16x64xf32>
    %cst_61 = arith.constant 0.254829586 : f32
    %172 = vector.broadcast %cst_61 : f32 to vector<16x64xf32>
    %173 = arith.addf %171, %172 : vector<16x64xf32>
    %174 = arith.mulf %173, %160 : vector<16x64xf32>
    %cst_62 = arith.constant 0.000000e+00 : f32
    %175 = vector.broadcast %cst_62 : f32 to vector<16x64xf32>
    %176 = arith.subf %175, %154 : vector<16x64xf32>
    %177 = arith.mulf %176, %154 : vector<16x64xf32>
    %178 = math.exp %177 : vector<16x64xf32>
    %179 = arith.mulf %174, %178 : vector<16x64xf32>
    %cst_63 = arith.constant 1.000000e+00 : f32
    %180 = vector.broadcast %cst_63 : f32 to vector<16x64xf32>
    %181 = arith.subf %180, %179 : vector<16x64xf32>
    %182 = arith.mulf %153, %181 : vector<16x64xf32>
    %cst_64 = arith.constant 1.000000e+00 : f32
    %183 = vector.broadcast %cst_64 : f32 to vector<16x64xf32>
    %184 = arith.addf %183, %182 : vector<16x64xf32>
    %185 = arith.mulf %146, %184 : vector<16x64xf32>
    %c192 = arith.constant 192 : index
    %c0_65 = arith.constant 0 : index
    %186 = vector.load %arg2[%c192, %c0_65] : memref<448x128xf32, #tpu.memory_space<vmem>>, vector<64x32xf32>
    %cst_66 = arith.constant dense<0.000000e+00> : vector<16x32xf32>
    %187 = tpu.matmul %185, %186, %cst_66 {dimension_numbers = #tpu.dot_dimension_numbers<[1], [0], [0], [1], [0, 0, 1, 1], [], []>} : vector<16x64xf32>, vector<64x32xf32>, vector<16x32xf32> -> vector<16x32xf32>
    %c7 = arith.constant 7 : index
    %c0_67 = arith.constant 0 : index
    %188 = vector.load %arg3[%c7, %c0_67] : memref<24x128xf32, #tpu.memory_space<vmem>>, vector<1x32xf32>
    %189 = vector.broadcast %188 : vector<1x32xf32> to vector<16x32xf32>
    %190 = arith.addf %187, %189 : vector<16x32xf32>
    %191 = arith.addf %139, %190 : vector<16x32xf32>
    %c8 = arith.constant 8 : index
    %c0_68 = arith.constant 0 : index
    %192 = vector.load %arg3[%c8, %c0_68] : memref<24x128xf32, #tpu.memory_space<vmem>>, vector<1x32xf32>
    %c9 = arith.constant 9 : index
    %c0_69 = arith.constant 0 : index
    %193 = vector.load %arg3[%c9, %c0_69] : memref<24x128xf32, #tpu.memory_space<vmem>>, vector<1x32xf32>
    %cst_70 = arith.constant dense<0.000000e+00> : vector<16xf32>
    %194 = vector.multi_reduction <add>, %191, %cst_70 [1] : vector<16x32xf32> to vector<16xf32>
    %195 = vector.shape_cast %194 : vector<16xf32> to vector<16x1xf32>
    %cst_71 = arith.constant 3.200000e+01 : f32
    %196 = vector.broadcast %cst_71 : f32 to vector<16x1xf32>
    %197 = arith.divf %195, %196 : vector<16x1xf32>
    %198 = vector.broadcast %197 : vector<16x1xf32> to vector<16x32xf32>
    %199 = arith.subf %191, %198 : vector<16x32xf32>
    %200 = arith.mulf %199, %199 : vector<16x32xf32>
    %cst_72 = arith.constant dense<0.000000e+00> : vector<16xf32>
    %201 = vector.multi_reduction <add>, %200, %cst_72 [1] : vector<16x32xf32> to vector<16xf32>
    %202 = vector.shape_cast %201 : vector<16xf32> to vector<16x1xf32>
    %cst_73 = arith.constant 3.200000e+01 : f32
    %203 = vector.broadcast %cst_73 : f32 to vector<16x1xf32>
    %204 = arith.divf %202, %203 : vector<16x1xf32>
    %205 = vector.broadcast %197 : vector<16x1xf32> to vector<16x32xf32>
    %206 = arith.subf %191, %205 : vector<16x32xf32>
    %cst_74 = arith.constant 9.99999996E-13 : f32
    %207 = vector.broadcast %cst_74 : f32 to vector<16x1xf32>
    %208 = arith.addf %204, %207 : vector<16x1xf32>
    %209 = math.rsqrt %208 : vector<16x1xf32>
    %210 = vector.broadcast %209 : vector<16x1xf32> to vector<16x32xf32>
    %211 = arith.mulf %206, %210 : vector<16x32xf32>
    %212 = vector.broadcast %192 : vector<1x32xf32> to vector<16x32xf32>
    %213 = arith.mulf %211, %212 : vector<16x32xf32>
    %214 = vector.broadcast %193 : vector<1x32xf32> to vector<16x32xf32>
    %215 = arith.addf %213, %214 : vector<16x32xf32>
    %c256 = arith.constant 256 : index
    %c0_75 = arith.constant 0 : index
    %216 = vector.load %arg2[%c256, %c0_75] : memref<448x128xf32, #tpu.memory_space<vmem>>, vector<32x96xf32>
    %cst_76 = arith.constant dense<0.000000e+00> : vector<16x96xf32>
    %217 = tpu.matmul %215, %216, %cst_76 {dimension_numbers = #tpu.dot_dimension_numbers<[1], [0], [0], [1], [0, 0, 1, 1], [], []>} : vector<16x32xf32>, vector<32x96xf32>, vector<16x96xf32> -> vector<16x96xf32>
    %c10 = arith.constant 10 : index
    %c0_77 = arith.constant 0 : index
    %218 = vector.load %arg3[%c10, %c0_77] : memref<24x128xf32, #tpu.memory_space<vmem>>, vector<1x96xf32>
    %219 = vector.broadcast %218 : vector<1x96xf32> to vector<16x96xf32>
    %220 = arith.addf %217, %219 : vector<16x96xf32>
    %cst_78 = arith.constant 0.000000e+00 : f32
    %221 = vector.broadcast %cst_78 : f32 to vector<16x32xf32>
    %222 = vector.extract_strided_slice %220 {offsets = [0, 0], sizes = [16, 16], strides = [1, 1]} : vector<16x96xf32> to vector<16x16xf32>
    %223 = vector.shape_cast %222 : vector<16x16xf32> to vector<2x8x16xf32>
    %224 = vector.extract_strided_slice %220 {offsets = [0, 32], sizes = [16, 16], strides = [1, 1]} : vector<16x96xf32> to vector<16x16xf32>
    %225 = vector.shape_cast %224 : vector<16x16xf32> to vector<2x8x16xf32>
    %226 = vector.extract_strided_slice %220 {offsets = [0, 64], sizes = [16, 16], strides = [1, 1]} : vector<16x96xf32> to vector<16x16xf32>
    %227 = vector.shape_cast %226 : vector<16x16xf32> to vector<2x8x16xf32>
    "tpu.trace_start"() <{level = 10 : i32, message = "bqd,bkd->bqk"}> : () -> ()
    %cst_79 = arith.constant dense<0.000000e+00> : vector<2x8x8xf32>
    %228 = tpu.matmul %223, %225, %cst_79 {dimension_numbers = #tpu.dot_dimension_numbers<[2], [2], [1], [1], [0, 0, 0, 1, 1, 1], [0], [0]>} : vector<2x8x16xf32>, vector<2x8x16xf32>, vector<2x8x8xf32> -> vector<2x8x8xf32>
    "tpu.trace_stop"() : () -> ()
    %cst_80 = arith.constant 2.500000e-01 : f32
    %229 = vector.broadcast %cst_80 : f32 to vector<2x8x8xf32>
    %230 = arith.mulf %228, %229 : vector<2x8x8xf32>
    %231 = vector.broadcast %53 : vector<2x1x8xf32> to vector<2x8x8xf32>
    %232 = arith.addf %230, %231 : vector<2x8x8xf32>
    %cst_81 = arith.constant dense<0xFF800000> : vector<2x8xf32>
    %233 = vector.multi_reduction <maximumf>, %232, %cst_81 [2] : vector<2x8x8xf32> to vector<2x8xf32>
    %234 = vector.shape_cast %233 : vector<2x8xf32> to vector<2x8x1xf32>
    %235 = vector.broadcast %234 : vector<2x8x1xf32> to vector<2x8x8xf32>
    %236 = arith.subf %232, %235 : vector<2x8x8xf32>
    %237 = math.exp %236 : vector<2x8x8xf32>
    %cst_82 = arith.constant dense<0.000000e+00> : vector<2x8xf32>
    %238 = vector.multi_reduction <add>, %237, %cst_82 [2] : vector<2x8x8xf32> to vector<2x8xf32>
    %239 = vector.shape_cast %238 : vector<2x8xf32> to vector<2x8x1xf32>
    %240 = tpu.reciprocal %239 {approx = true} : vector<2x8x1xf32> -> vector<2x8x1xf32>
    %241 = vector.broadcast %240 : vector<2x8x1xf32> to vector<2x8x8xf32>
    %242 = arith.mulf %237, %241 : vector<2x8x8xf32>
    "tpu.trace_start"() <{level = 10 : i32, message = "bqk,bkd->bqd"}> : () -> ()
    %cst_83 = arith.constant dense<0.000000e+00> : vector<2x8x16xf32>
    %243 = tpu.matmul %242, %227, %cst_83 {dimension_numbers = #tpu.dot_dimension_numbers<[2], [1], [1], [2], [0, 0, 0, 1, 1, 2], [0], [0]>} : vector<2x8x8xf32>, vector<2x8x16xf32>, vector<2x8x16xf32> -> vector<2x8x16xf32>
    "tpu.trace_stop"() : () -> ()
    %244 = vector.shape_cast %243 : vector<2x8x16xf32> to vector<16x16xf32>
    %c288 = arith.constant 288 : index
    %c0_84 = arith.constant 0 : index
    %245 = vector.load %arg2[%c288, %c0_84] : memref<448x128xf32, #tpu.memory_space<vmem>>, vector<16x32xf32>
    %cst_85 = arith.constant dense<0.000000e+00> : vector<16x32xf32>
    %246 = tpu.matmul %244, %245, %cst_85 {dimension_numbers = #tpu.dot_dimension_numbers<[1], [0], [0], [1], [0, 0, 1, 1], [], []>} : vector<16x16xf32>, vector<16x32xf32>, vector<16x32xf32> -> vector<16x32xf32>
    %247 = arith.addf %221, %246 : vector<16x32xf32>
    %248 = vector.extract_strided_slice %220 {offsets = [0, 16], sizes = [16, 16], strides = [1, 1]} : vector<16x96xf32> to vector<16x16xf32>
    %249 = vector.shape_cast %248 : vector<16x16xf32> to vector<2x8x16xf32>
    %250 = vector.extract_strided_slice %220 {offsets = [0, 48], sizes = [16, 16], strides = [1, 1]} : vector<16x96xf32> to vector<16x16xf32>
    %251 = vector.shape_cast %250 : vector<16x16xf32> to vector<2x8x16xf32>
    %252 = vector.extract_strided_slice %220 {offsets = [0, 80], sizes = [16, 16], strides = [1, 1]} : vector<16x96xf32> to vector<16x16xf32>
    %253 = vector.shape_cast %252 : vector<16x16xf32> to vector<2x8x16xf32>
    "tpu.trace_start"() <{level = 10 : i32, message = "bqd,bkd->bqk"}> : () -> ()
    %cst_86 = arith.constant dense<0.000000e+00> : vector<2x8x8xf32>
    %254 = tpu.matmul %249, %251, %cst_86 {dimension_numbers = #tpu.dot_dimension_numbers<[2], [2], [1], [1], [0, 0, 0, 1, 1, 1], [0], [0]>} : vector<2x8x16xf32>, vector<2x8x16xf32>, vector<2x8x8xf32> -> vector<2x8x8xf32>
    "tpu.trace_stop"() : () -> ()
    %cst_87 = arith.constant 2.500000e-01 : f32
    %255 = vector.broadcast %cst_87 : f32 to vector<2x8x8xf32>
    %256 = arith.mulf %254, %255 : vector<2x8x8xf32>
    %257 = vector.broadcast %53 : vector<2x1x8xf32> to vector<2x8x8xf32>
    %258 = arith.addf %256, %257 : vector<2x8x8xf32>
    %cst_88 = arith.constant dense<0xFF800000> : vector<2x8xf32>
    %259 = vector.multi_reduction <maximumf>, %258, %cst_88 [2] : vector<2x8x8xf32> to vector<2x8xf32>
    %260 = vector.shape_cast %259 : vector<2x8xf32> to vector<2x8x1xf32>
    %261 = vector.broadcast %260 : vector<2x8x1xf32> to vector<2x8x8xf32>
    %262 = arith.subf %258, %261 : vector<2x8x8xf32>
    %263 = math.exp %262 : vector<2x8x8xf32>
    %cst_89 = arith.constant dense<0.000000e+00> : vector<2x8xf32>
    %264 = vector.multi_reduction <add>, %263, %cst_89 [2] : vector<2x8x8xf32> to vector<2x8xf32>
    %265 = vector.shape_cast %264 : vector<2x8xf32> to vector<2x8x1xf32>
    %266 = tpu.reciprocal %265 {approx = true} : vector<2x8x1xf32> -> vector<2x8x1xf32>
    %267 = vector.broadcast %266 : vector<2x8x1xf32> to vector<2x8x8xf32>
    %268 = arith.mulf %263, %267 : vector<2x8x8xf32>
    "tpu.trace_start"() <{level = 10 : i32, message = "bqk,bkd->bqd"}> : () -> ()
    %cst_90 = arith.constant dense<0.000000e+00> : vector<2x8x16xf32>
    %269 = tpu.matmul %268, %253, %cst_90 {dimension_numbers = #tpu.dot_dimension_numbers<[2], [1], [1], [2], [0, 0, 0, 1, 1, 2], [0], [0]>} : vector<2x8x8xf32>, vector<2x8x16xf32>, vector<2x8x16xf32> -> vector<2x8x16xf32>
    "tpu.trace_stop"() : () -> ()
    %270 = vector.shape_cast %269 : vector<2x8x16xf32> to vector<16x16xf32>
    %c304 = arith.constant 304 : index
    %c0_91 = arith.constant 0 : index
    %271 = vector.load %arg2[%c304, %c0_91] : memref<448x128xf32, #tpu.memory_space<vmem>>, vector<16x32xf32>
    %cst_92 = arith.constant dense<0.000000e+00> : vector<16x32xf32>
    %272 = tpu.matmul %270, %271, %cst_92 {dimension_numbers = #tpu.dot_dimension_numbers<[1], [0], [0], [1], [0, 0, 1, 1], [], []>} : vector<16x16xf32>, vector<16x32xf32>, vector<16x32xf32> -> vector<16x32xf32>
    %273 = arith.addf %247, %272 : vector<16x32xf32>
    %c11 = arith.constant 11 : index
    %c0_93 = arith.constant 0 : index
    %274 = vector.load %arg3[%c11, %c0_93] : memref<24x128xf32, #tpu.memory_space<vmem>>, vector<1x32xf32>
    %275 = vector.broadcast %274 : vector<1x32xf32> to vector<16x32xf32>
    %276 = arith.addf %273, %275 : vector<16x32xf32>
    %277 = arith.addf %215, %276 : vector<16x32xf32>
    %c12 = arith.constant 12 : index
    %c0_94 = arith.constant 0 : index
    %278 = vector.load %arg3[%c12, %c0_94] : memref<24x128xf32, #tpu.memory_space<vmem>>, vector<1x32xf32>
    %c13 = arith.constant 13 : index
    %c0_95 = arith.constant 0 : index
    %279 = vector.load %arg3[%c13, %c0_95] : memref<24x128xf32, #tpu.memory_space<vmem>>, vector<1x32xf32>
    %cst_96 = arith.constant dense<0.000000e+00> : vector<16xf32>
    %280 = vector.multi_reduction <add>, %277, %cst_96 [1] : vector<16x32xf32> to vector<16xf32>
    %281 = vector.shape_cast %280 : vector<16xf32> to vector<16x1xf32>
    %cst_97 = arith.constant 3.200000e+01 : f32
    %282 = vector.broadcast %cst_97 : f32 to vector<16x1xf32>
    %283 = arith.divf %281, %282 : vector<16x1xf32>
    %284 = vector.broadcast %283 : vector<16x1xf32> to vector<16x32xf32>
    %285 = arith.subf %277, %284 : vector<16x32xf32>
    %286 = arith.mulf %285, %285 : vector<16x32xf32>
    %cst_98 = arith.constant dense<0.000000e+00> : vector<16xf32>
    %287 = vector.multi_reduction <add>, %286, %cst_98 [1] : vector<16x32xf32> to vector<16xf32>
    %288 = vector.shape_cast %287 : vector<16xf32> to vector<16x1xf32>
    %cst_99 = arith.constant 3.200000e+01 : f32
    %289 = vector.broadcast %cst_99 : f32 to vector<16x1xf32>
    %290 = arith.divf %288, %289 : vector<16x1xf32>
    %291 = vector.broadcast %283 : vector<16x1xf32> to vector<16x32xf32>
    %292 = arith.subf %277, %291 : vector<16x32xf32>
    %cst_100 = arith.constant 9.99999996E-13 : f32
    %293 = vector.broadcast %cst_100 : f32 to vector<16x1xf32>
    %294 = arith.addf %290, %293 : vector<16x1xf32>
    %295 = math.rsqrt %294 : vector<16x1xf32>
    %296 = vector.broadcast %295 : vector<16x1xf32> to vector<16x32xf32>
    %297 = arith.mulf %292, %296 : vector<16x32xf32>
    %298 = vector.broadcast %278 : vector<1x32xf32> to vector<16x32xf32>
    %299 = arith.mulf %297, %298 : vector<16x32xf32>
    %300 = vector.broadcast %279 : vector<1x32xf32> to vector<16x32xf32>
    %301 = arith.addf %299, %300 : vector<16x32xf32>
    %c320 = arith.constant 320 : index
    %c0_101 = arith.constant 0 : index
    %302 = vector.load %arg2[%c320, %c0_101] : memref<448x128xf32, #tpu.memory_space<vmem>>, vector<32x64xf32>
    %cst_102 = arith.constant dense<0.000000e+00> : vector<16x64xf32>
    %303 = tpu.matmul %301, %302, %cst_102 {dimension_numbers = #tpu.dot_dimension_numbers<[1], [0], [0], [1], [0, 0, 1, 1], [], []>} : vector<16x32xf32>, vector<32x64xf32>, vector<16x64xf32> -> vector<16x64xf32>
    %c14 = arith.constant 14 : index
    %c0_103 = arith.constant 0 : index
    %304 = vector.load %arg3[%c14, %c0_103] : memref<24x128xf32, #tpu.memory_space<vmem>>, vector<1x64xf32>
    %305 = vector.broadcast %304 : vector<1x64xf32> to vector<16x64xf32>
    %306 = arith.addf %303, %305 : vector<16x64xf32>
    %cst_104 = arith.constant 5.000000e-01 : f32
    %307 = vector.broadcast %cst_104 : f32 to vector<16x64xf32>
    %308 = arith.mulf %307, %306 : vector<16x64xf32>
    %cst_105 = arith.constant 0.707106769 : f32
    %309 = vector.broadcast %cst_105 : f32 to vector<16x64xf32>
    %310 = arith.mulf %306, %309 : vector<16x64xf32>
    %cst_106 = arith.constant 0.000000e+00 : f32
    %311 = vector.broadcast %cst_106 : f32 to vector<16x64xf32>
    %312 = arith.cmpf oge, %310, %311 : vector<16x64xf32>
    %cst_107 = arith.constant 1.000000e+00 : f32
    %cst_108 = arith.constant -1.000000e+00 : f32
    %313 = vector.broadcast %cst_107 : f32 to vector<16x64xf32>
    %314 = vector.broadcast %cst_108 : f32 to vector<16x64xf32>
    %315 = arith.select %312, %313, %314 : vector<16x64xi1>, vector<16x64xf32>
    %316 = math.absf %310 : vector<16x64xf32>
    %cst_109 = arith.constant 0.327591091 : f32
    %317 = vector.broadcast %cst_109 : f32 to vector<16x64xf32>
    %318 = arith.mulf %317, %316 : vector<16x64xf32>
    %cst_110 = arith.constant 1.000000e+00 : f32
    %319 = vector.broadcast %cst_110 : f32 to vector<16x64xf32>
    %320 = arith.addf %319, %318 : vector<16x64xf32>
    %cst_111 = arith.constant 1.000000e+00 : f32
    %321 = vector.broadcast %cst_111 : f32 to vector<16x64xf32>
    %322 = arith.divf %321, %320 : vector<16x64xf32>
    %cst_112 = arith.constant 1.06140542 : f32
    %323 = vector.broadcast %cst_112 : f32 to vector<16x64xf32>
    %324 = arith.mulf %323, %322 : vector<16x64xf32>
    %cst_113 = arith.constant -1.45315206 : f32
    %325 = vector.broadcast %cst_113 : f32 to vector<16x64xf32>
    %326 = arith.addf %324, %325 : vector<16x64xf32>
    %327 = arith.mulf %326, %322 : vector<16x64xf32>
    %cst_114 = arith.constant 1.42141378 : f32
    %328 = vector.broadcast %cst_114 : f32 to vector<16x64xf32>
    %329 = arith.addf %327, %328 : vector<16x64xf32>
    %330 = arith.mulf %329, %322 : vector<16x64xf32>
    %cst_115 = arith.constant -0.284496725 : f32
    %331 = vector.broadcast %cst_115 : f32 to vector<16x64xf32>
    %332 = arith.addf %330, %331 : vector<16x64xf32>
    %333 = arith.mulf %332, %322 : vector<16x64xf32>
    %cst_116 = arith.constant 0.254829586 : f32
    %334 = vector.broadcast %cst_116 : f32 to vector<16x64xf32>
    %335 = arith.addf %333, %334 : vector<16x64xf32>
    %336 = arith.mulf %335, %322 : vector<16x64xf32>
    %cst_117 = arith.constant 0.000000e+00 : f32
    %337 = vector.broadcast %cst_117 : f32 to vector<16x64xf32>
    %338 = arith.subf %337, %316 : vector<16x64xf32>
    %339 = arith.mulf %338, %316 : vector<16x64xf32>
    %340 = math.exp %339 : vector<16x64xf32>
    %341 = arith.mulf %336, %340 : vector<16x64xf32>
    %cst_118 = arith.constant 1.000000e+00 : f32
    %342 = vector.broadcast %cst_118 : f32 to vector<16x64xf32>
    %343 = arith.subf %342, %341 : vector<16x64xf32>
    %344 = arith.mulf %315, %343 : vector<16x64xf32>
    %cst_119 = arith.constant 1.000000e+00 : f32
    %345 = vector.broadcast %cst_119 : f32 to vector<16x64xf32>
    %346 = arith.addf %345, %344 : vector<16x64xf32>
    %347 = arith.mulf %308, %346 : vector<16x64xf32>
    %c352 = arith.constant 352 : index
    %c0_120 = arith.constant 0 : index
    %348 = vector.load %arg2[%c352, %c0_120] : memref<448x128xf32, #tpu.memory_space<vmem>>, vector<64x32xf32>
    %cst_121 = arith.constant dense<0.000000e+00> : vector<16x32xf32>
    %349 = tpu.matmul %347, %348, %cst_121 {dimension_numbers = #tpu.dot_dimension_numbers<[1], [0], [0], [1], [0, 0, 1, 1], [], []>} : vector<16x64xf32>, vector<64x32xf32>, vector<16x32xf32> -> vector<16x32xf32>
    %c15 = arith.constant 15 : index
    %c0_122 = arith.constant 0 : index
    %350 = vector.load %arg3[%c15, %c0_122] : memref<24x128xf32, #tpu.memory_space<vmem>>, vector<1x32xf32>
    %351 = vector.broadcast %350 : vector<1x32xf32> to vector<16x32xf32>
    %352 = arith.addf %349, %351 : vector<16x32xf32>
    %353 = arith.addf %301, %352 : vector<16x32xf32>
    %c16 = arith.constant 16 : index
    %c0_123 = arith.constant 0 : index
    %354 = vector.load %arg3[%c16, %c0_123] : memref<24x128xf32, #tpu.memory_space<vmem>>, vector<1x32xf32>
    %c17 = arith.constant 17 : index
    %c0_124 = arith.constant 0 : index
    %355 = vector.load %arg3[%c17, %c0_124] : memref<24x128xf32, #tpu.memory_space<vmem>>, vector<1x32xf32>
    %cst_125 = arith.constant dense<0.000000e+00> : vector<16xf32>
    %356 = vector.multi_reduction <add>, %353, %cst_125 [1] : vector<16x32xf32> to vector<16xf32>
    %357 = vector.shape_cast %356 : vector<16xf32> to vector<16x1xf32>
    %cst_126 = arith.constant 3.200000e+01 : f32
    %358 = vector.broadcast %cst_126 : f32 to vector<16x1xf32>
    %359 = arith.divf %357, %358 : vector<16x1xf32>
    %360 = vector.broadcast %359 : vector<16x1xf32> to vector<16x32xf32>
    %361 = arith.subf %353, %360 : vector<16x32xf32>
    %362 = arith.mulf %361, %361 : vector<16x32xf32>
    %cst_127 = arith.constant dense<0.000000e+00> : vector<16xf32>
    %363 = vector.multi_reduction <add>, %362, %cst_127 [1] : vector<16x32xf32> to vector<16xf32>
    %364 = vector.shape_cast %363 : vector<16xf32> to vector<16x1xf32>
    %cst_128 = arith.constant 3.200000e+01 : f32
    %365 = vector.broadcast %cst_128 : f32 to vector<16x1xf32>
    %366 = arith.divf %364, %365 : vector<16x1xf32>
    %367 = vector.broadcast %359 : vector<16x1xf32> to vector<16x32xf32>
    %368 = arith.subf %353, %367 : vector<16x32xf32>
    %cst_129 = arith.constant 9.99999996E-13 : f32
    %369 = vector.broadcast %cst_129 : f32 to vector<16x1xf32>
    %370 = arith.addf %366, %369 : vector<16x1xf32>
    %371 = math.rsqrt %370 : vector<16x1xf32>
    %372 = vector.broadcast %371 : vector<16x1xf32> to vector<16x32xf32>
    %373 = arith.mulf %368, %372 : vector<16x32xf32>
    %374 = vector.broadcast %354 : vector<1x32xf32> to vector<16x32xf32>
    %375 = arith.mulf %373, %374 : vector<16x32xf32>
    %376 = vector.broadcast %355 : vector<1x32xf32> to vector<16x32xf32>
    %377 = arith.addf %375, %376 : vector<16x32xf32>
    %c416 = arith.constant 416 : index
    %c0_130 = arith.constant 0 : index
    %378 = vector.load %arg2[%c416, %c0_130] : memref<448x128xf32, #tpu.memory_space<vmem>>, vector<32x3xf32>
    %cst_131 = arith.constant dense<0.000000e+00> : vector<16x3xf32>
    %379 = tpu.matmul %377, %378, %cst_131 {dimension_numbers = #tpu.dot_dimension_numbers<[1], [0], [0], [1], [0, 0, 1, 1], [], []>} : vector<16x32xf32>, vector<32x3xf32>, vector<16x3xf32> -> vector<16x3xf32>
    %c18 = arith.constant 18 : index
    %c0_132 = arith.constant 0 : index
    %380 = vector.load %arg3[%c18, %c0_132] : memref<24x128xf32, #tpu.memory_space<vmem>>, vector<1x3xf32>
    %381 = vector.broadcast %380 : vector<1x3xf32> to vector<16x3xf32>
    %382 = arith.addf %379, %381 : vector<16x3xf32>
    %383 = vector.shape_cast %382 : vector<16x3xf32> to vector<2x8x3xf32>
    %c19 = arith.constant 19 : index
    %c0_133 = arith.constant 0 : index
    %384 = vector.load %arg3[%c19, %c0_133] : memref<24x128xf32, #tpu.memory_space<vmem>>, vector<1x3xf32>
    %c20 = arith.constant 20 : index
    %c0_134 = arith.constant 0 : index
    %385 = vector.load %arg3[%c20, %c0_134] : memref<24x128xf32, #tpu.memory_space<vmem>>, vector<1x3xf32>
    %c21 = arith.constant 21 : index
    %c0_135 = arith.constant 0 : index
    %386 = vector.load %arg3[%c21, %c0_135] : memref<24x128xf32, #tpu.memory_space<vmem>>, vector<3x3xf32>
    %c0_136 = arith.constant 0 : index
    %c9_137 = arith.constant 9 : index
    %387 = vector.load %arg1[%c0_136, %c9_137] : memref<2x16xi32, #tpu.memory_space<vmem>>, vector<2x6xi32>
    %388 = vector.extract_strided_slice %48 {offsets = [0, 2], sizes = [2, 6], strides = [1, 1]} : vector<2x8xf32> to vector<2x6xf32>
    %389 = tpu.iota {dimensions = array<i32: 1>} : vector<2x3xi32>
    %cst_138 = arith.constant dense<0.000000e+00> : vector<2xf32>
    %390 = vector.multi_reduction <add>, %388, %cst_138 [1] : vector<2x6xf32> to vector<2xf32>
    %391 = vector.shape_cast %390 : vector<2xf32> to vector<2x1xf32>
    %392 = arith.fptosi %391 : vector<2x1xf32> to vector<2x1xi32>
    %c1_i32 = arith.constant 1 : i32
    %393 = vector.broadcast %c1_i32 : i32 to vector<2x1xi32>
    %394 = arith.subi %392, %393 : vector<2x1xi32>
    %395 = vector.extract_strided_slice %383 {offsets = [0, 1, 0], sizes = [2, 1, 3], strides = [1, 1, 1]} : vector<2x8x3xf32> to vector<2x1x3xf32>
    %396 = vector.shape_cast %395 : vector<2x1x3xf32> to vector<2x3xf32>
    %397 = vector.extract_strided_slice %387 {offsets = [0, 0], sizes = [2, 1], strides = [1, 1]} : vector<2x6xi32> to vector<2x1xi32>
    %398 = vector.broadcast %397 : vector<2x1xi32> to vector<2x3xi32>
    %399 = arith.cmpi eq, %398, %389 : vector<2x3xi32>
    %400 = arith.extui %399 : vector<2x3xi1> to vector<2x3xi32>
    %401 = arith.sitofp %400 : vector<2x3xi32> to vector<2x3xf32>
    %402 = vector.broadcast %384 : vector<1x3xf32> to vector<2x3xf32>
    %403 = arith.addf %402, %396 : vector<2x3xf32>
    %404 = arith.mulf %403, %401 : vector<2x3xf32>
    %cst_139 = arith.constant dense<0.000000e+00> : vector<2xf32>
    %405 = vector.multi_reduction <add>, %404, %cst_139 [1] : vector<2x3xf32> to vector<2xf32>
    %406 = vector.shape_cast %405 : vector<2xf32> to vector<2x1xf32>
    %c0_i32 = arith.constant 0 : i32
    %407 = vector.broadcast %c0_i32 : i32 to vector<2x1xi32>
    %408 = arith.cmpi eq, %394, %407 : vector<2x1xi32>
    %cst_140 = arith.constant 1.000000e+00 : f32
    %cst_141 = arith.constant 0.000000e+00 : f32
    %409 = vector.broadcast %cst_140 : f32 to vector<2x1xf32>
    %410 = vector.broadcast %cst_141 : f32 to vector<2x1xf32>
    %411 = arith.select %408, %409, %410 : vector<2x1xi1>, vector<2x1xf32>
    %412 = vector.broadcast %411 : vector<2x1xf32> to vector<2x3xf32>
    %413 = arith.mulf %412, %401 : vector<2x3xf32>
    %414 = vector.extract_strided_slice %383 {offsets = [0, 2, 0], sizes = [2, 1, 3], strides = [1, 1, 1]} : vector<2x8x3xf32> to vector<2x1x3xf32>
    %415 = vector.shape_cast %414 : vector<2x1x3xf32> to vector<2x3xf32>
    %416 = vector.extract_strided_slice %387 {offsets = [0, 1], sizes = [2, 1], strides = [1, 1]} : vector<2x6xi32> to vector<2x1xi32>
    %417 = vector.broadcast %416 : vector<2x1xi32> to vector<2x3xi32>
    %418 = arith.cmpi eq, %417, %389 : vector<2x3xi32>
    %419 = arith.extui %418 : vector<2x3xi1> to vector<2x3xi32>
    %420 = arith.sitofp %419 : vector<2x3xi32> to vector<2x3xf32>
    %421 = vector.extract_strided_slice %388 {offsets = [0, 1], sizes = [2, 1], strides = [1, 1]} : vector<2x6xf32> to vector<2x1xf32>
    %cst_142 = arith.constant dense<0.000000e+00> : vector<2x3xf32>
    %422 = tpu.matmul %401, %386, %cst_142 {dimension_numbers = #tpu.dot_dimension_numbers<[1], [0], [0], [1], [0, 0, 1, 1], [], []>} : vector<2x3xf32>, vector<3x3xf32>, vector<2x3xf32> -> vector<2x3xf32>
    %423 = arith.mulf %422, %420 : vector<2x3xf32>
    %cst_143 = arith.constant dense<0.000000e+00> : vector<2xf32>
    %424 = vector.multi_reduction <add>, %423, %cst_143 [1] : vector<2x3xf32> to vector<2xf32>
    %425 = vector.shape_cast %424 : vector<2xf32> to vector<2x1xf32>
    %426 = arith.mulf %415, %420 : vector<2x3xf32>
    %cst_144 = arith.constant dense<0.000000e+00> : vector<2xf32>
    %427 = vector.multi_reduction <add>, %426, %cst_144 [1] : vector<2x3xf32> to vector<2xf32>
    %428 = vector.shape_cast %427 : vector<2xf32> to vector<2x1xf32>
    %429 = arith.addf %425, %428 : vector<2x1xf32>
    %430 = arith.mulf %421, %429 : vector<2x1xf32>
    %431 = arith.addf %406, %430 : vector<2x1xf32>
    %c1_i32_145 = arith.constant 1 : i32
    %432 = vector.broadcast %c1_i32_145 : i32 to vector<2x1xi32>
    %433 = arith.cmpi eq, %394, %432 : vector<2x1xi32>
    %cst_146 = arith.constant 1.000000e+00 : f32
    %cst_147 = arith.constant 0.000000e+00 : f32
    %434 = vector.broadcast %cst_146 : f32 to vector<2x1xf32>
    %435 = vector.broadcast %cst_147 : f32 to vector<2x1xf32>
    %436 = arith.select %433, %434, %435 : vector<2x1xi1>, vector<2x1xf32>
    %437 = vector.broadcast %436 : vector<2x1xf32> to vector<2x3xf32>
    %438 = arith.mulf %437, %420 : vector<2x3xf32>
    %cst_148 = arith.constant 1.000000e+00 : f32
    %439 = vector.broadcast %cst_148 : f32 to vector<2x1xf32>
    %440 = arith.subf %439, %436 : vector<2x1xf32>
    %441 = vector.broadcast %440 : vector<2x1xf32> to vector<2x3xf32>
    %442 = arith.mulf %441, %413 : vector<2x3xf32>
    %443 = arith.addf %438, %442 : vector<2x3xf32>
    %444 = vector.extract_strided_slice %383 {offsets = [0, 3, 0], sizes = [2, 1, 3], strides = [1, 1, 1]} : vector<2x8x3xf32> to vector<2x1x3xf32>
    %445 = vector.shape_cast %444 : vector<2x1x3xf32> to vector<2x3xf32>
    %446 = vector.extract_strided_slice %387 {offsets = [0, 2], sizes = [2, 1], strides = [1, 1]} : vector<2x6xi32> to vector<2x1xi32>
    %447 = vector.broadcast %446 : vector<2x1xi32> to vector<2x3xi32>
    %448 = arith.cmpi eq, %447, %389 : vector<2x3xi32>
    %449 = arith.extui %448 : vector<2x3xi1> to vector<2x3xi32>
    %450 = arith.sitofp %449 : vector<2x3xi32> to vector<2x3xf32>
    %451 = vector.extract_strided_slice %388 {offsets = [0, 2], sizes = [2, 1], strides = [1, 1]} : vector<2x6xf32> to vector<2x1xf32>
    %cst_149 = arith.constant dense<0.000000e+00> : vector<2x3xf32>
    %452 = tpu.matmul %420, %386, %cst_149 {dimension_numbers = #tpu.dot_dimension_numbers<[1], [0], [0], [1], [0, 0, 1, 1], [], []>} : vector<2x3xf32>, vector<3x3xf32>, vector<2x3xf32> -> vector<2x3xf32>
    %453 = arith.mulf %452, %450 : vector<2x3xf32>
    %cst_150 = arith.constant dense<0.000000e+00> : vector<2xf32>
    %454 = vector.multi_reduction <add>, %453, %cst_150 [1] : vector<2x3xf32> to vector<2xf32>
    %455 = vector.shape_cast %454 : vector<2xf32> to vector<2x1xf32>
    %456 = arith.mulf %445, %450 : vector<2x3xf32>
    %cst_151 = arith.constant dense<0.000000e+00> : vector<2xf32>
    %457 = vector.multi_reduction <add>, %456, %cst_151 [1] : vector<2x3xf32> to vector<2xf32>
    %458 = vector.shape_cast %457 : vector<2xf32> to vector<2x1xf32>
    %459 = arith.addf %455, %458 : vector<2x1xf32>
    %460 = arith.mulf %451, %459 : vector<2x1xf32>
    %461 = arith.addf %431, %460 : vector<2x1xf32>
    %c2_i32 = arith.constant 2 : i32
    %462 = vector.broadcast %c2_i32 : i32 to vector<2x1xi32>
    %463 = arith.cmpi eq, %394, %462 : vector<2x1xi32>
    %cst_152 = arith.constant 1.000000e+00 : f32
    %cst_153 = arith.constant 0.000000e+00 : f32
    %464 = vector.broadcast %cst_152 : f32 to vector<2x1xf32>
    %465 = vector.broadcast %cst_153 : f32 to vector<2x1xf32>
    %466 = arith.select %463, %464, %465 : vector<2x1xi1>, vector<2x1xf32>
    %467 = vector.broadcast %466 : vector<2x1xf32> to vector<2x3xf32>
    %468 = arith.mulf %467, %450 : vector<2x3xf32>
    %cst_154 = arith.constant 1.000000e+00 : f32
    %469 = vector.broadcast %cst_154 : f32 to vector<2x1xf32>
    %470 = arith.subf %469, %466 : vector<2x1xf32>
    %471 = vector.broadcast %470 : vector<2x1xf32> to vector<2x3xf32>
    %472 = arith.mulf %471, %443 : vector<2x3xf32>
    %473 = arith.addf %468, %472 : vector<2x3xf32>
    %474 = vector.extract_strided_slice %383 {offsets = [0, 4, 0], sizes = [2, 1, 3], strides = [1, 1, 1]} : vector<2x8x3xf32> to vector<2x1x3xf32>
    %475 = vector.shape_cast %474 : vector<2x1x3xf32> to vector<2x3xf32>
    %476 = vector.extract_strided_slice %387 {offsets = [0, 3], sizes = [2, 1], strides = [1, 1]} : vector<2x6xi32> to vector<2x1xi32>
    %477 = vector.broadcast %476 : vector<2x1xi32> to vector<2x3xi32>
    %478 = arith.cmpi eq, %477, %389 : vector<2x3xi32>
    %479 = arith.extui %478 : vector<2x3xi1> to vector<2x3xi32>
    %480 = arith.sitofp %479 : vector<2x3xi32> to vector<2x3xf32>
    %481 = vector.extract_strided_slice %388 {offsets = [0, 3], sizes = [2, 1], strides = [1, 1]} : vector<2x6xf32> to vector<2x1xf32>
    %cst_155 = arith.constant dense<0.000000e+00> : vector<2x3xf32>
    %482 = tpu.matmul %450, %386, %cst_155 {dimension_numbers = #tpu.dot_dimension_numbers<[1], [0], [0], [1], [0, 0, 1, 1], [], []>} : vector<2x3xf32>, vector<3x3xf32>, vector<2x3xf32> -> vector<2x3xf32>
    %483 = arith.mulf %482, %480 : vector<2x3xf32>
    %cst_156 = arith.constant dense<0.000000e+00> : vector<2xf32>
    %484 = vector.multi_reduction <add>, %483, %cst_156 [1] : vector<2x3xf32> to vector<2xf32>
    %485 = vector.shape_cast %484 : vector<2xf32> to vector<2x1xf32>
    %486 = arith.mulf %475, %480 : vector<2x3xf32>
    %cst_157 = arith.constant dense<0.000000e+00> : vector<2xf32>
    %487 = vector.multi_reduction <add>, %486, %cst_157 [1] : vector<2x3xf32> to vector<2xf32>
    %488 = vector.shape_cast %487 : vector<2xf32> to vector<2x1xf32>
    %489 = arith.addf %485, %488 : vector<2x1xf32>
    %490 = arith.mulf %481, %489 : vector<2x1xf32>
    %491 = arith.addf %461, %490 : vector<2x1xf32>
    %c3_i32 = arith.constant 3 : i32
    %492 = vector.broadcast %c3_i32 : i32 to vector<2x1xi32>
    %493 = arith.cmpi eq, %394, %492 : vector<2x1xi32>
    %cst_158 = arith.constant 1.000000e+00 : f32
    %cst_159 = arith.constant 0.000000e+00 : f32
    %494 = vector.broadcast %cst_158 : f32 to vector<2x1xf32>
    %495 = vector.broadcast %cst_159 : f32 to vector<2x1xf32>
    %496 = arith.select %493, %494, %495 : vector<2x1xi1>, vector<2x1xf32>
    %497 = vector.broadcast %496 : vector<2x1xf32> to vector<2x3xf32>
    %498 = arith.mulf %497, %480 : vector<2x3xf32>
    %cst_160 = arith.constant 1.000000e+00 : f32
    %499 = vector.broadcast %cst_160 : f32 to vector<2x1xf32>
    %500 = arith.subf %499, %496 : vector<2x1xf32>
    %501 = vector.broadcast %500 : vector<2x1xf32> to vector<2x3xf32>
    %502 = arith.mulf %501, %473 : vector<2x3xf32>
    %503 = arith.addf %498, %502 : vector<2x3xf32>
    %504 = vector.extract_strided_slice %383 {offsets = [0, 5, 0], sizes = [2, 1, 3], strides = [1, 1, 1]} : vector<2x8x3xf32> to vector<2x1x3xf32>
    %505 = vector.shape_cast %504 : vector<2x1x3xf32> to vector<2x3xf32>
    %506 = vector.extract_strided_slice %387 {offsets = [0, 4], sizes = [2, 1], strides = [1, 1]} : vector<2x6xi32> to vector<2x1xi32>
    %507 = vector.broadcast %506 : vector<2x1xi32> to vector<2x3xi32>
    %508 = arith.cmpi eq, %507, %389 : vector<2x3xi32>
    %509 = arith.extui %508 : vector<2x3xi1> to vector<2x3xi32>
    %510 = arith.sitofp %509 : vector<2x3xi32> to vector<2x3xf32>
    %511 = vector.extract_strided_slice %388 {offsets = [0, 4], sizes = [2, 1], strides = [1, 1]} : vector<2x6xf32> to vector<2x1xf32>
    %cst_161 = arith.constant dense<0.000000e+00> : vector<2x3xf32>
    %512 = tpu.matmul %480, %386, %cst_161 {dimension_numbers = #tpu.dot_dimension_numbers<[1], [0], [0], [1], [0, 0, 1, 1], [], []>} : vector<2x3xf32>, vector<3x3xf32>, vector<2x3xf32> -> vector<2x3xf32>
    %513 = arith.mulf %512, %510 : vector<2x3xf32>
    %cst_162 = arith.constant dense<0.000000e+00> : vector<2xf32>
    %514 = vector.multi_reduction <add>, %513, %cst_162 [1] : vector<2x3xf32> to vector<2xf32>
    %515 = vector.shape_cast %514 : vector<2xf32> to vector<2x1xf32>
    %516 = arith.mulf %505, %510 : vector<2x3xf32>
    %cst_163 = arith.constant dense<0.000000e+00> : vector<2xf32>
    %517 = vector.multi_reduction <add>, %516, %cst_163 [1] : vector<2x3xf32> to vector<2xf32>
    %518 = vector.shape_cast %517 : vector<2xf32> to vector<2x1xf32>
    %519 = arith.addf %515, %518 : vector<2x1xf32>
    %520 = arith.mulf %511, %519 : vector<2x1xf32>
    %521 = arith.addf %491, %520 : vector<2x1xf32>
    %c4_i32 = arith.constant 4 : i32
    %522 = vector.broadcast %c4_i32 : i32 to vector<2x1xi32>
    %523 = arith.cmpi eq, %394, %522 : vector<2x1xi32>
    %cst_164 = arith.constant 1.000000e+00 : f32
    %cst_165 = arith.constant 0.000000e+00 : f32
    %524 = vector.broadcast %cst_164 : f32 to vector<2x1xf32>
    %525 = vector.broadcast %cst_165 : f32 to vector<2x1xf32>
    %526 = arith.select %523, %524, %525 : vector<2x1xi1>, vector<2x1xf32>
    %527 = vector.broadcast %526 : vector<2x1xf32> to vector<2x3xf32>
    %528 = arith.mulf %527, %510 : vector<2x3xf32>
    %cst_166 = arith.constant 1.000000e+00 : f32
    %529 = vector.broadcast %cst_166 : f32 to vector<2x1xf32>
    %530 = arith.subf %529, %526 : vector<2x1xf32>
    %531 = vector.broadcast %530 : vector<2x1xf32> to vector<2x3xf32>
    %532 = arith.mulf %531, %503 : vector<2x3xf32>
    %533 = arith.addf %528, %532 : vector<2x3xf32>
    %534 = vector.extract_strided_slice %383 {offsets = [0, 6, 0], sizes = [2, 1, 3], strides = [1, 1, 1]} : vector<2x8x3xf32> to vector<2x1x3xf32>
    %535 = vector.shape_cast %534 : vector<2x1x3xf32> to vector<2x3xf32>
    %536 = vector.extract_strided_slice %387 {offsets = [0, 5], sizes = [2, 1], strides = [1, 1]} : vector<2x6xi32> to vector<2x1xi32>
    %537 = vector.broadcast %536 : vector<2x1xi32> to vector<2x3xi32>
    %538 = arith.cmpi eq, %537, %389 : vector<2x3xi32>
    %539 = arith.extui %538 : vector<2x3xi1> to vector<2x3xi32>
    %540 = arith.sitofp %539 : vector<2x3xi32> to vector<2x3xf32>
    %541 = vector.extract_strided_slice %388 {offsets = [0, 5], sizes = [2, 1], strides = [1, 1]} : vector<2x6xf32> to vector<2x1xf32>
    %cst_167 = arith.constant dense<0.000000e+00> : vector<2x3xf32>
    %542 = tpu.matmul %510, %386, %cst_167 {dimension_numbers = #tpu.dot_dimension_numbers<[1], [0], [0], [1], [0, 0, 1, 1], [], []>} : vector<2x3xf32>, vector<3x3xf32>, vector<2x3xf32> -> vector<2x3xf32>
    %543 = arith.mulf %542, %540 : vector<2x3xf32>
    %cst_168 = arith.constant dense<0.000000e+00> : vector<2xf32>
    %544 = vector.multi_reduction <add>, %543, %cst_168 [1] : vector<2x3xf32> to vector<2xf32>
    %545 = vector.shape_cast %544 : vector<2xf32> to vector<2x1xf32>
    %546 = arith.mulf %535, %540 : vector<2x3xf32>
    %cst_169 = arith.constant dense<0.000000e+00> : vector<2xf32>
    %547 = vector.multi_reduction <add>, %546, %cst_169 [1] : vector<2x3xf32> to vector<2xf32>
    %548 = vector.shape_cast %547 : vector<2xf32> to vector<2x1xf32>
    %549 = arith.addf %545, %548 : vector<2x1xf32>
    %550 = arith.mulf %541, %549 : vector<2x1xf32>
    %551 = arith.addf %521, %550 : vector<2x1xf32>
    %c5_i32 = arith.constant 5 : i32
    %552 = vector.broadcast %c5_i32 : i32 to vector<2x1xi32>
    %553 = arith.cmpi eq, %394, %552 : vector<2x1xi32>
    %cst_170 = arith.constant 1.000000e+00 : f32
    %cst_171 = arith.constant 0.000000e+00 : f32
    %554 = vector.broadcast %cst_170 : f32 to vector<2x1xf32>
    %555 = vector.broadcast %cst_171 : f32 to vector<2x1xf32>
    %556 = arith.select %553, %554, %555 : vector<2x1xi1>, vector<2x1xf32>
    %557 = vector.broadcast %556 : vector<2x1xf32> to vector<2x3xf32>
    %558 = arith.mulf %557, %540 : vector<2x3xf32>
    %cst_172 = arith.constant 1.000000e+00 : f32
    %559 = vector.broadcast %cst_172 : f32 to vector<2x1xf32>
    %560 = arith.subf %559, %556 : vector<2x1xf32>
    %561 = vector.broadcast %560 : vector<2x1xf32> to vector<2x3xf32>
    %562 = arith.mulf %561, %533 : vector<2x3xf32>
    %563 = arith.addf %558, %562 : vector<2x3xf32>
    %564 = vector.broadcast %385 : vector<1x3xf32> to vector<2x3xf32>
    %565 = arith.mulf %564, %563 : vector<2x3xf32>
    %cst_173 = arith.constant dense<0.000000e+00> : vector<2xf32>
    %566 = vector.multi_reduction <add>, %565, %cst_173 [1] : vector<2x3xf32> to vector<2xf32>
    %567 = vector.shape_cast %566 : vector<2xf32> to vector<2x1xf32>
    %568 = arith.addf %551, %567 : vector<2x1xf32>
    %569 = vector.broadcast %384 : vector<1x3xf32> to vector<2x3xf32>
    %570 = arith.addf %569, %396 : vector<2x3xf32>
    %571 = vector.extract_strided_slice %383 {offsets = [0, 2, 0], sizes = [2, 1, 3], strides = [1, 1, 1]} : vector<2x8x3xf32> to vector<2x1x3xf32>
    %572 = vector.shape_cast %571 : vector<2x1x3xf32> to vector<2x3xf32>
    %573 = vector.extract_strided_slice %388 {offsets = [0, 1], sizes = [2, 1], strides = [1, 1]} : vector<2x6xf32> to vector<2x1xf32>
    %574 = vector.shape_cast %570 : vector<2x3xf32> to vector<2x3x1xf32>
    %575 = vector.shape_cast %386 : vector<3x3xf32> to vector<1x3x3xf32>
    %576 = vector.broadcast %574 : vector<2x3x1xf32> to vector<2x3x3xf32>
    %577 = vector.broadcast %575 : vector<1x3x3xf32> to vector<2x3x3xf32>
    %578 = arith.addf %576, %577 : vector<2x3x3xf32>
    %579 = vector.shape_cast %572 : vector<2x3xf32> to vector<2x1x3xf32>
    %580 = vector.broadcast %579 : vector<2x1x3xf32> to vector<2x3x3xf32>
    %581 = arith.addf %578, %580 : vector<2x3x3xf32>
    %cst_174 = arith.constant dense<0xFF800000> : vector<2x3xf32>
    %582 = vector.multi_reduction <maximumf>, %581, %cst_174 [1] : vector<2x3x3xf32> to vector<2x3xf32>
    %583 = vector.shape_cast %582 : vector<2x3xf32> to vector<2x1x3xf32>
    %584 = vector.shape_cast %583 : vector<2x1x3xf32> to vector<2x3xf32>
    %585 = vector.broadcast %583 : vector<2x1x3xf32> to vector<2x3x3xf32>
    %586 = arith.subf %581, %585 : vector<2x3x3xf32>
    %587 = math.exp %586 : vector<2x3x3xf32>
    %cst_175 = arith.constant dense<0.000000e+00> : vector<2x3xf32>
    %588 = vector.multi_reduction <add>, %587, %cst_175 [1] : vector<2x3x3xf32> to vector<2x3xf32>
    %589 = math.log %588 : vector<2x3xf32>
    %590 = arith.addf %584, %589 : vector<2x3xf32>
    %cst_176 = arith.constant 0.000000e+00 : f32
    %591 = vector.broadcast %cst_176 : f32 to vector<2x1xf32>
    %592 = arith.cmpf ogt, %573, %591 : vector<2x1xf32>
    %593 = vector.shape_cast %592 : vector<2x1xi1> to vector<2x1xi1>
    %594 = vector.broadcast %593 : vector<2x1xi1> to vector<2x3xi1>
    %595 = arith.select %594, %590, %570 : vector<2x3xi1>, vector<2x3xf32>
    %596 = vector.extract_strided_slice %383 {offsets = [0, 3, 0], sizes = [2, 1, 3], strides = [1, 1, 1]} : vector<2x8x3xf32> to vector<2x1x3xf32>
    %597 = vector.shape_cast %596 : vector<2x1x3xf32> to vector<2x3xf32>
    %598 = vector.extract_strided_slice %388 {offsets = [0, 2], sizes = [2, 1], strides = [1, 1]} : vector<2x6xf32> to vector<2x1xf32>
    %599 = vector.shape_cast %595 : vector<2x3xf32> to vector<2x3x1xf32>
    %600 = vector.shape_cast %386 : vector<3x3xf32> to vector<1x3x3xf32>
    %601 = vector.broadcast %599 : vector<2x3x1xf32> to vector<2x3x3xf32>
    %602 = vector.broadcast %600 : vector<1x3x3xf32> to vector<2x3x3xf32>
    %603 = arith.addf %601, %602 : vector<2x3x3xf32>
    %604 = vector.shape_cast %597 : vector<2x3xf32> to vector<2x1x3xf32>
    %605 = vector.broadcast %604 : vector<2x1x3xf32> to vector<2x3x3xf32>
    %606 = arith.addf %603, %605 : vector<2x3x3xf32>
    %cst_177 = arith.constant dense<0xFF800000> : vector<2x3xf32>
    %607 = vector.multi_reduction <maximumf>, %606, %cst_177 [1] : vector<2x3x3xf32> to vector<2x3xf32>
    %608 = vector.shape_cast %607 : vector<2x3xf32> to vector<2x1x3xf32>
    %609 = vector.shape_cast %608 : vector<2x1x3xf32> to vector<2x3xf32>
    %610 = vector.broadcast %608 : vector<2x1x3xf32> to vector<2x3x3xf32>
    %611 = arith.subf %606, %610 : vector<2x3x3xf32>
    %612 = math.exp %611 : vector<2x3x3xf32>
    %cst_178 = arith.constant dense<0.000000e+00> : vector<2x3xf32>
    %613 = vector.multi_reduction <add>, %612, %cst_178 [1] : vector<2x3x3xf32> to vector<2x3xf32>
    %614 = math.log %613 : vector<2x3xf32>
    %615 = arith.addf %609, %614 : vector<2x3xf32>
    %cst_179 = arith.constant 0.000000e+00 : f32
    %616 = vector.broadcast %cst_179 : f32 to vector<2x1xf32>
    %617 = arith.cmpf ogt, %598, %616 : vector<2x1xf32>
    %618 = vector.shape_cast %617 : vector<2x1xi1> to vector<2x1xi1>
    %619 = vector.broadcast %618 : vector<2x1xi1> to vector<2x3xi1>
    %620 = arith.select %619, %615, %595 : vector<2x3xi1>, vector<2x3xf32>
    %621 = vector.extract_strided_slice %383 {offsets = [0, 4, 0], sizes = [2, 1, 3], strides = [1, 1, 1]} : vector<2x8x3xf32> to vector<2x1x3xf32>
    %622 = vector.shape_cast %621 : vector<2x1x3xf32> to vector<2x3xf32>
    %623 = vector.extract_strided_slice %388 {offsets = [0, 3], sizes = [2, 1], strides = [1, 1]} : vector<2x6xf32> to vector<2x1xf32>
    %624 = vector.shape_cast %620 : vector<2x3xf32> to vector<2x3x1xf32>
    %625 = vector.shape_cast %386 : vector<3x3xf32> to vector<1x3x3xf32>
    %626 = vector.broadcast %624 : vector<2x3x1xf32> to vector<2x3x3xf32>
    %627 = vector.broadcast %625 : vector<1x3x3xf32> to vector<2x3x3xf32>
    %628 = arith.addf %626, %627 : vector<2x3x3xf32>
    %629 = vector.shape_cast %622 : vector<2x3xf32> to vector<2x1x3xf32>
    %630 = vector.broadcast %629 : vector<2x1x3xf32> to vector<2x3x3xf32>
    %631 = arith.addf %628, %630 : vector<2x3x3xf32>
    %cst_180 = arith.constant dense<0xFF800000> : vector<2x3xf32>
    %632 = vector.multi_reduction <maximumf>, %631, %cst_180 [1] : vector<2x3x3xf32> to vector<2x3xf32>
    %633 = vector.shape_cast %632 : vector<2x3xf32> to vector<2x1x3xf32>
    %634 = vector.shape_cast %633 : vector<2x1x3xf32> to vector<2x3xf32>
    %635 = vector.broadcast %633 : vector<2x1x3xf32> to vector<2x3x3xf32>
    %636 = arith.subf %631, %635 : vector<2x3x3xf32>
    %637 = math.exp %636 : vector<2x3x3xf32>
    %cst_181 = arith.constant dense<0.000000e+00> : vector<2x3xf32>
    %638 = vector.multi_reduction <add>, %637, %cst_181 [1] : vector<2x3x3xf32> to vector<2x3xf32>
    %639 = math.log %638 : vector<2x3xf32>
    %640 = arith.addf %634, %639 : vector<2x3xf32>
    %cst_182 = arith.constant 0.000000e+00 : f32
    %641 = vector.broadcast %cst_182 : f32 to vector<2x1xf32>
    %642 = arith.cmpf ogt, %623, %641 : vector<2x1xf32>
    %643 = vector.shape_cast %642 : vector<2x1xi1> to vector<2x1xi1>
    %644 = vector.broadcast %643 : vector<2x1xi1> to vector<2x3xi1>
    %645 = arith.select %644, %640, %620 : vector<2x3xi1>, vector<2x3xf32>
    %646 = vector.extract_strided_slice %383 {offsets = [0, 5, 0], sizes = [2, 1, 3], strides = [1, 1, 1]} : vector<2x8x3xf32> to vector<2x1x3xf32>
    %647 = vector.shape_cast %646 : vector<2x1x3xf32> to vector<2x3xf32>
    %648 = vector.extract_strided_slice %388 {offsets = [0, 4], sizes = [2, 1], strides = [1, 1]} : vector<2x6xf32> to vector<2x1xf32>
    %649 = vector.shape_cast %645 : vector<2x3xf32> to vector<2x3x1xf32>
    %650 = vector.shape_cast %386 : vector<3x3xf32> to vector<1x3x3xf32>
    %651 = vector.broadcast %649 : vector<2x3x1xf32> to vector<2x3x3xf32>
    %652 = vector.broadcast %650 : vector<1x3x3xf32> to vector<2x3x3xf32>
    %653 = arith.addf %651, %652 : vector<2x3x3xf32>
    %654 = vector.shape_cast %647 : vector<2x3xf32> to vector<2x1x3xf32>
    %655 = vector.broadcast %654 : vector<2x1x3xf32> to vector<2x3x3xf32>
    %656 = arith.addf %653, %655 : vector<2x3x3xf32>
    %cst_183 = arith.constant dense<0xFF800000> : vector<2x3xf32>
    %657 = vector.multi_reduction <maximumf>, %656, %cst_183 [1] : vector<2x3x3xf32> to vector<2x3xf32>
    %658 = vector.shape_cast %657 : vector<2x3xf32> to vector<2x1x3xf32>
    %659 = vector.shape_cast %658 : vector<2x1x3xf32> to vector<2x3xf32>
    %660 = vector.broadcast %658 : vector<2x1x3xf32> to vector<2x3x3xf32>
    %661 = arith.subf %656, %660 : vector<2x3x3xf32>
    %662 = math.exp %661 : vector<2x3x3xf32>
    %cst_184 = arith.constant dense<0.000000e+00> : vector<2x3xf32>
    %663 = vector.multi_reduction <add>, %662, %cst_184 [1] : vector<2x3x3xf32> to vector<2x3xf32>
    %664 = math.log %663 : vector<2x3xf32>
    %665 = arith.addf %659, %664 : vector<2x3xf32>
    %cst_185 = arith.constant 0.000000e+00 : f32
    %666 = vector.broadcast %cst_185 : f32 to vector<2x1xf32>
    %667 = arith.cmpf ogt, %648, %666 : vector<2x1xf32>
    %668 = vector.shape_cast %667 : vector<2x1xi1> to vector<2x1xi1>
    %669 = vector.broadcast %668 : vector<2x1xi1> to vector<2x3xi1>
    %670 = arith.select %669, %665, %645 : vector<2x3xi1>, vector<2x3xf32>
    %671 = vector.extract_strided_slice %383 {offsets = [0, 6, 0], sizes = [2, 1, 3], strides = [1, 1, 1]} : vector<2x8x3xf32> to vector<2x1x3xf32>
    %672 = vector.shape_cast %671 : vector<2x1x3xf32> to vector<2x3xf32>
    %673 = vector.extract_strided_slice %388 {offsets = [0, 5], sizes = [2, 1], strides = [1, 1]} : vector<2x6xf32> to vector<2x1xf32>
    %674 = vector.shape_cast %670 : vector<2x3xf32> to vector<2x3x1xf32>
    %675 = vector.shape_cast %386 : vector<3x3xf32> to vector<1x3x3xf32>
    %676 = vector.broadcast %674 : vector<2x3x1xf32> to vector<2x3x3xf32>
    %677 = vector.broadcast %675 : vector<1x3x3xf32> to vector<2x3x3xf32>
    %678 = arith.addf %676, %677 : vector<2x3x3xf32>
    %679 = vector.shape_cast %672 : vector<2x3xf32> to vector<2x1x3xf32>
    %680 = vector.broadcast %679 : vector<2x1x3xf32> to vector<2x3x3xf32>
    %681 = arith.addf %678, %680 : vector<2x3x3xf32>
    %cst_186 = arith.constant dense<0xFF800000> : vector<2x3xf32>
    %682 = vector.multi_reduction <maximumf>, %681, %cst_186 [1] : vector<2x3x3xf32> to vector<2x3xf32>
    %683 = vector.shape_cast %682 : vector<2x3xf32> to vector<2x1x3xf32>
    %684 = vector.shape_cast %683 : vector<2x1x3xf32> to vector<2x3xf32>
    %685 = vector.broadcast %683 : vector<2x1x3xf32> to vector<2x3x3xf32>
    %686 = arith.subf %681, %685 : vector<2x3x3xf32>
    %687 = math.exp %686 : vector<2x3x3xf32>
    %cst_187 = arith.constant dense<0.000000e+00> : vector<2x3xf32>
    %688 = vector.multi_reduction <add>, %687, %cst_187 [1] : vector<2x3x3xf32> to vector<2x3xf32>
    %689 = math.log %688 : vector<2x3xf32>
    %690 = arith.addf %684, %689 : vector<2x3xf32>
    %cst_188 = arith.constant 0.000000e+00 : f32
    %691 = vector.broadcast %cst_188 : f32 to vector<2x1xf32>
    %692 = arith.cmpf ogt, %673, %691 : vector<2x1xf32>
    %693 = vector.shape_cast %692 : vector<2x1xi1> to vector<2x1xi1>
    %694 = vector.broadcast %693 : vector<2x1xi1> to vector<2x3xi1>
    %695 = arith.select %694, %690, %670 : vector<2x3xi1>, vector<2x3xf32>
    %696 = vector.broadcast %385 : vector<1x3xf32> to vector<2x3xf32>
    %697 = arith.addf %695, %696 : vector<2x3xf32>
    %cst_189 = arith.constant dense<0xFF800000> : vector<2xf32>
    %698 = vector.multi_reduction <maximumf>, %697, %cst_189 [1] : vector<2x3xf32> to vector<2xf32>
    %699 = vector.shape_cast %698 : vector<2xf32> to vector<2x1xf32>
    %700 = vector.broadcast %699 : vector<2x1xf32> to vector<2x3xf32>
    %701 = arith.subf %697, %700 : vector<2x3xf32>
    %702 = math.exp %701 : vector<2x3xf32>
    %cst_190 = arith.constant dense<0.000000e+00> : vector<2xf32>
    %703 = vector.multi_reduction <add>, %702, %cst_190 [1] : vector<2x3xf32> to vector<2xf32>
    %704 = vector.shape_cast %703 : vector<2xf32> to vector<2x1xf32>
    %705 = math.log %704 : vector<2x1xf32>
    %706 = arith.addf %699, %705 : vector<2x1xf32>
    %707 = arith.subf %568, %706 : vector<2x1xf32>
    %c0_191 = arith.constant 0 : index
    %c0_192 = arith.constant 0 : index
    %708 = vector.load %arg4[%c0_191, %c0_192] : memref<2x1xf32, #tpu.memory_space<vmem>>, vector<2x1xf32>
    tpu.vector_store %arg4[%c0_191, %c0_192], %707 {strides = array<i32>} : memref<2x1xf32, #tpu.memory_space<vmem>>, vector<2x1xf32>,
    %709 = vector.broadcast %384 : vector<1x3xf32> to vector<2x3xf32>
    %710 = arith.addf %709, %396 : vector<2x3xf32>
    %711 = tpu.iota {dimensions = array<i32: 1>} : vector<2x3x3xi32>
    %712 = vector.extract_strided_slice %383 {offsets = [0, 2, 0], sizes = [2, 1, 3], strides = [1, 1, 1]} : vector<2x8x3xf32> to vector<2x1x3xf32>
    %713 = vector.shape_cast %712 : vector<2x1x3xf32> to vector<2x3xf32>
    %714 = vector.extract_strided_slice %388 {offsets = [0, 1], sizes = [2, 1], strides = [1, 1]} : vector<2x6xf32> to vector<2x1xf32>
    %715 = vector.shape_cast %710 : vector<2x3xf32> to vector<2x3x1xf32>
    %716 = vector.shape_cast %386 : vector<3x3xf32> to vector<1x3x3xf32>
    %717 = vector.broadcast %715 : vector<2x3x1xf32> to vector<2x3x3xf32>
    %718 = vector.broadcast %716 : vector<1x3x3xf32> to vector<2x3x3xf32>
    %719 = arith.addf %717, %718 : vector<2x3x3xf32>
    %720 = vector.shape_cast %713 : vector<2x3xf32> to vector<2x1x3xf32>
    %721 = vector.broadcast %720 : vector<2x1x3xf32> to vector<2x3x3xf32>
    %722 = arith.addf %719, %721 : vector<2x3x3xf32>
    %cst_193 = arith.constant dense<0xFF800000> : vector<2x3xf32>
    %723 = vector.multi_reduction <maximumf>, %722, %cst_193 [1] : vector<2x3x3xf32> to vector<2x3xf32>
    %724 = vector.shape_cast %723 : vector<2x3xf32> to vector<2x1x3xf32>
    %725 = vector.broadcast %724 : vector<2x1x3xf32> to vector<2x3x3xf32>
    %726 = arith.cmpf oeq, %722, %725 : vector<2x3x3xf32>
    %c3_i32_194 = arith.constant 3 : i32
    %727 = vector.broadcast %c3_i32_194 : i32 to vector<2x3x3xi32>
    %728 = arith.select %726, %711, %727 : vector<2x3x3xi1>, vector<2x3x3xi32>
    %cst_195 = arith.constant dense<2147483647> : vector<2x3xi32>
    %729 = vector.multi_reduction <minsi>, %728, %cst_195 [1] : vector<2x3x3xi32> to vector<2x3xi32>
    %cst_196 = arith.constant 0.000000e+00 : f32
    %730 = vector.broadcast %cst_196 : f32 to vector<2x1xf32>
    %731 = arith.cmpf ogt, %714, %730 : vector<2x1xf32>
    %732 = vector.shape_cast %731 : vector<2x1xi1> to vector<2x1xi1>
    %733 = vector.broadcast %732 : vector<2x1xi1> to vector<2x3xi1>
    %734 = arith.select %733, %723, %710 : vector<2x3xi1>, vector<2x3xf32>
    %735 = vector.extract_strided_slice %383 {offsets = [0, 3, 0], sizes = [2, 1, 3], strides = [1, 1, 1]} : vector<2x8x3xf32> to vector<2x1x3xf32>
    %736 = vector.shape_cast %735 : vector<2x1x3xf32> to vector<2x3xf32>
    %737 = vector.extract_strided_slice %388 {offsets = [0, 2], sizes = [2, 1], strides = [1, 1]} : vector<2x6xf32> to vector<2x1xf32>
    %738 = vector.shape_cast %734 : vector<2x3xf32> to vector<2x3x1xf32>
    %739 = vector.shape_cast %386 : vector<3x3xf32> to vector<1x3x3xf32>
    %740 = vector.broadcast %738 : vector<2x3x1xf32> to vector<2x3x3xf32>
    %741 = vector.broadcast %739 : vector<1x3x3xf32> to vector<2x3x3xf32>
    %742 = arith.addf %740, %741 : vector<2x3x3xf32>
    %743 = vector.shape_cast %736 : vector<2x3xf32> to vector<2x1x3xf32>
    %744 = vector.broadcast %743 : vector<2x1x3xf32> to vector<2x3x3xf32>
    %745 = arith.addf %742, %744 : vector<2x3x3xf32>
    %cst_197 = arith.constant dense<0xFF800000> : vector<2x3xf32>
    %746 = vector.multi_reduction <maximumf>, %745, %cst_197 [1] : vector<2x3x3xf32> to vector<2x3xf32>
    %747 = vector.shape_cast %746 : vector<2x3xf32> to vector<2x1x3xf32>
    %748 = vector.broadcast %747 : vector<2x1x3xf32> to vector<2x3x3xf32>
    %749 = arith.cmpf oeq, %745, %748 : vector<2x3x3xf32>
    %c3_i32_198 = arith.constant 3 : i32
    %750 = vector.broadcast %c3_i32_198 : i32 to vector<2x3x3xi32>
    %751 = arith.select %749, %711, %750 : vector<2x3x3xi1>, vector<2x3x3xi32>
    %cst_199 = arith.constant dense<2147483647> : vector<2x3xi32>
    %752 = vector.multi_reduction <minsi>, %751, %cst_199 [1] : vector<2x3x3xi32> to vector<2x3xi32>
    %cst_200 = arith.constant 0.000000e+00 : f32
    %753 = vector.broadcast %cst_200 : f32 to vector<2x1xf32>
    %754 = arith.cmpf ogt, %737, %753 : vector<2x1xf32>
    %755 = vector.shape_cast %754 : vector<2x1xi1> to vector<2x1xi1>
    %756 = vector.broadcast %755 : vector<2x1xi1> to vector<2x3xi1>
    %757 = arith.select %756, %746, %734 : vector<2x3xi1>, vector<2x3xf32>
    %758 = vector.extract_strided_slice %383 {offsets = [0, 4, 0], sizes = [2, 1, 3], strides = [1, 1, 1]} : vector<2x8x3xf32> to vector<2x1x3xf32>
    %759 = vector.shape_cast %758 : vector<2x1x3xf32> to vector<2x3xf32>
    %760 = vector.extract_strided_slice %388 {offsets = [0, 3], sizes = [2, 1], strides = [1, 1]} : vector<2x6xf32> to vector<2x1xf32>
    %761 = vector.shape_cast %757 : vector<2x3xf32> to vector<2x3x1xf32>
    %762 = vector.shape_cast %386 : vector<3x3xf32> to vector<1x3x3xf32>
    %763 = vector.broadcast %761 : vector<2x3x1xf32> to vector<2x3x3xf32>
    %764 = vector.broadcast %762 : vector<1x3x3xf32> to vector<2x3x3xf32>
    %765 = arith.addf %763, %764 : vector<2x3x3xf32>
    %766 = vector.shape_cast %759 : vector<2x3xf32> to vector<2x1x3xf32>
    %767 = vector.broadcast %766 : vector<2x1x3xf32> to vector<2x3x3xf32>
    %768 = arith.addf %765, %767 : vector<2x3x3xf32>
    %cst_201 = arith.constant dense<0xFF800000> : vector<2x3xf32>
    %769 = vector.multi_reduction <maximumf>, %768, %cst_201 [1] : vector<2x3x3xf32> to vector<2x3xf32>
    %770 = vector.shape_cast %769 : vector<2x3xf32> to vector<2x1x3xf32>
    %771 = vector.broadcast %770 : vector<2x1x3xf32> to vector<2x3x3xf32>
    %772 = arith.cmpf oeq, %768, %771 : vector<2x3x3xf32>
    %c3_i32_202 = arith.constant 3 : i32
    %773 = vector.broadcast %c3_i32_202 : i32 to vector<2x3x3xi32>
    %774 = arith.select %772, %711, %773 : vector<2x3x3xi1>, vector<2x3x3xi32>
    %cst_203 = arith.constant dense<2147483647> : vector<2x3xi32>
    %775 = vector.multi_reduction <minsi>, %774, %cst_203 [1] : vector<2x3x3xi32> to vector<2x3xi32>
    %cst_204 = arith.constant 0.000000e+00 : f32
    %776 = vector.broadcast %cst_204 : f32 to vector<2x1xf32>
    %777 = arith.cmpf ogt, %760, %776 : vector<2x1xf32>
    %778 = vector.shape_cast %777 : vector<2x1xi1> to vector<2x1xi1>
    %779 = vector.broadcast %778 : vector<2x1xi1> to vector<2x3xi1>
    %780 = arith.select %779, %769, %757 : vector<2x3xi1>, vector<2x3xf32>
    %781 = vector.extract_strided_slice %383 {offsets = [0, 5, 0], sizes = [2, 1, 3], strides = [1, 1, 1]} : vector<2x8x3xf32> to vector<2x1x3xf32>
    %782 = vector.shape_cast %781 : vector<2x1x3xf32> to vector<2x3xf32>
    %783 = vector.extract_strided_slice %388 {offsets = [0, 4], sizes = [2, 1], strides = [1, 1]} : vector<2x6xf32> to vector<2x1xf32>
    %784 = vector.shape_cast %780 : vector<2x3xf32> to vector<2x3x1xf32>
    %785 = vector.shape_cast %386 : vector<3x3xf32> to vector<1x3x3xf32>
    %786 = vector.broadcast %784 : vector<2x3x1xf32> to vector<2x3x3xf32>
    %787 = vector.broadcast %785 : vector<1x3x3xf32> to vector<2x3x3xf32>
    %788 = arith.addf %786, %787 : vector<2x3x3xf32>
    %789 = vector.shape_cast %782 : vector<2x3xf32> to vector<2x1x3xf32>
    %790 = vector.broadcast %789 : vector<2x1x3xf32> to vector<2x3x3xf32>
    %791 = arith.addf %788, %790 : vector<2x3x3xf32>
    %cst_205 = arith.constant dense<0xFF800000> : vector<2x3xf32>
    %792 = vector.multi_reduction <maximumf>, %791, %cst_205 [1] : vector<2x3x3xf32> to vector<2x3xf32>
    %793 = vector.shape_cast %792 : vector<2x3xf32> to vector<2x1x3xf32>
    %794 = vector.broadcast %793 : vector<2x1x3xf32> to vector<2x3x3xf32>
    %795 = arith.cmpf oeq, %791, %794 : vector<2x3x3xf32>
    %c3_i32_206 = arith.constant 3 : i32
    %796 = vector.broadcast %c3_i32_206 : i32 to vector<2x3x3xi32>
    %797 = arith.select %795, %711, %796 : vector<2x3x3xi1>, vector<2x3x3xi32>
    %cst_207 = arith.constant dense<2147483647> : vector<2x3xi32>
    %798 = vector.multi_reduction <minsi>, %797, %cst_207 [1] : vector<2x3x3xi32> to vector<2x3xi32>
    %cst_208 = arith.constant 0.000000e+00 : f32
    %799 = vector.broadcast %cst_208 : f32 to vector<2x1xf32>
    %800 = arith.cmpf ogt, %783, %799 : vector<2x1xf32>
    %801 = vector.shape_cast %800 : vector<2x1xi1> to vector<2x1xi1>
    %802 = vector.broadcast %801 : vector<2x1xi1> to vector<2x3xi1>
    %803 = arith.select %802, %792, %780 : vector<2x3xi1>, vector<2x3xf32>
    %804 = vector.extract_strided_slice %383 {offsets = [0, 6, 0], sizes = [2, 1, 3], strides = [1, 1, 1]} : vector<2x8x3xf32> to vector<2x1x3xf32>
    %805 = vector.shape_cast %804 : vector<2x1x3xf32> to vector<2x3xf32>
    %806 = vector.extract_strided_slice %388 {offsets = [0, 5], sizes = [2, 1], strides = [1, 1]} : vector<2x6xf32> to vector<2x1xf32>
    %807 = vector.shape_cast %803 : vector<2x3xf32> to vector<2x3x1xf32>
    %808 = vector.shape_cast %386 : vector<3x3xf32> to vector<1x3x3xf32>
    %809 = vector.broadcast %807 : vector<2x3x1xf32> to vector<2x3x3xf32>
    %810 = vector.broadcast %808 : vector<1x3x3xf32> to vector<2x3x3xf32>
    %811 = arith.addf %809, %810 : vector<2x3x3xf32>
    %812 = vector.shape_cast %805 : vector<2x3xf32> to vector<2x1x3xf32>
    %813 = vector.broadcast %812 : vector<2x1x3xf32> to vector<2x3x3xf32>
    %814 = arith.addf %811, %813 : vector<2x3x3xf32>
    %cst_209 = arith.constant dense<0xFF800000> : vector<2x3xf32>
    %815 = vector.multi_reduction <maximumf>, %814, %cst_209 [1] : vector<2x3x3xf32> to vector<2x3xf32>
    %816 = vector.shape_cast %815 : vector<2x3xf32> to vector<2x1x3xf32>
    %817 = vector.broadcast %816 : vector<2x1x3xf32> to vector<2x3x3xf32>
    %818 = arith.cmpf oeq, %814, %817 : vector<2x3x3xf32>
    %c3_i32_210 = arith.constant 3 : i32
    %819 = vector.broadcast %c3_i32_210 : i32 to vector<2x3x3xi32>
    %820 = arith.select %818, %711, %819 : vector<2x3x3xi1>, vector<2x3x3xi32>
    %cst_211 = arith.constant dense<2147483647> : vector<2x3xi32>
    %821 = vector.multi_reduction <minsi>, %820, %cst_211 [1] : vector<2x3x3xi32> to vector<2x3xi32>
    %cst_212 = arith.constant 0.000000e+00 : f32
    %822 = vector.broadcast %cst_212 : f32 to vector<2x1xf32>
    %823 = arith.cmpf ogt, %806, %822 : vector<2x1xf32>
    %824 = vector.shape_cast %823 : vector<2x1xi1> to vector<2x1xi1>
    %825 = vector.broadcast %824 : vector<2x1xi1> to vector<2x3xi1>
    %826 = arith.select %825, %815, %803 : vector<2x3xi1>, vector<2x3xf32>
    %827 = vector.broadcast %385 : vector<1x3xf32> to vector<2x3xf32>
    %828 = arith.addf %826, %827 : vector<2x3xf32>
    %cst_213 = arith.constant dense<0xFF800000> : vector<2xf32>
    %829 = vector.multi_reduction <maximumf>, %828, %cst_213 [1] : vector<2x3xf32> to vector<2xf32>
    %830 = vector.shape_cast %829 : vector<2xf32> to vector<2x1xf32>
    %831 = vector.broadcast %830 : vector<2x1xf32> to vector<2x3xf32>
    %832 = arith.cmpf oeq, %828, %831 : vector<2x3xf32>
    %c3_i32_214 = arith.constant 3 : i32
    %833 = vector.broadcast %c3_i32_214 : i32 to vector<2x3xi32>
    %834 = arith.select %832, %389, %833 : vector<2x3xi1>, vector<2x3xi32>
    %cst_215 = arith.constant dense<2147483647> : vector<2xi32>
    %835 = vector.multi_reduction <minsi>, %834, %cst_215 [1] : vector<2x3xi32> to vector<2xi32>
    %836 = vector.shape_cast %835 : vector<2xi32> to vector<2x1xi32>
    %837 = tpu.iota {dimensions = array<i32: 1>} : vector<2x6xi32>
    %c0_i32_216 = arith.constant 0 : i32
    %838 = vector.broadcast %c0_i32_216 : i32 to vector<2x1xi32>
    %c0_i32_217 = arith.constant 0 : i32
    %839 = vector.broadcast %c0_i32_217 : i32 to vector<2x6xi32>
    %c5_i32_218 = arith.constant 5 : i32
    %840 = vector.broadcast %c5_i32_218 : i32 to vector<2x1xi32>
    %841 = arith.cmpi eq, %394, %840 : vector<2x1xi32>
    %842 = arith.select %841, %836, %838 : vector<2x1xi1>, vector<2x1xi32>
    %c5_i32_219 = arith.constant 5 : i32
    %843 = vector.broadcast %c5_i32_219 : i32 to vector<2x1xi32>
    %844 = arith.cmpi sge, %394, %843 : vector<2x1xi32>
    %c5_i32_220 = arith.constant 5 : i32
    %845 = vector.broadcast %c5_i32_220 : i32 to vector<2x6xi32>
    %846 = arith.cmpi eq, %837, %845 : vector<2x6xi32>
    %847 = vector.broadcast %844 : vector<2x1xi1> to vector<2x6xi1>
    %848 = arith.andi %846, %847 : vector<2x6xi1>
    %849 = vector.shape_cast %842 : vector<2x1xi32> to vector<2x1xi32>
    %850 = vector.broadcast %849 : vector<2x1xi32> to vector<2x6xi32>
    %851 = arith.select %848, %850, %839 : vector<2x6xi1>, vector<2x6xi32>
    %852 = vector.broadcast %842 : vector<2x1xi32> to vector<2x3xi32>
    %853 = arith.cmpi eq, %389, %852 : vector<2x3xi32>
    %c0_i32_221 = arith.constant 0 : i32
    %854 = vector.broadcast %c0_i32_221 : i32 to vector<2x3xi32>
    %855 = arith.select %853, %821, %854 : vector<2x3xi1>, vector<2x3xi32>
    %cst_222 = arith.constant dense<0> : vector<2xi32>
    %856 = vector.multi_reduction <add>, %855, %cst_222 [1] : vector<2x3xi32> to vector<2xi32>
    %857 = vector.shape_cast %856 : vector<2xi32> to vector<2x1xi32>
    %858 = arith.select %844, %857, %842 : vector<2x1xi1>, vector<2x1xi32>
    %c4_i32_223 = arith.constant 4 : i32
    %859 = vector.broadcast %c4_i32_223 : i32 to vector<2x1xi32>
    %860 = arith.cmpi eq, %394, %859 : vector<2x1xi32>
    %861 = arith.select %860, %836, %858 : vector<2x1xi1>, vector<2x1xi32>
    %c4_i32_224 = arith.constant 4 : i32
    %862 = vector.broadcast %c4_i32_224 : i32 to vector<2x1xi32>
    %863 = arith.cmpi sge, %394, %862 : vector<2x1xi32>
    %c4_i32_225 = arith.constant 4 : i32
    %864 = vector.broadcast %c4_i32_225 : i32 to vector<2x6xi32>
    %865 = arith.cmpi eq, %837, %864 : vector<2x6xi32>
    %866 = vector.broadcast %863 : vector<2x1xi1> to vector<2x6xi1>
    %867 = arith.andi %865, %866 : vector<2x6xi1>
    %868 = vector.shape_cast %861 : vector<2x1xi32> to vector<2x1xi32>
    %869 = vector.broadcast %868 : vector<2x1xi32> to vector<2x6xi32>
    %870 = arith.select %867, %869, %851 : vector<2x6xi1>, vector<2x6xi32>
    %871 = vector.broadcast %861 : vector<2x1xi32> to vector<2x3xi32>
    %872 = arith.cmpi eq, %389, %871 : vector<2x3xi32>
    %c0_i32_226 = arith.constant 0 : i32
    %873 = vector.broadcast %c0_i32_226 : i32 to vector<2x3xi32>
    %874 = arith.select %872, %798, %873 : vector<2x3xi1>, vector<2x3xi32>
    %cst_227 = arith.constant dense<0> : vector<2xi32>
    %875 = vector.multi_reduction <add>, %874, %cst_227 [1] : vector<2x3xi32> to vector<2xi32>
    %876 = vector.shape_cast %875 : vector<2xi32> to vector<2x1xi32>
    %877 = arith.select %863, %876, %861 : vector<2x1xi1>, vector<2x1xi32>
    %c3_i32_228 = arith.constant 3 : i32
    %878 = vector.broadcast %c3_i32_228 : i32 to vector<2x1xi32>
    %879 = arith.cmpi eq, %394, %878 : vector<2x1xi32>
    %880 = arith.select %879, %836, %877 : vector<2x1xi1>, vector<2x1xi32>
    %c3_i32_229 = arith.constant 3 : i32
    %881 = vector.broadcast %c3_i32_229 : i32 to vector<2x1xi32>
    %882 = arith.cmpi sge, %394, %881 : vector<2x1xi32>
    %c3_i32_230 = arith.constant 3 : i32
    %883 = vector.broadcast %c3_i32_230 : i32 to vector<2x6xi32>
    %884 = arith.cmpi eq, %837, %883 : vector<2x6xi32>
    %885 = vector.broadcast %882 : vector<2x1xi1> to vector<2x6xi1>
    %886 = arith.andi %884, %885 : vector<2x6xi1>
    %887 = vector.shape_cast %880 : vector<2x1xi32> to vector<2x1xi32>
    %888 = vector.broadcast %887 : vector<2x1xi32> to vector<2x6xi32>
    %889 = arith.select %886, %888, %870 : vector<2x6xi1>, vector<2x6xi32>
    %890 = vector.broadcast %880 : vector<2x1xi32> to vector<2x3xi32>
    %891 = arith.cmpi eq, %389, %890 : vector<2x3xi32>
    %c0_i32_231 = arith.constant 0 : i32
    %892 = vector.broadcast %c0_i32_231 : i32 to vector<2x3xi32>
    %893 = arith.select %891, %775, %892 : vector<2x3xi1>, vector<2x3xi32>
    %cst_232 = arith.constant dense<0> : vector<2xi32>
    %894 = vector.multi_reduction <add>, %893, %cst_232 [1] : vector<2x3xi32> to vector<2xi32>
    %895 = vector.shape_cast %894 : vector<2xi32> to vector<2x1xi32>
    %896 = arith.select %882, %895, %880 : vector<2x1xi1>, vector<2x1xi32>
    %c2_i32_233 = arith.constant 2 : i32
    %897 = vector.broadcast %c2_i32_233 : i32 to vector<2x1xi32>
    %898 = arith.cmpi eq, %394, %897 : vector<2x1xi32>
    %899 = arith.select %898, %836, %896 : vector<2x1xi1>, vector<2x1xi32>
    %c2_i32_234 = arith.constant 2 : i32
    %900 = vector.broadcast %c2_i32_234 : i32 to vector<2x1xi32>
    %901 = arith.cmpi sge, %394, %900 : vector<2x1xi32>
    %c2_i32_235 = arith.constant 2 : i32
    %902 = vector.broadcast %c2_i32_235 : i32 to vector<2x6xi32>
    %903 = arith.cmpi eq, %837, %902 : vector<2x6xi32>
    %904 = vector.broadcast %901 : vector<2x1xi1> to vector<2x6xi1>
    %905 = arith.andi %903, %904 : vector<2x6xi1>
    %906 = vector.shape_cast %899 : vector<2x1xi32> to vector<2x1xi32>
    %907 = vector.broadcast %906 : vector<2x1xi32> to vector<2x6xi32>
    %908 = arith.select %905, %907, %889 : vector<2x6xi1>, vector<2x6xi32>
    %909 = vector.broadcast %899 : vector<2x1xi32> to vector<2x3xi32>
    %910 = arith.cmpi eq, %389, %909 : vector<2x3xi32>
    %c0_i32_236 = arith.constant 0 : i32
    %911 = vector.broadcast %c0_i32_236 : i32 to vector<2x3xi32>
    %912 = arith.select %910, %752, %911 : vector<2x3xi1>, vector<2x3xi32>
    %cst_237 = arith.constant dense<0> : vector<2xi32>
    %913 = vector.multi_reduction <add>, %912, %cst_237 [1] : vector<2x3xi32> to vector<2xi32>
    %914 = vector.shape_cast %913 : vector<2xi32> to vector<2x1xi32>
    %915 = arith.select %901, %914, %899 : vector<2x1xi1>, vector<2x1xi32>
    %c1_i32_238 = arith.constant 1 : i32
    %916 = vector.broadcast %c1_i32_238 : i32 to vector<2x1xi32>
    %917 = arith.cmpi eq, %394, %916 : vector<2x1xi32>
    %918 = arith.select %917, %836, %915 : vector<2x1xi1>, vector<2x1xi32>
    %c1_i32_239 = arith.constant 1 : i32
    %919 = vector.broadcast %c1_i32_239 : i32 to vector<2x1xi32>
    %920 = arith.cmpi sge, %394, %919 : vector<2x1xi32>
    %c1_i32_240 = arith.constant 1 : i32
    %921 = vector.broadcast %c1_i32_240 : i32 to vector<2x6xi32>
    %922 = arith.cmpi eq, %837, %921 : vector<2x6xi32>
    %923 = vector.broadcast %920 : vector<2x1xi1> to vector<2x6xi1>
    %924 = arith.andi %922, %923 : vector<2x6xi1>
    %925 = vector.shape_cast %918 : vector<2x1xi32> to vector<2x1xi32>
    %926 = vector.broadcast %925 : vector<2x1xi32> to vector<2x6xi32>
    %927 = arith.select %924, %926, %908 : vector<2x6xi1>, vector<2x6xi32>
    %928 = vector.broadcast %918 : vector<2x1xi32> to vector<2x3xi32>
    %929 = arith.cmpi eq, %389, %928 : vector<2x3xi32>
    %c0_i32_241 = arith.constant 0 : i32
    %930 = vector.broadcast %c0_i32_241 : i32 to vector<2x3xi32>
    %931 = arith.select %929, %729, %930 : vector<2x3xi1>, vector<2x3xi32>
    %cst_242 = arith.constant dense<0> : vector<2xi32>
    %932 = vector.multi_reduction <add>, %931, %cst_242 [1] : vector<2x3xi32> to vector<2xi32>
    %933 = vector.shape_cast %932 : vector<2xi32> to vector<2x1xi32>
    %934 = arith.select %920, %933, %918 : vector<2x1xi1>, vector<2x1xi32>
    %c0_i32_243 = arith.constant 0 : i32
    %935 = vector.broadcast %c0_i32_243 : i32 to vector<2x1xi32>
    %936 = arith.cmpi eq, %394, %935 : vector<2x1xi32>
    %937 = arith.select %936, %836, %934 : vector<2x1xi1>, vector<2x1xi32>
    %c0_i32_244 = arith.constant 0 : i32
    %938 = vector.broadcast %c0_i32_244 : i32 to vector<2x1xi32>
    %939 = arith.cmpi sge, %394, %938 : vector<2x1xi32>
    %c0_i32_245 = arith.constant 0 : i32
    %940 = vector.broadcast %c0_i32_245 : i32 to vector<2x6xi32>
    %941 = arith.cmpi eq, %837, %940 : vector<2x6xi32>
    %942 = vector.broadcast %939 : vector<2x1xi1> to vector<2x6xi1>
    %943 = arith.andi %941, %942 : vector<2x6xi1>
    %944 = vector.shape_cast %937 : vector<2x1xi32> to vector<2x1xi32>
    %945 = vector.broadcast %944 : vector<2x1xi32> to vector<2x6xi32>
    %946 = arith.select %943, %945, %927 : vector<2x6xi1>, vector<2x6xi32>
    %c0_246 = arith.constant 0 : index
    %c0_247 = arith.constant 0 : index
    %947 = vector.load %arg5[%c0_246, %c0_247] : memref<2x6xi32, #tpu.memory_space<vmem>>, vector<2x6xi32>
    tpu.vector_store %arg5[%c0_246, %c0_247], %946 {strides = array<i32>} : memref<2x6xi32, #tpu.memory_space<vmem>>, vector<2x6xi32>,
    return
  }
}

</mosaic_0001>

<bundles_post_ra>
// kernel: bert_crf_forward.1
= control target key start
LH: loop header
LB: loop body
LE: loop exit
PB: predicated region body
PF: predicated region fallthrough
CT: control target
= control target key end

     0   :  { %11 = vsyncpa [#allocation3], 0  ;;  %s6163_s0 = inlined_call_operand.vmem [shape: s32[16,2], index: 0, kind: input, shape index: {}]   ;;  %s6164_s1 = inlined_call_operand.vmem [shape: s32[2,16], index: 1, kind: input, shape index: {}]   ;;  %s6165_s2 = inlined_call_operand.hbm [shape: f32[448,128], index: 2, kind: input, shape index: {}]   ;;  %s6166_s3 = inlined_call_operand.vmem [shape: f32[24,128], index: 3, kind: input, shape index: {}]   ;;  %s6167_s4 = inlined_call_operand.vmem [shape: f32[2,1], index: 4, kind: output, shape index: {0}]   ;;  %s6168_s5 = inlined_call_operand.hbm [shape: s32[2,6], index: 5, kind: output, shape index: {1}]  }
   0x1   :  { %12 = vsyncpa [#allocation4], 0  ;;  %s5177_s18 = smov [#allocation2]   ;;  %s5129_s22 = scalar_lea.hbm %s6165_s2, 7168 }
   0x2   :  { %s22_s19 = sshll.u32 %s5177_s18, 4  ;;  %p5130_p0 = scmp.ne.s32.totalorder %s6165_s2, %s5129_s22  ;;  %s23_s19 = int_to_ptr.vmem [resolvable:$true] %s22_s19 }
   0x3   :  { %p5133_p1 = scmp.lt.u32.totalorder %s5129_s22, %s6165_s2 }
   0x5   :  { %p5135_p2 = pnand %p5133_p1, %p5130_p0 }
   0x7   :  { %5138 = shalt.err (!%p5135_p2)
}
   0x8   :  { %s5139_s27 = scalar_lea.vmem %s23_s19, 7168  ;;  %p5144_p4 = scmp.lt.s32.totalorder %s23_s19, %s23_s19 }
   0x9   :  { %p5140_p3 = scmp.ne.s32.totalorder %s23_s19, %s5139_s27  ;;  %p5145_p5 = scmp.lt.s32.totalorder %s5139_s27, %s5139_s27 }
   0xb   :  { %p5146_p6 = por %p5145_p5, %p5144_p4 }
   0xd   :  { %p5147_p7 = pnand %p5146_p6, %p5140_p3 }
   0xf   :  { %5150 = shalt.err (!%p5147_p7)
}
  0x10   :  { %s5178_s28 = smov 128   ;;  %s5179_s29 = smov 8  }
  0x11   :  { %28 = dma.hbm_to_vmem [thread:$0]  %s6165_s2, 7168, %s23_s19, [#allocation3], %s5178_s28, %s5178_s28, %s5179_s29  }
  0x12   :  { %5173 = dma.done.wait [#allocation3], 7168  }
  0x13   :  { %5174 = vsyncadd [#allocation3], 4294960128  ;;  %v5180_v0 = vmov 0   ;;  %v34_v1 = vld [vmem:[%s6163_s0] sm:$0xff]  ;;  %v35_v2 = vld [vmem:[%s6163_s0 + $0x8] sm:$0xff]  ;;  %v5181_v9 = vmov 1   ;;  %v36_v16 = vlaneseq }
  0x14   :  { %4999 = vset.pattern.permute.xlu0 %v5180_v0  ;;  %5001 = vset.pattern.permute.xlu1 %v5180_v0  ;;  %v50_v3 = vld [vmem:[#allocation2] sm:$0xff]  ;;  %v51_v4 = vld [vmem:[#allocation2 + $0x8] sm:$0xff]  ;;  %v52_v5 = vld [vmem:[#allocation2 + $0x10] sm:$0xff]  ;;  %v5182_v15 = vmov 0.0   ;;  %vm152_vm0 = vcmask 457728   ;;  %vm70_vm3 = vcmask 64512  }
  0x15   :  { %39 = vperm.xlu0 %4999, %v34_v1   ;;  %42 = vperm.xlu1 %5001, %v35_v2   ;;  %v4856_v6 = vpack.c.bf16 %v51_v4, %v50_v3  ;;  %v53_v7 = vld [vmem:[#allocation2 + $0x18] sm:$0xff]  ;;  %v54_v10 = vld [vmem:[#allocation2 + $0x20] sm:$0xff]  ;;  %v55_v11 = vld [vmem:[#allocation2 + $0x28] sm:$0xff]  ;;  %v5264_v17 = vand.u32 127, %v36_v16  ;;  %vm239_vm6 = vcmask 261120   ;;  %vm5183_vm7 = vmmov 0  }
  0x16   :  { %v4860_v8 = vpack.c.bf16 %v53_v7, %v52_v5  ;;  %v69_v12 = vld [vmem:[#allocation2 + $0x58] sm:$0xff]  ;;  %v4864_v13 = vpack.c.bf16 %v55_v11, %v54_v10  ;;  %v56_v14 = vld [vmem:[#allocation2 + $0x30] sm:$0xff]  ;;  %v306_v47 = vld [vmem:[#allocation2 + $0x60] sm:$0xff]  ;;  %s5184_s15 = smov 96   ;;  %vm399_vm8 = vcmask 130048   ;;  %s5186_s18 = smov 64  }
  0x17   :  { %4857 = vmatprep.subr.bf16.mxu0 %v4856_v6  ;;  %4608 = vmatprep.subr.mxu1 %v69_v12  ;;  %v234_v29 = vld [vmem:[#allocation2 + $0x38] sm:$0xff]  ;;  %v307_v48 = vld [vmem:[#allocation2 + $0x68] sm:$0xff]  ;;  %v308_v49 = vld [vmem:[#allocation2 + $0x70] sm:$0xff]  ;;  %s5187_s19 = smov 80   ;;  %s5188_s20 = smov 112   ;;  %vm1445_vm11 = vcmask 523264  }
  0x18   :  { %4859 = vmatpush3.bf16.msra.mxu0 %v4856_v6  ;;  %4609 = vmatpush3.msra.mxu1 %v69_v12  ;;  %v4868_v50 = vpack.c.bf16 %v307_v48, %v306_v47  ;;  %v309_v51 = vld [vmem:[#allocation2 + $0x78] sm:$0xff]  ;;  %v4404_v60 = vld [vmem:[%s6166_s3] ss:$0 sm:$0xff]  ;;  %v4406_v6 = vld [vmem:[%s6166_s3 + $0x2] ss:$0 sm:$0xff]  ;;  %s5189_s21 = smov 48  }
  0x19   :  { %5000 = vset.pattern.permute.xlu0 %v5181_v9  ;;  %5002 = vset.pattern.permute.xlu1 %v5181_v9  ;;  %v4872_v52 = vpack.c.bf16 %v309_v51, %v308_v49  ;;  %vm2937_vm14 = vcmask 1041409   ;;  %s5197_s8 = smov 126   ;;  %s5203_s2 = smov 4  }
  0x1a   :  { %58 = vperm.xlu0 %5000, %v34_v1   ;;  %61 = vperm.xlu1 %5002, %v35_v2   ;;  %v4405_v1 = vld [vmem:[%s6166_s3 + $0x1] ss:$0 sm:$0xff]  ;;  %s5204_s11 = smov 5   ;;  %s5205_s12 = smov 6  }
  0x1b   :  { %4861 = vmatprep.subr.bf16.mxu0 %v4860_v8  ;;  %4869 = vmatprep.subr.bf16.mxu1 %v4868_v50  ;;  %s5206_s13 = smov 7   ;;  %s5207_s16 = smov 3  }
  0x1c   :  { %4863 = vmatpush3.bf16.msra.mxu0 %v4860_v8  ;;  %s5209_s17 = smov 125  }
  0x1d   :  { %4865 = vmatprep.subr.bf16.mxu0 %v4864_v13 }
  0x20   :  { %4867 = vmatpush3.bf16.msra.mxu0 %v4864_v13  ;;  %v279_v13 = vld [vmem:[%s6164_s1] sm:$0x3] }
  0x21   :  { %4625 = vmatprep.subr.mxu0 %v56_v14 }
  0x24   :  { %4626 = vmatpush3.msra.mxu0 %v56_v14  ;;  %v5325_v14 = vcvt.s32.f32 %v279_v13 }
  0x25   :  { %4651 = vmatprep.subr.mxu0 %v5182_v15 }
  0x26   :  { %vm3622_vm15 = vcmp.gt.f32.partialorder %v5325_v14, 0.0 }
  0x94   :  { %v40_v18 = vpop.permute.xlu0 %39  ;;  %v43_v19 = vpop.permute.xlu1 %42 }
  0x95   :  { %vm45_vm1 = vcmp.eq.s32.totalorder %v43_v19, %v5264_v17  ;;  %vm44_vm2 = vcmp.eq.s32.totalorder %v40_v18, %v5264_v17  ;;  %v5185_v18 = vmov 1966171168  }
  0x96   :  { %v4397_v20 = vsel %vm45_vm1, 1.0, %v5182_v15  ;;  %v4396_v21 = vsel %vm44_vm2, 1.0, %v5182_v15  ;;  %v285_v19 = vunpack.c.l.s4 %v5185_v18 }
  0x97   :  { %4627 = vmatprep.mubr.msk.f32.mxu0 %vm152_vm0, %v4396_v21 }
  0x98   :  { %4628 = vmatmul.mubr.msk.f32.vlgmr.msra.gmra.mrb[0].mxu0 %vm152_vm0, %v4397_v20  ;;  %v281_v20 = vsub.f32 1.0, %v5325_v14  ;;  %v286_v21 = vunpack.c.0.s8 %v285_v19  ;;  %vm3581_vm0 = vcmask 18432  }
  0x99   :  { %v59_v22 = vpop.permute.xlu0 %58  ;;  %v62_v23 = vpop.permute.xlu1 %61  ;;  %4653 = vmatprep.mubr.msk.f32.mxu0 %vm5183_vm7, %v5182_v15 }
  0x9a   :  { %vm64_vm4 = vcmp.eq.s32.totalorder %v62_v23, %v5264_v17  ;;  %vm63_vm5 = vcmp.eq.s32.totalorder %v59_v22, %v5264_v17  ;;  %v5329_v22 = vshrl.u32 %v36_v16, 7  ;;  %v282_v23 = vmul.f32 -10000.0, %v281_v20 }
  0x9b   :  { %v4399_v24 = vsel %vm64_vm4, 1.0, %v5182_v15  ;;  %v4398_v25 = vsel %vm63_vm5, 1.0, %v5182_v15 }
  0x9c   :  { %4610 = vmatprep.mubr.msk.f32.mxu1 %vm70_vm3, %v4398_v25 }
  0x9d   :  { %4611 = vmatmul.mubr.msk.f32.vlgmr.msra.gmra.mrb[0].mxu1 %vm70_vm3, %v4399_v24  ;;  %v289_v24 = vsub.s32 %v286_v21, %v5329_v22 }
  0x9e   :  { %4871 = vmatpush3.bf16.msra.mxu1 %v4868_v50 }
  0x9f   :  { %4873 = vmatprep.subr.bf16.mxu1 %v4872_v52  ;;  %v290_v25 = vrot.slane %v282_v23, %v289_v24 }
  0xa2   :  { %4875 = vmatpush3.bf16.msra.mxu1 %v4872_v52 }
  0xa3   :  { %4641 = vmatprep.subr.mxu1 %v5182_v15 }
 0x16b   :  { %v4629_v26 = vpop.f32.mrb[0].mxu0 }
 0x16c   :  { %v225_v27 = vpop.f32.mrb[1].mxu0 }
 0x170   :  { %v4612_v28 = vpop.f32.mrb[0].mxu1 }
 0x171   :  { %v231_v30 = vadd.f32 %v4629_v26, %v4612_v28  ;;  %v143_v31 = vpop.f32.mrb[1].mxu1  ;;  %v298_v26 = vrot.slane %v290_v25, %v289_v24  ;;  %v291_v28 = vcombine.high %v290_v25, %v290_v25 }
 0x172   :  { %v226_v32 = vadd.f32 %v225_v27, %v143_v31  ;;  %v5333_v27 = vsub.s32 0, %v5329_v22 }
 0x173   :  { %v236_v33 = vadd.f32 %v234_v29, %v231_v30  ;;  %v305_v30 = vrot.slane %v291_v28, %v289_v24 }
 0x174   :  { %v235_v34 = vadd.f32 %v234_v29, %v226_v32  ;;  %v5336_v29 = vrot.slane %v298_v26, %v5333_v27 }
 0x175   :  { %v243_v35 = vsel %vm239_vm6, %v236_v33, 0.0  ;;  %v5340_v16 = vrot.slane %v305_v30, %v5333_v27 }
 0x176   :  { %244 = vadd.xlane.f32.xlu0 %v243_v35  ;;  %v240_v36 = vsel %vm239_vm6, %v235_v34, 0.0 }
 0x177   :  { %241 = vadd.xlane.f32.xlu1 %v240_v36 }
 0x203   :  { %v245_v37 = vpop.xlane.xlu0 %244 }
 0x204   :  { %v248_v38 = vmul.f32 0.03125, %v245_v37  ;;  %v242_v39 = vpop.xlane.xlu1 %241 }
 0x205   :  { %v247_v40 = vmul.f32 0.03125, %v242_v39 }
 0x206   :  { %v250_v41 = vsub.f32 %v236_v33, %v248_v38 }
 0x207   :  { %v249_v42 = vsub.f32 %v235_v34, %v247_v40 }
 0x208   :  { %v252_v43 = vmul.f32 %v250_v41, %v250_v41 }
 0x209   :  { %v251_v44 = vmul.f32 %v249_v42, %v249_v42 }
 0x20a   :  { %v256_v45 = vsel %vm239_vm6, %v252_v43, 0.0 }
 0x20b   :  { %257 = vadd.xlane.f32.xlu1 %v256_v45  ;;  %v253_v46 = vsel %vm239_vm6, %v251_v44, 0.0 }
 0x20c   :  { %254 = vadd.xlane.f32.xlu0 %v253_v46 }
 0x298   :  { %v258_v53 = vpop.xlane.xlu1 %257 }
 0x299   :  { %v260_v54 = vmul.f32 0.03125, %v258_v53  ;;  %v255_v55 = vpop.xlane.xlu0 %254 }
 0x29a   :  { %v259_v56 = vmul.f32 0.03125, %v255_v55 }
 0x29b   :  { %v262_v57 = vadd.f32 1e-12, %v260_v54 }
 0x29c   :  { %v261_v58 = vadd.f32 1e-12, %v259_v56 }
 0x29d   :  { %5015 = vrsqrt.f32 %v262_v57 }
 0x29e   :  { %5017 = vrsqrt.f32 %v261_v58 }
 0x2a7   :  { %v5016_v59 = vpop.eup %5015 }
 0x2a8   :  { %v5018_v61 = vpop.eup %5017  ;;  %v266_v62 = vmul.f32 %v5016_v59, %v250_v41 }
 0x2a9   :  { %v265_v63 = vmul.f32 %v5018_v61, %v249_v42 }
 0x2aa   :  { %v272_v2 = vmul.f32 %v4404_v60, %v266_v62 }
 0x2ab   :  { %v271_v3 = vmul.f32 %v4404_v60, %v265_v63 }
 0x2ac   :  { %v5289_v5 = vadd.f32 %v4405_v1, %v272_v2 }
 0x2ad   :  { %v5287_v4 = vadd.f32 %v4405_v1, %v271_v3 }
 0x2af   :  { %4638 = vmatprep.mubr.msk.f32.mxu1 %vm239_vm6, %v5287_v4 }
 0x2b0   :  { %4639 = vmatmul.mubr.msk.f32.vlgmr.msra.gmra.mrb[2].mxu1 %vm239_vm6, %v5289_v5 }
 0x2b1   :  { %4643 = vmatprep.mubr.msk.f32.mxu1 %vm5183_vm7, %v5182_v15 }
 0x383   :  { %v4640_v7 = vpop.f32.mrb[2].mxu1 }
 0x384   :  { %v5302_v8 = vadd.f32 %v4640_v7, %v4406_v6  ;;  %v387_v9 = vpop.f32.mrb[3].mxu1 }
 0x385   :  { %v5304_v10 = vadd.f32 %v4406_v6, %v387_v9 }
 0x386   :  { %475 = vrot.lane.b32.xlu1 %v5302_v8, %s5184_s15 }
 0x387   :  { %397 = vrot.lane.b32.xlu0 %v5304_v10, %s5184_s15 }
 0x3f8   :  { %v476_v12 = vpop.permute.xlu1 %475 }
 0x3f9   :  { %v398_v11 = vpop.permute.xlu0 %397 }
 0x3fa   :  { %4642 = vmatpush3.xpose.msk.msra.mxu1 %vm399_vm8, %v398_v11 }
 0x3fb   :  { %4646 = vmatprep.subr.mxu1 %v5182_v15 }
 0x3fd   :  { %4644 = vmatmul.mubr.msk.f32.vlgmr.msra.gmra.mrb[4].mxu1 %vm399_vm8, %v5304_v10 }
 0x3fe   :  { %4647 = vmatpush3.xpose.msk.msra.mxu1 %vm399_vm8, %v476_v12  ;;  %4648 = vmatprep.mubr.msk.f32.mxu1 %vm5183_vm7, %v5182_v15 }
 0x3ff   :  { %4656 = vmatprep.subr.mxu1 %v5182_v15 }
 0x401   :  { %4649 = vmatmul.mubr.msk.f32.vlgmr.msra.gmra.mrb[6].mxu1 %vm399_vm8, %v5302_v8 }
 0x402   :  { %4658 = vmatprep.mubr.msk.f32.mxu1 %vm5183_vm7, %v5182_v15 }
 0x4d0   :  { %v470_v31 = vpop.f32.mrb[4].mxu1 }
 0x4d1   :  { %v551_v32 = vmul.f32 0.25, %v470_v31  ;;  %v4645_v33 = vpop.f32.mrb[5].mxu1 }
 0x4d3   :  { %v563_v34 = vadd.f32 %v5336_v29, %v551_v32 }
 0x4d4   :  { %v547_v35 = vpop.f32.mrb[6].mxu1 }
 0x4d5   :  { %v552_v36 = vmul.f32 0.25, %v547_v35  ;;  %v4650_v37 = vpop.f32.mrb[7].mxu1  ;;  %v565_v38 = vsel %vm70_vm3, %v563_v34, -inf }
 0x4d6   :  { %566 = vmax.xlane.f32.xlu1 %v565_v38 }
 0x4d7   :  { %v564_v39 = vadd.f32 %v5340_v16, %v552_v36 }
 0x4d9   :  { %v568_v40 = vsel %vm70_vm3, %v564_v39, -inf }
 0x4da   :  { %569 = vmax.xlane.f32.xlu0 %v568_v40 }
 0x4e7   :  { %663 = vrot.lane.b32.xlu1 %v5302_v8, %s5186_s18 }
 0x4eb   :  { %743 = vrot.lane.b32.xlu1 %v5304_v10, %s5187_s19 }
 0x4f0   :  { %587 = vrot.lane.b32.xlu0 %v5304_v10, %s5186_s18 }
 0x563   :  { %v567_v41 = vpop.xlane.xlu1 %566 }
 0x564   :  { %v571_v42 = vsub.f32 %v563_v34, %v567_v41 }
 0x566   :  { %v573_v43 = vmul.f32 1.442695, %v571_v42 }
 0x567   :  { %v664_v44 = vpop.permute.xlu1 %663  ;;  %v570_v45 = vpop.xlane.xlu0 %569 }
 0x568   :  { %5019 = vpow2.f32 %v573_v43  ;;  %v572_v46 = vsub.f32 %v564_v39, %v570_v45  ;;  %4657 = vmatpush3.msra.mxu1 %v664_v44  ;;  %v1076_v43 = vld [vmem:[#allocation2 + $0x98] sm:$0xff]  ;;  %v740_v45 = vld [vmem:[#allocation2 + $0x88] sm:$0xff] }
 0x569   :  { %4666 = vmatprep.subr.mxu1 %v5182_v15 }
 0x56a   :  { %v575_v47 = vmul.f32 1.442695, %v572_v46 }
 0x56b   :  { %v588_v48 = vpop.permute.xlu0 %587  ;;  %v744_v53 = vpop.permute.xlu1 %743 }
 0x56c   :  { %5021 = vpow2.f32 %v575_v47  ;;  %4652 = vmatpush3.msra.mxu0 %v588_v48 }
 0x56d   :  { %4661 = vmatprep.subr.mxu0 %v5182_v15 }
 0x572   :  { %v5020_v49 = vpop.eup %5019 }
 0x573   :  { %v577_v50 = vsel %vm70_vm3, %v5020_v49, 0.0 }
 0x574   :  { %578 = vadd.xlane.f32.xlu0 %v577_v50 }
 0x576   :  { %v5022_v51 = vpop.eup %5021 }
 0x577   :  { %v580_v52 = vsel %vm70_vm3, %v5022_v51, 0.0 }
 0x578   :  { %581 = vadd.xlane.f32.xlu1 %v580_v52 }
 0x589   :  { %741 = vrot.lane.b32.xlu1 %v5304_v10, %s5188_s20 }
 0x58a   :  { %821 = vrot.lane.b32.xlu0 %v5302_v8, %s5187_s19 }
 0x58e   :  { %819 = vrot.lane.b32.xlu0 %v5302_v8, %s5188_s20 }
 0x601   :  { %v579_v54 = vpop.xlane.xlu0 %578 }
 0x602   :  { %5023 = vrcp.f32 %v579_v54 }
 0x605   :  { %v582_v55 = vpop.xlane.xlu1 %581  ;;  %v822_v59 = vpop.permute.xlu0 %821 }
 0x606   :  { %5025 = vrcp.f32 %v582_v55 }
 0x609   :  { %v742_v61 = vpop.permute.xlu1 %741  ;;  %v820_v62 = vpop.permute.xlu0 %819 }
 0x60c   :  { %v5024_v56 = vpop.eup %5023 }
 0x60d   :  { %v585_v57 = vmul.f32 %v5024_v56, %v5020_v49 }
 0x60f   :  { %4654 = vmatmul.mubr.msk.f32.vlgmr.msra.gmra.mrb[2].mxu0 %vm70_vm3, %v585_v57 }
 0x610   :  { %v5026_v58 = vpop.eup %5025  ;;  %4662 = vmatpush3.xpose.msk.msra.mxu0 %vm399_vm8, %v744_v53  ;;  %4663 = vmatprep.mubr.msk.f32.mxu0 %vm5183_vm7, %v5182_v15 }
 0x611   :  { %v586_v60 = vmul.f32 %v5026_v58, %v5022_v51  ;;  %4671 = vmatprep.subr.mxu0 %v5182_v15  ;;  %v4425_v51 = vld [vmem:[%s6166_s3 + $0x3] ss:$0 sm:$0xff] }
 0x613   :  { %4659 = vmatmul.mubr.msk.f32.vlgmr.msra.gmra.mrb[8].mxu1 %vm70_vm3, %v586_v60  ;;  %4664 = vmatmul.mubr.msk.f32.vlgmr.msra.gmra.mrb[4].mxu0 %vm399_vm8, %v742_v61 }
 0x614   :  { %4667 = vmatpush3.xpose.msk.msra.mxu1 %vm399_vm8, %v822_v59  ;;  %4668 = vmatprep.mubr.msk.f32.mxu1 %vm5183_vm7, %v5182_v15 }
 0x615   :  { %4676 = vmatprep.subr.mxu1 %v5182_v15  ;;  %4673 = vmatprep.mubr.msk.f32.mxu0 %vm5183_vm7, %v5182_v15 }
 0x617   :  { %4669 = vmatmul.mubr.msk.f32.vlgmr.msra.gmra.mrb[10].mxu1 %vm399_vm8, %v820_v62 }
 0x618   :  { %4678 = vmatprep.mubr.msk.f32.mxu1 %vm5183_vm7, %v5182_v15 }
 0x6e2   :  { %v5377_v63 = vpop.f32.mrb[2].mxu0 }
 0x6e3   :  { %v4655_v1 = vpop.f32.mrb[3].mxu0 }
 0x6e6   :  { %v735_v2 = vpop.f32.mrb[8].mxu1  ;;  %v815_v3 = vpop.f32.mrb[4].mxu0 }
 0x6e7   :  { %v897_v6 = vmul.f32 0.25, %v815_v3  ;;  %v4660_v7 = vpop.f32.mrb[9].mxu1  ;;  %v4665_v9 = vpop.f32.mrb[5].mxu0 }
 0x6e8   :  { %v1289_v9 = vld [vmem:[#allocation2 + $0xa8] sm:$0xff] }
 0x6e9   :  { %v899_v11 = vadd.f32 %v897_v6, %v5336_v29 }
 0x6ea   :  { %v893_v12 = vpop.f32.mrb[10].mxu1 }
 0x6eb   :  { %v898_v13 = vmul.f32 0.25, %v893_v12  ;;  %v4670_v18 = vpop.f32.mrb[11].mxu1  ;;  %v901_v19 = vsel %vm70_vm3, %v899_v11, -inf }
 0x6ec   :  { %902 = vmax.xlane.f32.xlu1 %v901_v19 }
 0x6ed   :  { %v900_v20 = vadd.f32 %v898_v13, %v5340_v16  ;;  %v1291_v13 = vld [vmem:[#allocation2 + $0xb8] sm:$0xff] }
 0x6ef   :  { %v904_v21 = vsel %vm70_vm3, %v900_v20, -inf }
 0x6f0   :  { %905 = vmax.xlane.f32.xlu0 %v904_v21 }
 0x779   :  { %v903_v23 = vpop.xlane.xlu1 %902 }
 0x77a   :  { %v907_v24 = vsub.f32 %v899_v11, %v903_v23  ;;  %v1290_v11 = vld [vmem:[#allocation2 + $0xb0] sm:$0xff] }
 0x77b   :  { %v4888_v18 = vpack.c.bf16 %v1291_v13, %v1290_v11 }
 0x77c   :  { %v909_v25 = vmul.f32 1.442695, %v907_v24 }
 0x77d   :  { %v906_v26 = vpop.xlane.xlu0 %905 }
 0x77e   :  { %5027 = vpow2.f32 %v909_v25  ;;  %v908_v28 = vsub.f32 %v900_v20, %v906_v26 }
 0x780   :  { %v911_v30 = vmul.f32 1.442695, %v908_v28  ;;  %v4426_v28 = vld [vmem:[%s6166_s3 + $0x4] ss:$0 sm:$0xff] }
 0x782   :  { %5029 = vpow2.f32 %v911_v30 }
 0x788   :  { %v5028_v31 = vpop.eup %5027 }
 0x789   :  { %v913_v32 = vsel %vm70_vm3, %v5028_v31, 0.0 }
 0x78a   :  { %914 = vadd.xlane.f32.xlu0 %v913_v32 }
 0x78c   :  { %v5030_v33 = vpop.eup %5029 }
 0x78d   :  { %v916_v34 = vsel %vm70_vm3, %v5030_v33, 0.0 }
 0x78e   :  { %917 = vadd.xlane.f32.xlu1 %v916_v34 }
 0x79f   :  { %999 = vrot.lane.b32.xlu1 %v5302_v8, %s5189_s21  ;;  %v1075_v8 = vld [vmem:[#allocation2 + $0x90] sm:$0xff] }
 0x7a0   :  { %923 = vrot.lane.b32.xlu0 %v5304_v10, %s5189_s21  ;;  %v4876_v44 = vpack.c.bf16 %v1076_v43, %v1075_v8  ;;  %v739_v10 = vld [vmem:[#allocation2 + $0x80] sm:$0xff] }
 0x7a1   :  { %v4880_v46 = vpack.c.bf16 %v740_v45, %v739_v10  ;;  %v1436_v43 = vld [vmem:[#allocation2 + $0xe0] sm:$0xff]  ;;  %v1438_v45 = vld [vmem:[#allocation2 + $0xf0] sm:$0xff] }
 0x817   :  { %v915_v35 = vpop.xlane.xlu0 %914 }
 0x818   :  { %5031 = vrcp.f32 %v915_v35 }
 0x81b   :  { %v918_v36 = vpop.xlane.xlu1 %917  ;;  %v924_v37 = vpop.permute.xlu0 %923 }
 0x81c   :  { %5033 = vrcp.f32 %v918_v36  ;;  %4672 = vmatpush3.msra.mxu0 %v924_v37 }
 0x81d   :  { %4877 = vmatprep.subr.bf16.mxu0 %v4876_v44 }
 0x81f   :  { %v1000_v38 = vpop.permute.xlu1 %999 }
 0x820   :  { %4677 = vmatpush3.msra.mxu1 %v1000_v38  ;;  %v1432_v38 = vld [vmem:[#allocation2 + $0xc0] sm:$0xff] }
 0x822   :  { %v5032_v39 = vpop.eup %5031 }
 0x823   :  { %v921_v40 = vmul.f32 %v5032_v39, %v5028_v31  ;;  %v1433_v39 = vld [vmem:[#allocation2 + $0xc8] sm:$0xff] }
 0x825   :  { %4674 = vmatmul.mubr.msk.f32.vlgmr.msra.gmra.mrb[6].mxu0 %vm70_vm3, %v921_v40  ;;  %v4892_v40 = vpack.c.bf16 %v1433_v39, %v1432_v38 }
 0x826   :  { %v5034_v41 = vpop.eup %5033  ;;  %4879 = vmatpush3.bf16.msra.mxu0 %v4876_v44  ;;  %v1437_v44 = vld [vmem:[#allocation2 + $0xe8] sm:$0xff] }
 0x827   :  { %v922_v42 = vmul.f32 %v5034_v41, %v5030_v33  ;;  %4881 = vmatprep.subr.bf16.mxu0 %v4880_v46  ;;  %v4427_v33 = vld [vmem:[%s6166_s3 + $0x5] ss:$0 sm:$0xff]  ;;  %v1434_v41 = vld [vmem:[#allocation2 + $0xd0] sm:$0xff]  ;;  %v4900_v10 = vpack.c.bf16 %v1437_v44, %v1436_v43 }
 0x829   :  { %4679 = vmatmul.mubr.msk.f32.vlgmr.msra.gmra.mrb[12].mxu1 %vm70_vm3, %v922_v42  ;;  %v1435_v42 = vld [vmem:[#allocation2 + $0xd8] sm:$0xff] }
 0x82a   :  { %v4896_v8 = vpack.c.bf16 %v1435_v42, %v1434_v41 }
 0x8f8   :  { %v995_v47 = vpop.f32.mrb[6].mxu0 }
 0x8f9   :  { %v4675_v48 = vpop.f32.mrb[7].mxu0  ;;  %4685 = vmatprep.mubr.msk.f32.mxu0 %vm399_vm8, %v995_v47 }
 0x8fa   :  { %v4428_v48 = vld [vmem:[%s6166_s3 + $0x6] ss:$0 sm:$0xff] }
 0x8fc   :  { %v1071_v49 = vpop.f32.mrb[12].mxu1 }
 0x8fd   :  { %v4680_v50 = vpop.f32.mrb[13].mxu1  ;;  %4686 = vmatmul.mubr.msk.f32.vlgmr.msra.gmra.mrb[8].mxu0 %vm399_vm8, %v1071_v49 }
 0x8fe   :  { %4883 = vmatpush3.bf16.msra.mxu0 %v4880_v46  ;;  %4692 = vmatprep.mubr.msk.f32.mxu0 %vm399_vm8, %v5377_v63  ;;  %v1439_v46 = vld [vmem:[#allocation2 + $0xf8] sm:$0xff] }
 0x8ff   :  { %4893 = vmatprep.subr.bf16.mxu0 %v4892_v40  ;;  %v4904_v47 = vpack.c.bf16 %v1439_v46, %v1438_v45 }
 0x905   :  { %4693 = vmatmul.mubr.msk.f32.vlgmr.msra.gmra.mrb[8].mxu0 %vm399_vm8, %v735_v2 }
 0x906   :  { %4895 = vmatpush3.bf16.msra.mxu0 %v4892_v40  ;;  %v5190_v40 = vmov -1.0  }
 0x907   :  { %4897 = vmatprep.subr.bf16.mxu0 %v4896_v8 }
 0x90a   :  { %4899 = vmatpush3.bf16.msra.mxu0 %v4896_v8 }
 0x90b   :  { %4901 = vmatprep.subr.bf16.mxu0 %v4900_v10 }
 0x90e   :  { %4903 = vmatpush3.bf16.msra.mxu0 %v4900_v10 }
 0x90f   :  { %4905 = vmatprep.subr.bf16.mxu0 %v4904_v47 }
 0x912   :  { %4907 = vmatpush3.bf16.msra.mxu0 %v4904_v47 }
 0x913   :  { %4746 = vmatprep.subr.mxu0 %v5182_v15 }
 0x9d8   :  { %v4694_v52 = vpop.f32.mrb[8].mxu0 }
 0x9d9   :  { %v1245_v53 = vadd.f32 %v4694_v52, %v4425_v51  ;;  %v1230_v54 = vpop.f32.mrb[9].mxu0 }
 0x9da   :  { %v1244_v55 = vadd.f32 %v4425_v51, %v1230_v54 }
 0x9db   :  { %v1247_v56 = vadd.f32 %v1245_v53, %v5289_v5 }
 0x9dc   :  { %v1246_v57 = vadd.f32 %v1244_v55, %v5287_v4  ;;  %v1288_v4 = vld [vmem:[#allocation2 + $0xa0] sm:$0xff] }
 0x9dd   :  { %v1253_v58 = vsel %vm239_vm6, %v1247_v56, 0.0  ;;  %v4884_v12 = vpack.c.bf16 %v1289_v9, %v1288_v4 }
 0x9de   :  { %1254 = vadd.xlane.f32.xlu0 %v1253_v58  ;;  %v1250_v59 = vsel %vm239_vm6, %v1246_v57, 0.0 }
 0x9df   :  { %1251 = vadd.xlane.f32.xlu1 %v1250_v59  ;;  %4885 = vmatprep.subr.bf16.mxu1 %v4884_v12 }
 0x9e0   :  { %4887 = vmatpush3.bf16.msra.mxu1 %v4884_v12 }
 0x9e1   :  { %4889 = vmatprep.subr.bf16.mxu1 %v4888_v18 }
 0x9e4   :  { %4891 = vmatpush3.bf16.msra.mxu1 %v4888_v18 }
 0xa6b   :  { %v1255_v60 = vpop.xlane.xlu0 %1254 }
 0xa6c   :  { %v1257_v61 = vmul.f32 0.03125, %v1255_v60  ;;  %v1252_v62 = vpop.xlane.xlu1 %1251 }
 0xa6d   :  { %v1256_v63 = vmul.f32 0.03125, %v1252_v62 }
 0xa6e   :  { %v1259_v1 = vsub.f32 %v1247_v56, %v1257_v61 }
 0xa6f   :  { %v1258_v2 = vsub.f32 %v1246_v57, %v1256_v63 }
 0xa70   :  { %v1261_v3 = vmul.f32 %v1259_v1, %v1259_v1 }
 0xa71   :  { %v1260_v6 = vmul.f32 %v1258_v2, %v1258_v2 }
 0xa72   :  { %v1265_v7 = vsel %vm239_vm6, %v1261_v3, 0.0 }
 0xa73   :  { %1266 = vadd.xlane.f32.xlu1 %v1265_v7  ;;  %v1262_v5 = vsel %vm239_vm6, %v1260_v6, 0.0 }
 0xa74   :  { %1263 = vadd.xlane.f32.xlu0 %v1262_v5 }
 0xb00   :  { %v1267_v19 = vpop.xlane.xlu1 %1266 }
 0xb01   :  { %v1269_v20 = vmul.f32 0.03125, %v1267_v19  ;;  %v1264_v21 = vpop.xlane.xlu0 %1263 }
 0xb02   :  { %v1268_v23 = vmul.f32 0.03125, %v1264_v21 }
 0xb03   :  { %v1271_v24 = vadd.f32 1e-12, %v1269_v20 }
 0xb04   :  { %v1270_v25 = vadd.f32 1e-12, %v1268_v23 }
 0xb05   :  { %5035 = vrsqrt.f32 %v1271_v24 }
 0xb06   :  { %5037 = vrsqrt.f32 %v1270_v25 }
 0xb0f   :  { %v5036_v26 = vpop.eup %5035 }
 0xb10   :  { %v5038_v30 = vpop.eup %5037  ;;  %v1275_v31 = vmul.f32 %v5036_v26, %v1259_v1 }
 0xb11   :  { %v1274_v32 = vmul.f32 %v5038_v30, %v1258_v2 }
 0xb12   :  { %v1281_v34 = vmul.f32 %v4426_v28, %v1275_v31 }
 0xb13   :  { %v1280_v35 = vmul.f32 %v4426_v28, %v1274_v32 }
 0xb14   :  { %v5413_v37 = vadd.f32 %v4427_v33, %v1281_v34 }
 0xb15   :  { %v5411_v36 = vadd.f32 %v4427_v33, %v1280_v35 }
 0xb17   :  { %4703 = vmatprep.mubr.msk.f32.mxu1 %vm239_vm6, %v5411_v36 }
 0xb18   :  { %4704 = vmatmul.mubr.msk.f32.vlgmr.msra.gmra.mrb[14].mxu1 %vm239_vm6, %v5413_v37 }
 0xbeb   :  { %v4705_v49 = vpop.f32.mrb[14].mxu1 }
 0xbec   :  { %v1375_v50 = vadd.f32 %v4705_v49, %v4428_v48  ;;  %v1369_v51 = vpop.f32.mrb[15].mxu1 }
 0xbed   :  { %v1370_v52 = vadd.f32 %v4428_v48, %v1369_v51  ;;  %v4431_v51 = vld [vmem:[%s6166_s3 + $0x7] ss:$0 sm:$0xff] }
 0xbee   :  { %v1381_v53 = vmul.f32 0.70710677, %v1375_v50  ;;  %v1379_v47 = vmul.f32 0.5, %v1375_v50 }
 0xbef   :  { %v1380_v54 = vmul.f32 0.70710677, %v1370_v52  ;;  %v1378_v45 = vmul.f32 0.5, %v1370_v52 }
 0xbf0   :  { %v1387_v55 = vand.u32 2147483647, %v1381_v53  ;;  %vm1383_vm9 = vcmp.ge.f32.partialorder %v1381_v53, 0.0 }
 0xbf1   :  { %v1386_v56 = vand.u32 2147483647, %v1380_v54  ;;  %vm1382_vm10 = vcmp.ge.f32.partialorder %v1380_v54, 0.0  ;;  %v1385_v41 = vsel %vm1383_vm9, 1.0, %v5190_v40 }
 0xbf2   :  { %v1389_v57 = vmul.f32 0.3275911, %v1387_v55  ;;  %v1415_v61 = vsub.f32 0.0, %v1387_v55  ;;  %v1384_v43 = vsel %vm1382_vm10, 1.0, %v5190_v40 }
 0xbf3   :  { %v1388_v58 = vmul.f32 0.3275911, %v1386_v56  ;;  %v1414_v62 = vsub.f32 0.0, %v1386_v56 }
 0xbf4   :  { %v1391_v59 = vadd.f32 1.0, %v1389_v57  ;;  %v1417_v1 = vmul.f32 %v1415_v61, %v1387_v55 }
 0xbf5   :  { %v1390_v60 = vadd.f32 1.0, %v1388_v58  ;;  %v1416_v6 = vmul.f32 %v1414_v62, %v1386_v56 }
 0xbf6   :  { %5039 = vrcp.f32 %v1391_v59  ;;  %v1420_v4 = vmul.f32 1.442695, %v1417_v1 }
 0xbf7   :  { %5041 = vrcp.f32 %v1390_v60  ;;  %v1418_v12 = vmul.f32 1.442695, %v1416_v6 }
 0xbf8   :  { %5043 = vpow2.f32 %v1420_v4 }
 0xbf9   :  { %5045 = vpow2.f32 %v1418_v12 }
 0xc00   :  { %v5040_v63 = vpop.eup %5039 }
 0xc01   :  { %v5042_v2 = vpop.eup %5041  ;;  %v1397_v3 = vmul.f32 1.0614054, %v5040_v63 }
 0xc02   :  { %v1396_v7 = vmul.f32 1.0614054, %v5042_v2  ;;  %v5044_v32 = vpop.eup %5043 }
 0xc03   :  { %v1399_v5 = vadd.f32 -1.4531521, %v1397_v3  ;;  %v5046_v34 = vpop.eup %5045 }
 0xc04   :  { %v1398_v9 = vadd.f32 -1.4531521, %v1396_v7  ;;  %v1570_v7 = vld [vmem:[#allocation2 + $0x108] sm:$0xff] }
 0xc05   :  { %v1401_v11 = vmul.f32 %v5040_v63, %v1399_v5  ;;  %v1571_v5 = vld [vmem:[#allocation2 + $0x110] sm:$0xff] }
 0xc06   :  { %v1400_v13 = vmul.f32 %v5042_v2, %v1398_v9  ;;  %v1572_v9 = vld [vmem:[#allocation2 + $0x118] sm:$0xff] }
 0xc07   :  { %v1403_v18 = vadd.f32 1.4214138, %v1401_v11  ;;  %v4912_v11 = vpack.c.bf16 %v1572_v9, %v1571_v5 }
 0xc08   :  { %v1402_v19 = vadd.f32 1.4214138, %v1400_v13 }
 0xc09   :  { %v1405_v20 = vmul.f32 %v5040_v63, %v1403_v18 }
 0xc0a   :  { %v1404_v21 = vmul.f32 %v5042_v2, %v1402_v19 }
 0xc0b   :  { %v1407_v23 = vadd.f32 -0.28449672, %v1405_v20 }
 0xc0c   :  { %v1406_v24 = vadd.f32 -0.28449672, %v1404_v21 }
 0xc0d   :  { %v1409_v25 = vmul.f32 %v5040_v63, %v1407_v23 }
 0xc0e   :  { %v1408_v26 = vmul.f32 %v5042_v2, %v1406_v24  ;;  %v4434_v24 = vld [vmem:[%s6166_s3 + $0x8] ss:$0 sm:$0xff] }
 0xc0f   :  { %v1411_v28 = vadd.f32 0.2548296, %v1409_v25 }
 0xc10   :  { %v1410_v30 = vadd.f32 0.2548296, %v1408_v26 }
 0xc11   :  { %v1413_v31 = vmul.f32 %v5040_v63, %v1411_v28 }
 0xc12   :  { %v1412_v33 = vmul.f32 %v5042_v2, %v1410_v30  ;;  %v4435_v30 = vld [vmem:[%s6166_s3 + $0x9] ss:$0 sm:$0xff] }
 0xc13   :  { %v1423_v35 = vmul.f32 %v5044_v32, %v1413_v31 }
 0xc14   :  { %v1422_v38 = vmul.f32 %v5046_v34, %v1412_v33 }
 0xc15   :  { %v1425_v39 = vsub.f32 1.0, %v1423_v35  ;;  %v4436_v35 = vld [vmem:[%s6166_s3 + $0xa] ss:$0 sm:$0xff] }
 0xc16   :  { %v1424_v42 = vsub.f32 1.0, %v1422_v38 }
 0xc17   :  { %v1427_v8 = vmul.f32 %v1425_v39, %v1385_v41 }
 0xc18   :  { %v1426_v44 = vmul.f32 %v1424_v42, %v1384_v43 }
 0xc19   :  { %v1429_v10 = vadd.f32 1.0, %v1427_v8 }
 0xc1a   :  { %v1428_v46 = vadd.f32 1.0, %v1426_v44 }
 0xc1b   :  { %v1431_v49 = vmul.f32 %v1429_v10, %v1379_v47 }
 0xc1c   :  { %v1430_v48 = vmul.f32 %v1428_v46, %v1378_v45 }
 0xc1e   :  { %4722 = vmatprep.mubr.msk.f32.mxu0 %vm1445_vm11, %v1430_v48 }
 0xc1f   :  { %4723 = vmatmul.mubr.msk.f32.vlgmr.msra.gmra.mrb[10].mxu0 %vm1445_vm11, %v1431_v49 }
 0xc20   :  { %4748 = vmatprep.mubr.msk.f32.mxu0 %vm5183_vm7, %v5182_v15 }
 0xcf2   :  { %v4724_v53 = vpop.f32.mrb[10].mxu0 }
 0xcf3   :  { %v1524_v54 = vadd.f32 %v4724_v53, %v4431_v51  ;;  %v1518_v55 = vpop.f32.mrb[11].mxu0 }
 0xcf4   :  { %v1519_v52 = vadd.f32 %v4431_v51, %v1518_v55 }
 0xcf5   :  { %v1528_v50 = vadd.f32 %v1524_v54, %v5413_v37 }
 0xcf6   :  { %v1527_v56 = vadd.f32 %v1519_v52, %v5411_v36  ;;  %v1569_v36 = vld [vmem:[#allocation2 + $0x100] sm:$0xff] }
 0xcf7   :  { %v1534_v57 = vsel %vm239_vm6, %v1528_v50, 0.0  ;;  %v4908_v4 = vpack.c.bf16 %v1570_v7, %v1569_v36 }
 0xcf8   :  { %1535 = vadd.xlane.f32.xlu1 %v1534_v57  ;;  %v1531_v58 = vsel %vm239_vm6, %v1527_v56, 0.0 }
 0xcf9   :  { %1532 = vadd.xlane.f32.xlu0 %v1531_v58  ;;  %4909 = vmatprep.subr.bf16.mxu1 %v4908_v4 }
 0xcfa   :  { %4911 = vmatpush3.bf16.msra.mxu1 %v4908_v4 }
 0xcfb   :  { %4913 = vmatprep.subr.bf16.mxu1 %v4912_v11 }
 0xcfe   :  { %4915 = vmatpush3.bf16.msra.mxu1 %v4912_v11 }
 0xcff   :  { %4736 = vmatprep.subr.mxu1 %v5182_v15 }
 0xd85   :  { %v1536_v59 = vpop.xlane.xlu1 %1535 }
 0xd86   :  { %v1538_v60 = vmul.f32 0.03125, %v1536_v59  ;;  %v1533_v61 = vpop.xlane.xlu0 %1532 }
 0xd87   :  { %v1537_v62 = vmul.f32 0.03125, %v1533_v61 }
 0xd88   :  { %v1540_v63 = vsub.f32 %v1528_v50, %v1538_v60 }
 0xd89   :  { %v1539_v1 = vsub.f32 %v1527_v56, %v1537_v62 }
 0xd8a   :  { %v1542_v2 = vmul.f32 %v1540_v63, %v1540_v63 }
 0xd8b   :  { %v1541_v3 = vmul.f32 %v1539_v1, %v1539_v1 }
 0xd8c   :  { %v1546_v6 = vsel %vm239_vm6, %v1542_v2, 0.0 }
 0xd8d   :  { %1547 = vadd.xlane.f32.xlu1 %v1546_v6  ;;  %v1543_v37 = vsel %vm239_vm6, %v1541_v3, 0.0 }
 0xd8e   :  { %1544 = vadd.xlane.f32.xlu0 %v1543_v37 }
 0xe1a   :  { %v1548_v12 = vpop.xlane.xlu1 %1547 }
 0xe1b   :  { %v1550_v13 = vmul.f32 0.03125, %v1548_v12  ;;  %v1545_v18 = vpop.xlane.xlu0 %1544 }
 0xe1c   :  { %v1549_v19 = vmul.f32 0.03125, %v1545_v18 }
 0xe1d   :  { %v1552_v20 = vadd.f32 1e-12, %v1550_v13 }
 0xe1e   :  { %v1551_v21 = vadd.f32 1e-12, %v1549_v19 }
 0xe1f   :  { %5047 = vrsqrt.f32 %v1552_v20 }
 0xe20   :  { %5049 = vrsqrt.f32 %v1551_v21 }
 0xe29   :  { %v5048_v23 = vpop.eup %5047 }
 0xe2a   :  { %v5050_v25 = vpop.eup %5049  ;;  %v1556_v26 = vmul.f32 %v5048_v23, %v1540_v63 }
 0xe2b   :  { %v1555_v28 = vmul.f32 %v5050_v25, %v1539_v1 }
 0xe2c   :  { %v1562_v31 = vmul.f32 %v4434_v24, %v1556_v26 }
 0xe2d   :  { %v1561_v32 = vmul.f32 %v4434_v24, %v1555_v28 }
 0xe2e   :  { %v5447_v34 = vadd.f32 %v4435_v30, %v1562_v31 }
 0xe2f   :  { %v5445_v33 = vadd.f32 %v4435_v30, %v1561_v32 }
 0xe31   :  { %4733 = vmatprep.mubr.msk.f32.mxu1 %vm239_vm6, %v5445_v33 }
 0xe32   :  { %4734 = vmatmul.mubr.msk.f32.vlgmr.msra.gmra.mrb[16].mxu1 %vm239_vm6, %v5447_v34 }
 0xe33   :  { %4738 = vmatprep.mubr.msk.f32.mxu1 %vm5183_vm7, %v5182_v15 }
 0xf05   :  { %v4735_v38 = vpop.f32.mrb[16].mxu1 }
 0xf06   :  { %v5458_v39 = vadd.f32 %v4735_v38, %v4436_v35  ;;  %v1650_v41 = vpop.f32.mrb[17].mxu1 }
 0xf07   :  { %v5460_v42 = vadd.f32 %v4436_v35, %v1650_v41 }
 0xf08   :  { %1737 = vrot.lane.b32.xlu1 %v5458_v39, %s5184_s15 }
 0xf09   :  { %1660 = vrot.lane.b32.xlu0 %v5460_v42, %s5184_s15 }
 0xf7a   :  { %v1738_v43 = vpop.permute.xlu1 %1737 }
 0xf7b   :  { %v1661_v8 = vpop.permute.xlu0 %1660 }
 0xf7c   :  { %4737 = vmatpush3.xpose.msk.msra.mxu1 %vm399_vm8, %v1661_v8 }
 0xf7d   :  { %4741 = vmatprep.subr.mxu1 %v5182_v15 }
 0xf7f   :  { %4739 = vmatmul.mubr.msk.f32.vlgmr.msra.gmra.mrb[18].mxu1 %vm399_vm8, %v5460_v42 }
 0xf80   :  { %4742 = vmatpush3.xpose.msk.msra.mxu1 %vm399_vm8, %v1738_v43  ;;  %4743 = vmatprep.mubr.msk.f32.mxu1 %vm5183_vm7, %v5182_v15 }
 0xf81   :  { %4751 = vmatprep.subr.mxu1 %v5182_v15 }
 0xf83   :  { %4744 = vmatmul.mubr.msk.f32.vlgmr.msra.gmra.mrb[20].mxu1 %vm399_vm8, %v5458_v39 }
 0xf84   :  { %4753 = vmatprep.mubr.msk.f32.mxu1 %vm5183_vm7, %v5182_v15 }
0x1052   :  { %v1732_v44 = vpop.f32.mrb[18].mxu1 }
0x1053   :  { %v1813_v10 = vmul.f32 0.25, %v1732_v44  ;;  %v4740_v45 = vpop.f32.mrb[19].mxu1 }
0x1055   :  { %v1815_v46 = vadd.f32 %v1813_v10, %v5336_v29 }
0x1056   :  { %v1809_v47 = vpop.f32.mrb[20].mxu1 }
0x1057   :  { %v1814_v48 = vmul.f32 0.25, %v1809_v47  ;;  %v4745_v49 = vpop.f32.mrb[21].mxu1  ;;  %v1817_v51 = vsel %vm70_vm3, %v1815_v46, -inf }
0x1058   :  { %1818 = vmax.xlane.f32.xlu1 %v1817_v51 }
0x1059   :  { %v1816_v53 = vadd.f32 %v1814_v48, %v5340_v16 }
0x105b   :  { %v1820_v54 = vsel %vm70_vm3, %v1816_v53, -inf }
0x105c   :  { %1821 = vmax.xlane.f32.xlu0 %v1820_v54 }
0x1069   :  { %1915 = vrot.lane.b32.xlu1 %v5458_v39, %s5186_s18 }
0x106d   :  { %1995 = vrot.lane.b32.xlu1 %v5460_v42, %s5187_s19 }
0x1072   :  { %1839 = vrot.lane.b32.xlu0 %v5460_v42, %s5186_s18  ;;  %s5210_s18 = smov 124  }
0x10e5   :  { %v1819_v55 = vpop.xlane.xlu1 %1818 }
0x10e6   :  { %v1823_v52 = vsub.f32 %v1815_v46, %v1819_v55 }
0x10e8   :  { %v1825_v50 = vmul.f32 1.442695, %v1823_v52  ;;  %v2328_v52 = vld [vmem:[#allocation2 + $0x138] sm:$0xff] }
0x10e9   :  { %v1916_v56 = vpop.permute.xlu1 %1915  ;;  %v1822_v57 = vpop.xlane.xlu0 %1821 }
0x10ea   :  { %5051 = vpow2.f32 %v1825_v50  ;;  %v1824_v58 = vsub.f32 %v1816_v53, %v1822_v57  ;;  %4752 = vmatpush3.msra.mxu1 %v1916_v56  ;;  %v1992_v56 = vld [vmem:[#allocation2 + $0x128] sm:$0xff] }
0x10eb   :  { %4761 = vmatprep.subr.mxu1 %v5182_v15 }
0x10ec   :  { %v1827_v59 = vmul.f32 1.442695, %v1824_v58 }
0x10ed   :  { %v1840_v60 = vpop.permute.xlu0 %1839  ;;  %v1996_v2 = vpop.permute.xlu1 %1995 }
0x10ee   :  { %5053 = vpow2.f32 %v1827_v59  ;;  %4747 = vmatpush3.msra.mxu0 %v1840_v60 }
0x10ef   :  { %4756 = vmatprep.subr.mxu0 %v5182_v15 }
0x10f4   :  { %v5052_v61 = vpop.eup %5051 }
0x10f5   :  { %v1829_v62 = vsel %vm70_vm3, %v5052_v61, 0.0 }
0x10f6   :  { %1830 = vadd.xlane.f32.xlu0 %v1829_v62  ;;  %v4455_v62 = vld [vmem:[%s6166_s3 + $0xb] ss:$0 sm:$0xff] }
0x10f8   :  { %v5054_v63 = vpop.eup %5053 }
0x10f9   :  { %v1832_v1 = vsel %vm70_vm3, %v5054_v63, 0.0 }
0x10fa   :  { %1833 = vadd.xlane.f32.xlu1 %v1832_v1 }
0x110b   :  { %1993 = vrot.lane.b32.xlu1 %v5460_v42, %s5188_s20 }
0x110c   :  { %2073 = vrot.lane.b32.xlu0 %v5458_v39, %s5187_s19  ;;  %s5211_s19 = smov [#allocation5]  }
0x1110   :  { %2071 = vrot.lane.b32.xlu0 %v5458_v39, %s5188_s20  ;;  %s4385_s20 = sshll.u32 %s5211_s19, 4  ;;  %s4386_s20 = int_to_ptr.vmem [resolvable:$true] %s4385_s20 }
0x1111   :  { %p5156_p9 = scmp.lt.s32.totalorder %s4386_s20, %s4386_s20 }
0x1183   :  { %v1831_v3 = vpop.xlane.xlu0 %1830 }
0x1184   :  { %5055 = vrcp.f32 %v1831_v3 }
0x1187   :  { %v1834_v6 = vpop.xlane.xlu1 %1833  ;;  %v2074_v5 = vpop.permute.xlu0 %2073 }
0x1188   :  { %5057 = vrcp.f32 %v1834_v6 }
0x118b   :  { %v1994_v9 = vpop.permute.xlu1 %1993  ;;  %v2072_v11 = vpop.permute.xlu0 %2071 }
0x118e   :  { %v5056_v37 = vpop.eup %5055 }
0x118f   :  { %v1837_v36 = vmul.f32 %v5056_v37, %v5052_v61 }
0x1191   :  { %4749 = vmatmul.mubr.msk.f32.vlgmr.msra.gmra.mrb[12].mxu0 %vm70_vm3, %v1837_v36 }
0x1192   :  { %v5058_v7 = vpop.eup %5057  ;;  %4757 = vmatpush3.xpose.msk.msra.mxu0 %vm399_vm8, %v1996_v2  ;;  %4758 = vmatprep.mubr.msk.f32.mxu0 %vm5183_vm7, %v5182_v15 }
0x1193   :  { %v1838_v4 = vmul.f32 %v5058_v7, %v5054_v63  ;;  %4766 = vmatprep.subr.mxu0 %v5182_v15 }
0x1195   :  { %4754 = vmatmul.mubr.msk.f32.vlgmr.msra.gmra.mrb[22].mxu1 %vm70_vm3, %v1838_v4  ;;  %4759 = vmatmul.mubr.msk.f32.vlgmr.msra.gmra.mrb[14].mxu0 %vm399_vm8, %v1994_v9 }
0x1196   :  { %4762 = vmatpush3.xpose.msk.msra.mxu1 %vm399_vm8, %v2074_v5  ;;  %4763 = vmatprep.mubr.msk.f32.mxu1 %vm5183_vm7, %v5182_v15 }
0x1197   :  { %4771 = vmatprep.subr.mxu1 %v5182_v15  ;;  %4768 = vmatprep.mubr.msk.f32.mxu0 %vm5183_vm7, %v5182_v15 }
0x1199   :  { %4764 = vmatmul.mubr.msk.f32.vlgmr.msra.gmra.mrb[24].mxu1 %vm399_vm8, %v2072_v11 }
0x119a   :  { %4773 = vmatprep.mubr.msk.f32.mxu1 %vm5183_vm7, %v5182_v15 }
0x1264   :  { %v1911_v12 = vpop.f32.mrb[12].mxu0 }
0x1265   :  { %v4750_v13 = vpop.f32.mrb[13].mxu0 }
0x1268   :  { %v1987_v18 = vpop.f32.mrb[22].mxu1  ;;  %v2067_v19 = vpop.f32.mrb[14].mxu0 }
0x1269   :  { %v2149_v20 = vmul.f32 0.25, %v2067_v19  ;;  %v4755_v21 = vpop.f32.mrb[23].mxu1  ;;  %v4760_v23 = vpop.f32.mrb[15].mxu0 }
0x126a   :  { %v2541_v21 = vld [vmem:[#allocation2 + $0x148] sm:$0xff] }
0x126b   :  { %v2151_v24 = vadd.f32 %v2149_v20, %v5336_v29 }
0x126c   :  { %v2145_v25 = vpop.f32.mrb[24].mxu1 }
0x126d   :  { %v2150_v26 = vmul.f32 0.25, %v2145_v25  ;;  %v4765_v28 = vpop.f32.mrb[25].mxu1  ;;  %v2153_v30 = vsel %vm70_vm3, %v2151_v24, -inf  ;;  %v2543_v25 = vld [vmem:[#allocation2 + $0x158] sm:$0xff] }
0x126e   :  { %2154 = vmax.xlane.f32.xlu1 %v2153_v30 }
0x126f   :  { %v2152_v31 = vadd.f32 %v2150_v26, %v5340_v16 }
0x1271   :  { %v2156_v32 = vsel %vm70_vm3, %v2152_v31, -inf }
0x1272   :  { %2157 = vmax.xlane.f32.xlu0 %v2156_v32 }
0x12fb   :  { %v2155_v35 = vpop.xlane.xlu1 %2154 }
0x12fc   :  { %v2159_v38 = vsub.f32 %v2151_v24, %v2155_v35  ;;  %v2542_v24 = vld [vmem:[#allocation2 + $0x150] sm:$0xff] }
0x12fd   :  { %v4928_v26 = vpack.c.bf16 %v2543_v25, %v2542_v24 }
0x12fe   :  { %v2161_v41 = vmul.f32 1.442695, %v2159_v38 }
0x12ff   :  { %v2158_v8 = vpop.xlane.xlu0 %2157 }
0x1300   :  { %5059 = vpow2.f32 %v2161_v41  ;;  %v2160_v43 = vsub.f32 %v2152_v31, %v2158_v8  ;;  %v4456_v8 = vld [vmem:[%s6166_s3 + $0xc] ss:$0 sm:$0xff] }
0x1302   :  { %v2163_v44 = vmul.f32 1.442695, %v2160_v43 }
0x1304   :  { %5061 = vpow2.f32 %v2163_v44 }
0x130a   :  { %v5060_v29 = vpop.eup %5059 }
0x130b   :  { %v2165_v10 = vsel %vm70_vm3, %v5060_v29, 0.0 }
0x130c   :  { %2166 = vadd.xlane.f32.xlu0 %v2165_v10  ;;  %v4457_v10 = vld [vmem:[%s6166_s3 + $0xd] ss:$0 sm:$0xff] }
0x130e   :  { %v5062_v45 = vpop.eup %5061 }
0x130f   :  { %v2168_v46 = vsel %vm70_vm3, %v5062_v45, 0.0 }
0x1310   :  { %2169 = vadd.xlane.f32.xlu1 %v2168_v46 }
0x1321   :  { %2251 = vrot.lane.b32.xlu1 %v5458_v39, %s5189_s21  ;;  %v2327_v39 = vld [vmem:[#allocation2 + $0x130] sm:$0xff] }
0x1322   :  { %2175 = vrot.lane.b32.xlu0 %v5460_v42, %s5189_s21  ;;  %v4916_v50 = vpack.c.bf16 %v2328_v52, %v2327_v39  ;;  %v1991_v42 = vld [vmem:[#allocation2 + $0x120] sm:$0xff]  ;;  %v2689_v52 = vld [vmem:[#allocation2 + $0x188] sm:$0xff]  ;;  %s5151_s21 = scalar_lea.vmem %s4386_s20, 32 }
0x1323   :  { %v4920_v57 = vpack.c.bf16 %v1992_v56, %v1991_v42  ;;  %v2688_v39 = vld [vmem:[#allocation2 + $0x180] sm:$0xff]  ;;  %v2690_v42 = vld [vmem:[#allocation2 + $0x190] sm:$0xff]  ;;  %v2691_v56 = vld [vmem:[#allocation2 + $0x198] sm:$0xff]  ;;  %p5152_p8 = scmp.ne.s32.totalorder %s4386_s20, %s5151_s21  ;;  %p5157_p10 = scmp.lt.s32.totalorder %s5151_s21, %s5151_s21 }
0x1325   :  { %p5158_p11 = por %p5157_p10, %p5156_p9 }
0x1327   :  { %p5159_p12 = pnand %p5158_p11, %p5152_p8 }
0x1399   :  { %v2167_v16 = vpop.xlane.xlu0 %2166 }
0x139a   :  { %5063 = vrcp.f32 %v2167_v16 }
0x139d   :  { %v2170_v47 = vpop.xlane.xlu1 %2169  ;;  %v2176_v48 = vpop.permute.xlu0 %2175 }
0x139e   :  { %5065 = vrcp.f32 %v2170_v47  ;;  %4767 = vmatpush3.msra.mxu0 %v2176_v48  ;;  %v2684_v48 = vld [vmem:[#allocation2 + $0x160] sm:$0xff] }
0x139f   :  { %4917 = vmatprep.subr.bf16.mxu0 %v4916_v50 }
0x13a1   :  { %v2252_v49 = vpop.permute.xlu1 %2251 }
0x13a2   :  { %4772 = vmatpush3.msra.mxu1 %v2252_v49  ;;  %v2685_v49 = vld [vmem:[#allocation2 + $0x168] sm:$0xff] }
0x13a4   :  { %v5064_v51 = vpop.eup %5063 }
0x13a5   :  { %v2173_v53 = vmul.f32 %v5064_v51, %v5060_v29  ;;  %v4932_v51 = vpack.c.bf16 %v2685_v49, %v2684_v48 }
0x13a7   :  { %4769 = vmatmul.mubr.msk.f32.vlgmr.msra.gmra.mrb[16].mxu0 %vm70_vm3, %v2173_v53  ;;  %v2686_v53 = vld [vmem:[#allocation2 + $0x170] sm:$0xff] }
0x13a8   :  { %v5066_v54 = vpop.eup %5065  ;;  %4919 = vmatpush3.bf16.msra.mxu0 %v4916_v50  ;;  %v4940_v50 = vpack.c.bf16 %v2689_v52, %v2688_v39 }
0x13a9   :  { %v2174_v55 = vmul.f32 %v5066_v54, %v5062_v45  ;;  %4921 = vmatprep.subr.bf16.mxu0 %v4920_v57  ;;  %v2687_v54 = vld [vmem:[#allocation2 + $0x178] sm:$0xff] }
0x13ab   :  { %4774 = vmatmul.mubr.msk.f32.vlgmr.msra.gmra.mrb[26].mxu1 %vm70_vm3, %v2174_v55  ;;  %v4936_v55 = vpack.c.bf16 %v2687_v54, %v2686_v53 }
0x147a   :  { %v2247_v58 = vpop.f32.mrb[16].mxu0 }
0x147b   :  { %v4770_v59 = vpop.f32.mrb[17].mxu0  ;;  %4780 = vmatprep.mubr.msk.f32.mxu0 %vm399_vm8, %v2247_v58  ;;  %v4458_v58 = vld [vmem:[%s6166_s3 + $0xe] ss:$0 sm:$0xff] }
0x147e   :  { %v2323_v60 = vpop.f32.mrb[26].mxu1 }
0x147f   :  { %v4775_v61 = vpop.f32.mrb[27].mxu1  ;;  %4781 = vmatmul.mubr.msk.f32.vlgmr.msra.gmra.mrb[18].mxu0 %vm399_vm8, %v2323_v60 }
0x1480   :  { %4923 = vmatpush3.bf16.msra.mxu0 %v4920_v57  ;;  %4787 = vmatprep.mubr.msk.f32.mxu0 %vm399_vm8, %v1911_v12  ;;  %v4944_v57 = vpack.c.bf16 %v2691_v56, %v2690_v42 }
0x1481   :  { %4933 = vmatprep.subr.bf16.mxu0 %v4932_v51 }
0x1487   :  { %4788 = vmatmul.mubr.msk.f32.vlgmr.msra.gmra.mrb[18].mxu0 %vm399_vm8, %v1987_v18 }
0x1488   :  { %4935 = vmatpush3.bf16.msra.mxu0 %v4932_v51 }
0x1489   :  { %4937 = vmatprep.subr.bf16.mxu0 %v4936_v55 }
0x148c   :  { %4939 = vmatpush3.bf16.msra.mxu0 %v4936_v55 }
0x148d   :  { %4941 = vmatprep.subr.bf16.mxu0 %v4940_v50 }
0x1490   :  { %4943 = vmatpush3.bf16.msra.mxu0 %v4940_v50 }
0x1491   :  { %4945 = vmatprep.subr.bf16.mxu0 %v4944_v57 }
0x1494   :  { %4947 = vmatpush3.bf16.msra.mxu0 %v4944_v57 }
0x1495   :  { %4841 = vmatprep.subr.mxu0 %v5182_v15 }
0x155a   :  { %v4789_v63 = vpop.f32.mrb[18].mxu0 }
0x155b   :  { %v2497_v1 = vadd.f32 %v4789_v63, %v4455_v62  ;;  %v2482_v2 = vpop.f32.mrb[19].mxu0 }
0x155c   :  { %v2496_v3 = vadd.f32 %v4455_v62, %v2482_v2 }
0x155d   :  { %v2499_v6 = vadd.f32 %v2497_v1, %v5447_v34 }
0x155e   :  { %v2498_v37 = vadd.f32 %v2496_v3, %v5445_v33  ;;  %v2540_v33 = vld [vmem:[#allocation2 + $0x140] sm:$0xff] }
0x155f   :  { %v2505_v36 = vsel %vm239_vm6, %v2499_v6, 0.0  ;;  %v4924_v23 = vpack.c.bf16 %v2541_v21, %v2540_v33 }
0x1560   :  { %2506 = vadd.xlane.f32.xlu0 %v2505_v36  ;;  %v2502_v7 = vsel %vm239_vm6, %v2498_v37, 0.0 }
0x1561   :  { %2503 = vadd.xlane.f32.xlu1 %v2502_v7  ;;  %4925 = vmatprep.subr.bf16.mxu1 %v4924_v23 }
0x1562   :  { %4927 = vmatpush3.bf16.msra.mxu1 %v4924_v23 }
0x1563   :  { %4929 = vmatprep.subr.bf16.mxu1 %v4928_v26 }
0x1566   :  { %4931 = vmatpush3.bf16.msra.mxu1 %v4928_v26 }
0x15ed   :  { %v2507_v5 = vpop.xlane.xlu0 %2506 }
0x15ee   :  { %v2509_v4 = vmul.f32 0.03125, %v2507_v5  ;;  %v2504_v9 = vpop.xlane.xlu1 %2503 }
0x15ef   :  { %v2508_v11 = vmul.f32 0.03125, %v2504_v9 }
0x15f0   :  { %v2511_v12 = vsub.f32 %v2499_v6, %v2509_v4 }
0x15f1   :  { %v2510_v13 = vsub.f32 %v2498_v37, %v2508_v11 }
0x15f2   :  { %v2513_v18 = vmul.f32 %v2511_v12, %v2511_v12 }
0x15f3   :  { %v2512_v19 = vmul.f32 %v2510_v13, %v2510_v13 }
0x15f4   :  { %v2517_v20 = vsel %vm239_vm6, %v2513_v18, 0.0 }
0x15f5   :  { %2518 = vadd.xlane.f32.xlu1 %v2517_v20  ;;  %v2514_v34 = vsel %vm239_vm6, %v2512_v19, 0.0 }
0x15f6   :  { %2515 = vadd.xlane.f32.xlu0 %v2514_v34 }
0x1682   :  { %v2519_v28 = vpop.xlane.xlu1 %2518 }
0x1683   :  { %v2521_v30 = vmul.f32 0.03125, %v2519_v28  ;;  %v2516_v31 = vpop.xlane.xlu0 %2515 }
0x1684   :  { %v2520_v32 = vmul.f32 0.03125, %v2516_v31 }
0x1685   :  { %v2523_v35 = vadd.f32 1e-12, %v2521_v30 }
0x1686   :  { %v2522_v38 = vadd.f32 1e-12, %v2520_v32 }
0x1687   :  { %5067 = vrsqrt.f32 %v2523_v35 }
0x1688   :  { %5069 = vrsqrt.f32 %v2522_v38 }
0x1691   :  { %v5068_v41 = vpop.eup %5067 }
0x1692   :  { %v5070_v43 = vpop.eup %5069  ;;  %v2527_v44 = vmul.f32 %v5068_v41, %v2511_v12 }
0x1693   :  { %v2526_v29 = vmul.f32 %v5070_v43, %v2510_v13 }
0x1694   :  { %v2533_v45 = vmul.f32 %v4456_v8, %v2527_v44 }
0x1695   :  { %v2532_v46 = vmul.f32 %v4456_v8, %v2526_v29 }
0x1696   :  { %v5547_v47 = vadd.f32 %v4457_v10, %v2533_v45 }
0x1697   :  { %v5545_v16 = vadd.f32 %v4457_v10, %v2532_v46 }
0x1699   :  { %4798 = vmatprep.mubr.msk.f32.mxu1 %vm239_vm6, %v5545_v16 }
0x169a   :  { %4799 = vmatmul.mubr.msk.f32.vlgmr.msra.gmra.mrb[28].mxu1 %vm239_vm6, %v5547_v47 }
0x176d   :  { %v4800_v59 = vpop.f32.mrb[28].mxu1 }
0x176e   :  { %v2627_v60 = vadd.f32 %v4800_v59, %v4458_v58  ;;  %v2621_v61 = vpop.f32.mrb[29].mxu1 }
0x176f   :  { %v2622_v62 = vadd.f32 %v4458_v58, %v2621_v61  ;;  %v4461_v58 = vld [vmem:[%s6166_s3 + $0xf] ss:$0 sm:$0xff] }
0x1770   :  { %v2633_v63 = vmul.f32 0.70710677, %v2627_v60  ;;  %v2631_v42 = vmul.f32 0.5, %v2627_v60 }
0x1771   :  { %v2632_v1 = vmul.f32 0.70710677, %v2622_v62  ;;  %v2630_v52 = vmul.f32 0.5, %v2622_v62 }
0x1772   :  { %v2639_v2 = vand.u32 2147483647, %v2633_v63  ;;  %vm2635_vm12 = vcmp.ge.f32.partialorder %v2633_v63, 0.0 }
0x1773   :  { %v2638_v3 = vand.u32 2147483647, %v2632_v1  ;;  %vm2634_vm13 = vcmp.ge.f32.partialorder %v2632_v1, 0.0  ;;  %v2637_v49 = vsel %vm2635_vm12, 1.0, %v5190_v40 }
0x1774   :  { %v2641_v6 = vmul.f32 0.3275911, %v2639_v2  ;;  %v2667_v5 = vsub.f32 0.0, %v2639_v2  ;;  %v2636_v54 = vsel %vm2634_vm13, 1.0, %v5190_v40 }
0x1775   :  { %v2640_v37 = vmul.f32 0.3275911, %v2638_v3  ;;  %v2666_v4 = vsub.f32 0.0, %v2638_v3 }
0x1776   :  { %v2643_v36 = vadd.f32 1.0, %v2641_v6  ;;  %v2669_v11 = vmul.f32 %v2667_v5, %v2639_v2 }
0x1777   :  { %v2642_v7 = vadd.f32 1.0, %v2640_v37  ;;  %v2668_v18 = vmul.f32 %v2666_v4, %v2638_v3 }
0x1778   :  { %5071 = vrcp.f32 %v2643_v36  ;;  %v2672_v34 = vmul.f32 1.442695, %v2669_v11 }
0x1779   :  { %5073 = vrcp.f32 %v2642_v7  ;;  %v2670_v23 = vmul.f32 1.442695, %v2668_v18  ;;  %v2822_v18 = vld [vmem:[#allocation2 + $0x1b0] sm:$0xff] }
0x177a   :  { %5075 = vpow2.f32 %v2672_v34 }
0x177b   :  { %5077 = vpow2.f32 %v2670_v23 }
0x1782   :  { %v5072_v9 = vpop.eup %5071 }
0x1783   :  { %v5074_v12 = vpop.eup %5073  ;;  %v2649_v13 = vmul.f32 1.0614054, %v5072_v9 }
0x1784   :  { %v2648_v19 = vmul.f32 1.0614054, %v5074_v12  ;;  %v5076_v44 = vpop.eup %5075 }
0x1785   :  { %v2651_v20 = vadd.f32 -1.4531521, %v2649_v13  ;;  %v5078_v10 = vpop.eup %5077 }
0x1786   :  { %v2650_v33 = vadd.f32 -1.4531521, %v2648_v19  ;;  %v2823_v19 = vld [vmem:[#allocation2 + $0x1b8] sm:$0xff] }
0x1787   :  { %v2653_v21 = vmul.f32 %v5072_v9, %v2651_v20  ;;  %v4952_v20 = vpack.c.bf16 %v2823_v19, %v2822_v18 }
0x1788   :  { %v2652_v24 = vmul.f32 %v5074_v12, %v2650_v33 }
0x1789   :  { %v2655_v25 = vadd.f32 1.4214138, %v2653_v21 }
0x178a   :  { %v2654_v26 = vadd.f32 1.4214138, %v2652_v24 }
0x178b   :  { %v2657_v28 = vmul.f32 %v5072_v9, %v2655_v25 }
0x178c   :  { %v2656_v30 = vmul.f32 %v5074_v12, %v2654_v26 }
0x178d   :  { %v2659_v31 = vadd.f32 -0.28449672, %v2657_v28  ;;  %v4464_v28 = vld [vmem:[%s6166_s3 + $0x10] ss:$0 sm:$0xff] }
0x178e   :  { %v2658_v32 = vadd.f32 -0.28449672, %v2656_v30 }
0x178f   :  { %v2661_v35 = vmul.f32 %v5072_v9, %v2659_v31 }
0x1790   :  { %v2660_v38 = vmul.f32 %v5074_v12, %v2658_v32 }
0x1791   :  { %v2663_v41 = vadd.f32 0.2548296, %v2661_v35  ;;  %v4465_v35 = vld [vmem:[%s6166_s3 + $0x11] ss:$0 sm:$0xff] }
0x1792   :  { %v2662_v8 = vadd.f32 0.2548296, %v2660_v38 }
0x1793   :  { %v2665_v43 = vmul.f32 %v5072_v9, %v2663_v41 }
0x1794   :  { %v2664_v29 = vmul.f32 %v5074_v12, %v2662_v8  ;;  %v2821_v12 = vld [vmem:[#allocation2 + $0x1a8] sm:$0xff] }
0x1795   :  { %v2675_v45 = vmul.f32 %v5076_v44, %v2665_v43  ;;  %v5191_v44 = vmov 3  }
0x1796   :  { %v2674_v46 = vmul.f32 %v5078_v10, %v2664_v29  ;;  %5003 = vset.pattern.permute.xlu1 %v5191_v44  ;;  %v4466_v29 = vld [vmem:[%s6166_s3 + $0x12] ss:$0 sm:$0xff] }
0x1797   :  { %v2677_v48 = vsub.f32 1.0, %v2675_v45 }
0x1798   :  { %v2676_v51 = vsub.f32 1.0, %v2674_v46 }
0x1799   :  { %v2679_v53 = vmul.f32 %v2677_v48, %v2637_v49  ;;  %v4471_v49 = vld [vmem:[%s6166_s3 + $0x13] ss:$0 sm:$0xff] }
0x179a   :  { %v2678_v55 = vmul.f32 %v2676_v51, %v2636_v54 }
0x179b   :  { %v2681_v39 = vadd.f32 1.0, %v2679_v53  ;;  %v5595_v53 = vsub.s32 1, %v5329_v22 }
0x179c   :  { %v2680_v50 = vadd.f32 1.0, %v2678_v55 }
0x179d   :  { %v2683_v57 = vmul.f32 %v2681_v39, %v2631_v42  ;;  %v5192_v42 = vmov 4  }
0x179e   :  { %v2682_v56 = vmul.f32 %v2680_v50, %v2630_v52  ;;  %v5607_v50 = vsel %vm3622_vm15, 1, %v5180_v0  ;;  %5004 = vset.pattern.permute.xlu0 %v5192_v42 }
0x17a0   :  { %4817 = vmatprep.mubr.msk.f32.mxu0 %vm1445_vm11, %v2682_v56  ;;  %v3573_v56 = vsub.s32 2, %v5329_v22 }
0x17a1   :  { %4818 = vmatmul.mubr.msk.f32.vlgmr.msra.gmra.mrb[20].mxu0 %vm1445_vm11, %v2683_v57  ;;  %v5614_v57 = vld [vmem:[%s6166_s3 + $0x15] sm:$0x7] }
0x17a2   :  { %4843 = vmatprep.mubr.msk.f32.mxu0 %vm5183_vm7, %v5182_v15 }
0x1874   :  { %v4819_v59 = vpop.f32.mrb[20].mxu0 }
0x1875   :  { %v2775_v40 = vadd.f32 %v4819_v59, %v4461_v58  ;;  %v2769_v61 = vpop.f32.mrb[21].mxu0 }
0x1876   :  { %v2770_v63 = vadd.f32 %v4461_v58, %v2769_v61 }
0x1877   :  { %v2779_v62 = vadd.f32 %v2775_v40, %v5547_v47 }
0x1878   :  { %v2778_v60 = vadd.f32 %v2770_v63, %v5545_v16  ;;  %v2820_v16 = vld [vmem:[#allocation2 + $0x1a0] sm:$0xff] }
0x1879   :  { %v2785_v1 = vsel %vm239_vm6, %v2779_v62, 0.0  ;;  %v4948_v13 = vpack.c.bf16 %v2821_v12, %v2820_v16 }
0x187a   :  { %2786 = vadd.xlane.f32.xlu1 %v2785_v1  ;;  %v2782_v2 = vsel %vm239_vm6, %v2778_v60, 0.0 }
0x187b   :  { %2783 = vadd.xlane.f32.xlu0 %v2782_v2  ;;  %4949 = vmatprep.subr.bf16.mxu1 %v4948_v13 }
0x187c   :  { %4951 = vmatpush3.bf16.msra.mxu1 %v4948_v13 }
0x187d   :  { %4953 = vmatprep.subr.bf16.mxu1 %v4952_v20 }
0x1880   :  { %4955 = vmatpush3.bf16.msra.mxu1 %v4952_v20 }
0x1881   :  { %4831 = vmatprep.subr.mxu1 %v5182_v15 }
0x1907   :  { %v2787_v3 = vpop.xlane.xlu1 %2786 }
0x1908   :  { %v2789_v6 = vmul.f32 0.03125, %v2787_v3  ;;  %v2784_v37 = vpop.xlane.xlu0 %2783 }
0x1909   :  { %v2788_v36 = vmul.f32 0.03125, %v2784_v37 }
0x190a   :  { %v2791_v7 = vsub.f32 %v2779_v62, %v2789_v6 }
0x190b   :  { %v2790_v5 = vsub.f32 %v2778_v60, %v2788_v36 }
0x190c   :  { %v2793_v4 = vmul.f32 %v2791_v7, %v2791_v7 }
0x190d   :  { %v2792_v9 = vmul.f32 %v2790_v5, %v2790_v5 }
0x190e   :  { %v2797_v11 = vsel %vm239_vm6, %v2793_v4, 0.0 }
0x190f   :  { %2798 = vadd.xlane.f32.xlu1 %v2797_v11  ;;  %v2794_v47 = vsel %vm239_vm6, %v2792_v9, 0.0 }
0x1910   :  { %2795 = vadd.xlane.f32.xlu0 %v2794_v47 }
0x199c   :  { %v2799_v34 = vpop.xlane.xlu1 %2798 }
0x199d   :  { %v2801_v33 = vmul.f32 0.03125, %v2799_v34  ;;  %v2796_v21 = vpop.xlane.xlu0 %2795 }
0x199e   :  { %v2800_v23 = vmul.f32 0.03125, %v2796_v21 }
0x199f   :  { %v2803_v24 = vadd.f32 1e-12, %v2801_v33 }
0x19a0   :  { %v2802_v25 = vadd.f32 1e-12, %v2800_v23 }
0x19a1   :  { %5079 = vrsqrt.f32 %v2803_v24 }
0x19a2   :  { %5081 = vrsqrt.f32 %v2802_v25 }
0x19ab   :  { %v5080_v26 = vpop.eup %5079 }
0x19ac   :  { %v5082_v30 = vpop.eup %5081  ;;  %v2807_v31 = vmul.f32 %v5080_v26, %v2791_v7 }
0x19ad   :  { %v2806_v32 = vmul.f32 %v5082_v30, %v2790_v5 }
0x19ae   :  { %v2813_v38 = vmul.f32 %v4464_v28, %v2807_v31 }
0x19af   :  { %v2812_v41 = vmul.f32 %v4464_v28, %v2806_v32 }
0x19b0   :  { %v2819_v43 = vadd.f32 %v4465_v35, %v2813_v38 }
0x19b1   :  { %v2818_v8 = vadd.f32 %v4465_v35, %v2812_v41 }
0x19b3   :  { %4828 = vmatprep.mubr.msk.f32.mxu1 %vm239_vm6, %v2818_v8 }
0x19b4   :  { %4829 = vmatmul.mubr.msk.f32.vlgmr.msra.gmra.mrb[30].mxu1 %vm239_vm6, %v2819_v43 }
0x19b5   :  { %4833 = vmatprep.mubr.msk.f32.mxu1 %vm5183_vm7, %v5182_v15 }
0x1a87   :  { %v4830_v10 = vpop.f32.mrb[30].mxu1 }
0x1a88   :  { %v2901_v45 = vpop.f32.mrb[31].mxu1  ;;  %v5588_v48 = vadd.f32 %v4830_v10, %v4466_v29 }
0x1a89   :  { %v5586_v46 = vadd.f32 %v4466_v29, %v2901_v45 }
0x1a8a   :  { %v3578_v40 = vrot.slane %v5588_v48, %v3573_v56 }
0x1a8b   :  { %v2936_v51 = vrot.slane %v5586_v46, 1  ;;  %v3574_v0 = vrot.slane %v5586_v46, %v3573_v56 }
0x1a8d   :  { %v2938_v54 = vsel %vm2937_vm14, %v5588_v48, %v2936_v51 }
0x1a8e   :  { %v5599_v55 = vadd.f32 %v4471_v49, %v2938_v54 }
0x1a90   :  { %v3565_v39 = vrot.slane %v5599_v55, %v5595_v53  ;;  %v3558_v52 = vrot.slane %v5599_v55, %v5333_v27 }
0x1a92   :  { %3567 = vbcast.lane.b32.xlu1 %v3565_v39, 256  ;;  %3560 = vbcast.lane.b32.xlu0 %v3558_v52, 256 }
0x1a96   :  { %3625 = vperm.xlu1 %5003, %v5607_v50  }
0x1b04   :  { %v3568_v58 = vpop.permute.xlu1 %3567  ;;  %v3561_v59 = vpop.permute.xlu0 %3560 }
0x1b05   :  { %v3570_v61 = vadd.f32 %v3568_v58, %v5614_v57  ;;  %v3569_v63 = vadd.f32 %v3561_v59, %v5614_v57 }
0x1b07   :  { %v3580_v62 = vadd.f32 %v3578_v40, %v3570_v61  ;;  %v3579_v60 = vadd.f32 %v3574_v0, %v3569_v63  ;;  %v5193_v0 = vmov 5  }
0x1b09   :  { %v3589_v1 = vsel %vm3581_vm0, %v3580_v62, -inf  ;;  %v3582_v2 = vsel %vm3581_vm0, %v3579_v60, -inf }
0x1b0a   :  { %v3590_v3 = vrot.slane %v3589_v1, 4  ;;  %v3583_v6 = vrot.slane %v3582_v2, 4 }
0x1b0c   :  { %v3591_v37 = vmax.f32 %v3589_v1, %v3590_v3  ;;  %v3584_v36 = vmax.f32 %v3582_v2, %v3583_v6 }
0x1b0e   :  { %v3592_v7 = vrot.slane %v3591_v37, 2  ;;  %v3585_v5 = vrot.slane %v3584_v36, 2 }
0x1b10   :  { %v3593_v4 = vmax.f32 %v3591_v37, %v3592_v7  ;;  %v3586_v9 = vmax.f32 %v3584_v36, %v3585_v5 }
0x1b12   :  { %v3594_v11 = vrot.slane %v3593_v4, 1  ;;  %v3587_v47 = vrot.slane %v3586_v9, 1 }
0x1b14   :  { %v5622_v16 = vmax.f32 %v3593_v4, %v3594_v11  ;;  %v5624_v12 = vmax.f32 %v3586_v9, %v3587_v47 }
0x1b15   :  { %v5626_v13 = vpop.permute.xlu1 %3625 }
0x1b16   :  { %v3597_v18 = vsub.f32 %v3580_v62, %v5622_v16  ;;  %vm3956_vm1 = vcmp.eq.f32.partialorder %v3580_v62, %v5622_v16  ;;  %v3596_v19 = vsub.f32 %v3579_v60, %v5624_v12  ;;  %vm3955_vm2 = vcmp.eq.f32.partialorder %v3579_v60, %v5624_v12 }
0x1b17   :  { %v3958_v20 = vsel %vm3956_vm1, %v5329_v22, 3  ;;  %v3957_v34 = vsel %vm3955_vm2, %v5329_v22, 3  ;;  %vm3627_vm3 = vcmp.eq.s32.totalorder %v5626_v13, 1  ;;  %v3981_v33 = vsel %vm2937_vm14, %v5622_v16, %v5624_v12 }
0x1b18   :  { %v3600_v21 = vmul.f32 1.442695, %v3597_v18  ;;  %v3969_v23 = vsel %vm3581_vm0, %v3958_v20, 2147483647  ;;  %v3598_v24 = vmul.f32 1.442695, %v3596_v19  ;;  %v5642_v25 = vsel %vm3627_vm3, %v3981_v33, %v5599_v55 }
0x1b19   :  { %v3970_v26 = vrot.slane %v3969_v23, 4  ;;  %v3959_v28 = vsel %vm3581_vm0, %v3957_v34, 2147483647  ;;  %v3994_v30 = vrot.slane %v5642_v25, %v5595_v53  ;;  %v3987_v31 = vrot.slane %v5642_v25, %v5333_v27 }
0x1b1a   :  { %5083 = vpow2.f32 %v3600_v21  ;;  %v3960_v32 = vrot.slane %v3959_v28, 4  ;;  %v3651_v18 = vsub.s32 3, %v5329_v22 }
0x1b1b   :  { %vm3971_vm4 = vcmp.lt.s32.totalorder %v3969_v23, %v3970_v26  ;;  %5085 = vpow2.f32 %v3598_v24  ;;  %3996 = vbcast.lane.b32.xlu1 %v3994_v30, 256  ;;  %3989 = vbcast.lane.b32.xlu0 %v3987_v31, 256 }
0x1b1c   :  { %v3972_v35 = vsel %vm3971_vm4, %v3969_v23, %v3970_v26  ;;  %vm3961_vm5 = vcmp.lt.s32.totalorder %v3959_v28, %v3960_v32  ;;  %v5666_v34 = vrot.slane %v5588_v48, %v3651_v18 }
0x1b1d   :  { %v3973_v38 = vrot.slane %v3972_v35, 2  ;;  %v3962_v41 = vsel %vm3961_vm5, %v3959_v28, %v3960_v32 }
0x1b1e   :  { %v3963_v8 = vrot.slane %v3962_v41, 2 }
0x1b1f   :  { %vm3974_vm6 = vcmp.lt.s32.totalorder %v3972_v35, %v3973_v38  ;;  %3700 = vperm.xlu0 %5004, %v5607_v50  }
0x1b20   :  { %vm3964_vm8 = vcmp.lt.s32.totalorder %v3962_v41, %v3963_v8  ;;  %v3975_v43 = vsel %vm3974_vm6, %v3972_v35, %v3973_v38 }
0x1b21   :  { %v3965_v44 = vsel %vm3964_vm8, %v3962_v41, %v3963_v8  ;;  %v3976_v29 = vrot.slane %v3975_v43, 1 }
0x1b22   :  { %v3966_v10 = vrot.slane %v3965_v44, 1 }
0x1b23   :  { %vm3977_vm9 = vcmp.lt.s32.totalorder %v3975_v43, %v3976_v29  ;;  %5005 = vset.pattern.permute.xlu0 %v5193_v0 }
0x1b24   :  { %v5084_v45 = vpop.eup %5083  ;;  %vm3967_vm10 = vcmp.lt.s32.totalorder %v3965_v44, %v3966_v10  ;;  %v3978_v49 = vsel %vm3977_vm9, %v3975_v43, %v3976_v29  ;;  %3775 = vperm.xlu0 %5005, %v5607_v50  }
0x1b25   :  { %v5086_v51 = vpop.eup %5085  ;;  %v3609_v54 = vsel %vm3581_vm0, %v5084_v45, 0.0  ;;  %v3968_v39 = vsel %vm3967_vm10, %v3965_v44, %v3966_v10 }
0x1b26   :  { %v3610_v52 = vrot.slane %v3609_v54, 4  ;;  %v3602_v42 = vsel %vm3581_vm0, %v5086_v51, 0.0  ;;  %v5653_v56 = vsel %vm2937_vm14, %v3978_v49, %v3968_v39 }
0x1b27   :  { %v3603_v58 = vrot.slane %v3602_v42, 4 }
0x1b28   :  { %v3611_v59 = vadd.f32 %v3610_v52, %v3609_v54 }
0x1b29   :  { %v3604_v40 = vadd.f32 %v3603_v58, %v3602_v42 }
0x1b2a   :  { %v3612_v61 = vrot.slane %v3611_v59, 2 }
0x1b2b   :  { %v3605_v63 = vrot.slane %v3604_v40, 2 }
0x1b2c   :  { %v3613_v62 = vadd.f32 %v3612_v61, %v3611_v59 }
0x1b2d   :  { %v3606_v60 = vadd.f32 %v3605_v63, %v3604_v40 }
0x1b2e   :  { %v3614_v1 = vrot.slane %v3613_v62, 1 }
0x1b2f   :  { %v3607_v2 = vrot.slane %v3606_v60, 1 }
0x1b30   :  { %v3615_v3 = vadd.f32 %v3614_v1, %v3613_v62 }
0x1b31   :  { %v3608_v6 = vadd.f32 %v3607_v2, %v3606_v60 }
0x1b32   :  { %5087 = vlog2.f32 %v3615_v3 }
0x1b33   :  { %5089 = vlog2.f32 %v3608_v6 }
0x1b3c   :  { %v5088_v37 = vpop.eup %5087 }
0x1b3d   :  { %v5090_v36 = vpop.eup %5089  ;;  %v3619_v7 = vmul.f32 0.6931472, %v5088_v37 }
0x1b3e   :  { %v3617_v5 = vmul.f32 0.6931472, %v5090_v36  ;;  %v5194_v36 = vmov 6  }
0x1b3f   :  { %v3621_v4 = vadd.f32 %v3619_v7, %v5622_v16  ;;  %v5670_v16 = vrot.slane %v5586_v46, %v3651_v18  ;;  %5006 = vset.pattern.permute.xlu0 %v5194_v36  ;;  %v3726_v7 = vsub.s32 4, %v5329_v22  ;;  %v3801_v36 = vsub.s32 5, %v5329_v22 }
0x1b40   :  { %v3620_v9 = vadd.f32 %v3617_v5, %v5624_v12  ;;  %3850 = vperm.xlu0 %5006, %v5607_v50  }
0x1b42   :  { %v3630_v11 = vsel %vm2937_vm14, %v3621_v4, %v3620_v9  ;;  %v5700_v4 = vrot.slane %v5586_v46, %v3726_v7 }
0x1b43   :  { %v5662_v47 = vsel %vm3627_vm3, %v3630_v11, %v5599_v55 }
0x1b8d   :  { %v3997_v19 = vpop.permute.xlu1 %3996  ;;  %v3990_v20 = vpop.permute.xlu0 %3989 }
0x1b8e   :  { %v3999_v33 = vadd.f32 %v3997_v19, %v5614_v57  ;;  %v3998_v12 = vadd.f32 %v3990_v20, %v5614_v57  ;;  %v5706_v20 = vrot.slane %v5588_v48, %v3726_v7 }
0x1b90   :  { %v4001_v21 = vadd.f32 %v3999_v33, %v5666_v34  ;;  %v4000_v13 = vadd.f32 %v3998_v12, %v5670_v16 }
0x1b92   :  { %v4009_v23 = vsel %vm3581_vm0, %v4001_v21, -inf  ;;  %v4002_v24 = vsel %vm3581_vm0, %v4000_v13, -inf }
0x1b93   :  { %v4010_v26 = vrot.slane %v4009_v23, 4  ;;  %v4003_v28 = vrot.slane %v4002_v24, 4 }
0x1b95   :  { %v4011_v30 = vmax.f32 %v4009_v23, %v4010_v26  ;;  %v4004_v31 = vmax.f32 %v4002_v24, %v4003_v28 }
0x1b97   :  { %v4012_v32 = vrot.slane %v4011_v30, 2  ;;  %v4005_v35 = vrot.slane %v4004_v31, 2 }
0x1b99   :  { %v4013_v38 = vmax.f32 %v4011_v30, %v4012_v32  ;;  %v4006_v41 = vmax.f32 %v4004_v31, %v4005_v35 }
0x1b9b   :  { %v4014_v8 = vrot.slane %v4013_v38, 1  ;;  %v4007_v43 = vrot.slane %v4006_v41, 1 }
0x1b9d   :  { %v4015_v44 = vmax.f32 %v4013_v38, %v4014_v8  ;;  %v4008_v29 = vmax.f32 %v4006_v41, %v4007_v43 }
0x1b9e   :  { %v5677_v10 = vpop.permute.xlu0 %3700 }
0x1b9f   :  { %vm4017_vm11 = vcmp.eq.f32.partialorder %v4001_v21, %v4015_v44  ;;  %vm4016_vm12 = vcmp.eq.f32.partialorder %v4000_v13, %v4008_v29  ;;  %v4042_v45 = vsel %vm2937_vm14, %v4015_v44, %v4008_v29  ;;  %vm3702_vm13 = vcmp.eq.s32.totalorder %v5677_v10, 1 }
0x1ba0   :  { %v4019_v49 = vsel %vm4017_vm11, %v5329_v22, 3  ;;  %v4018_v51 = vsel %vm4016_vm12, %v5329_v22, 3  ;;  %v5686_v54 = vsel %vm3702_vm13, %v4042_v45, %v5642_v25 }
0x1ba1   :  { %v4030_v39 = vsel %vm3581_vm0, %v4019_v49, 2147483647  ;;  %v4020_v52 = vsel %vm3581_vm0, %v4018_v51, 2147483647  ;;  %v4048_v42 = vrot.slane %v5686_v54, %v5333_v27  ;;  %v4055_v0 = vrot.slane %v5686_v54, %v5595_v53 }
0x1ba2   :  { %v4031_v58 = vrot.slane %v4030_v39, 4  ;;  %v4021_v59 = vrot.slane %v4020_v52, 4 }
0x1ba3   :  { %4050 = vbcast.lane.b32.xlu1 %v4048_v42, 256  ;;  %v5711_v41 = vpop.permute.xlu0 %3775 }
0x1ba4   :  { %vm4032_vm15 = vcmp.lt.s32.totalorder %v4030_v39, %v4031_v58  ;;  %vm4022_vm1 = vcmp.lt.s32.totalorder %v4020_v52, %v4021_v59  ;;  %vm3777_vm8 = vcmp.eq.s32.totalorder %v5711_v41, 1 }
0x1ba5   :  { %v4033_v40 = vsel %vm4032_vm15, %v4030_v39, %v4031_v58  ;;  %v4023_v61 = vsel %vm4022_vm1, %v4020_v52, %v4021_v59 }
0x1ba6   :  { %v4034_v63 = vrot.slane %v4033_v40, 2  ;;  %v4024_v25 = vrot.slane %v4023_v61, 2 }
0x1ba7   :  { %4057 = vbcast.lane.b32.xlu1 %v4055_v0, 256 }
0x1ba8   :  { %vm4035_vm2 = vcmp.lt.s32.totalorder %v4033_v40, %v4034_v63  ;;  %vm4025_vm3 = vcmp.lt.s32.totalorder %v4023_v61, %v4024_v25 }
0x1ba9   :  { %v4036_v62 = vsel %vm4035_vm2, %v4033_v40, %v4034_v63  ;;  %v4026_v60 = vsel %vm4025_vm3, %v4023_v61, %v4024_v25 }
0x1baa   :  { %v4037_v1 = vrot.slane %v4036_v62, 1  ;;  %v4027_v2 = vrot.slane %v4026_v60, 1 }
0x1bac   :  { %vm4028_vm4 = vcmp.lt.s32.totalorder %v4026_v60, %v4027_v2  ;;  %vm4038_vm5 = vcmp.lt.s32.totalorder %v4036_v62, %v4037_v1 }
0x1bad   :  { %v4029_v3 = vsel %vm4028_vm4, %v4026_v60, %v4027_v2  ;;  %v4039_v6 = vsel %vm4038_vm5, %v4036_v62, %v4037_v1 }
0x1bae   :  { %v5695_v37 = vsel %vm2937_vm14, %v4039_v6, %v4029_v3  ;;  %v5195_v6 = vmov 7  }
0x1baf   :  { %5007 = vset.pattern.permute.xlu0 %v5195_v6 }
0x1bb0   :  { %3925 = vperm.xlu0 %5007, %v5607_v50  }
0x1c15   :  { %v4051_v5 = vpop.permute.xlu1 %4050 }
0x1c16   :  { %v4059_v9 = vadd.f32 %v4051_v5, %v5614_v57  ;;  %v5731_v5 = vrot.slane %v5586_v46, %v3801_v36 }
0x1c18   :  { %v4061_v11 = vadd.f32 %v4059_v9, %v5700_v4 }
0x1c19   :  { %v4058_v18 = vpop.permute.xlu1 %4057 }
0x1c1a   :  { %v4063_v19 = vsel %vm3581_vm0, %v4061_v11, -inf  ;;  %v4060_v33 = vadd.f32 %v4058_v18, %v5614_v57 }
0x1c1b   :  { %v4064_v12 = vrot.slane %v4063_v19, 4 }
0x1c1c   :  { %v4062_v21 = vadd.f32 %v4060_v33, %v5706_v20  ;;  %v5737_v33 = vrot.slane %v5588_v48, %v3801_v36  ;;  %v3643_v36 = vrot.slane %v5662_v47, %v5595_v53 }
0x1c1d   :  { %v4065_v13 = vmax.f32 %v4063_v19, %v4064_v12 }
0x1c1e   :  { %v4070_v23 = vsel %vm3581_vm0, %v4062_v21, -inf }
0x1c1f   :  { %v4066_v24 = vrot.slane %v4065_v13, 2  ;;  %v4071_v26 = vrot.slane %v4070_v23, 4 }
0x1c21   :  { %v4067_v28 = vmax.f32 %v4065_v13, %v4066_v24  ;;  %v4072_v30 = vmax.f32 %v4070_v23, %v4071_v26 }
0x1c23   :  { %v4068_v31 = vrot.slane %v4067_v28, 1  ;;  %v4073_v32 = vrot.slane %v4072_v30, 2 }
0x1c25   :  { %v4069_v35 = vmax.f32 %v4067_v28, %v4068_v31  ;;  %v4074_v38 = vmax.f32 %v4072_v30, %v4073_v32 }
0x1c27   :  { %vm4077_vm6 = vcmp.eq.f32.partialorder %v4061_v11, %v4069_v35  ;;  %v4075_v8 = vrot.slane %v4074_v38, 1 }
0x1c28   :  { %v4079_v43 = vsel %vm4077_vm6, %v5329_v22, 3 }
0x1c29   :  { %v4081_v44 = vsel %vm3581_vm0, %v4079_v43, 2147483647  ;;  %v4076_v29 = vmax.f32 %v4074_v38, %v4075_v8  ;;  %v5742_v8 = vpop.permute.xlu0 %3850 }
0x1c2a   :  { %v4082_v45 = vrot.slane %v4081_v44, 4  ;;  %vm3852_vm4 = vcmp.eq.s32.totalorder %v5742_v8, 1 }
0x1c2b   :  { %vm4078_vm9 = vcmp.eq.f32.partialorder %v4062_v21, %v4076_v29  ;;  %v4103_v49 = vsel %vm2937_vm14, %v4076_v29, %v4069_v35 }
0x1c2c   :  { %vm4083_vm10 = vcmp.lt.s32.totalorder %v4081_v44, %v4082_v45  ;;  %v4080_v51 = vsel %vm4078_vm9, %v5329_v22, 3  ;;  %v4105_v39 = vsel %vm3777_vm8, %v4103_v49, %v5686_v54 }
0x1c2d   :  { %v4084_v52 = vsel %vm4083_vm10, %v4081_v44, %v4082_v45  ;;  %v4091_v42 = vsel %vm3581_vm0, %v4080_v51, 2147483647  ;;  %v4109_v58 = vrot.slane %v4105_v39, %v5333_v27  ;;  %v4116_v63 = vrot.slane %v4105_v39, %v5595_v53 }
0x1c2e   :  { %v4085_v59 = vrot.slane %v4084_v52, 2  ;;  %v4092_v40 = vrot.slane %v4091_v42, 4 }
0x1c2f   :  { %4111 = vbcast.lane.b32.xlu1 %v4109_v58, 256 }
0x1c30   :  { %vm4086_vm11 = vcmp.lt.s32.totalorder %v4084_v52, %v4085_v59  ;;  %vm4093_vm12 = vcmp.lt.s32.totalorder %v4091_v42, %v4092_v40 }
0x1c31   :  { %v4087_v61 = vsel %vm4086_vm11, %v4084_v52, %v4085_v59  ;;  %v4094_v0 = vsel %vm4093_vm12, %v4091_v42, %v4092_v40 }
0x1c32   :  { %v4088_v25 = vrot.slane %v4087_v61, 1  ;;  %v4095_v62 = vrot.slane %v4094_v0, 2 }
0x1c33   :  { %4118 = vbcast.lane.b32.xlu1 %v4116_v63, 256 }
0x1c34   :  { %vm4096_vm15 = vcmp.lt.s32.totalorder %v4094_v0, %v4095_v62  ;;  %vm4089_vm1 = vcmp.lt.s32.totalorder %v4087_v61, %v4088_v25 }
0x1c35   :  { %v4097_v60 = vsel %vm4096_vm15, %v4094_v0, %v4095_v62  ;;  %v4090_v1 = vsel %vm4089_vm1, %v4087_v61, %v4088_v25 }
0x1c36   :  { %v4098_v54 = vrot.slane %v4097_v60, 1 }
0x1c38   :  { %vm4099_vm2 = vcmp.lt.s32.totalorder %v4097_v60, %v4098_v54 }
0x1c39   :  { %v4100_v2 = vsel %vm4099_vm2, %v4097_v60, %v4098_v54 }
0x1c3a   :  { %v5725_v3 = vsel %vm2937_vm14, %v4100_v2, %v4090_v1 }
0x1ca1   :  { %v4112_v7 = vpop.permute.xlu1 %4111 }
0x1ca2   :  { %v4120_v9 = vadd.f32 %v4112_v7, %v5614_v57 }
0x1ca4   :  { %v4122_v11 = vadd.f32 %v4120_v9, %v5731_v5 }
0x1ca5   :  { %v4119_v18 = vpop.permute.xlu1 %4118 }
0x1ca6   :  { %v4124_v19 = vsel %vm3581_vm0, %v4122_v11, -inf  ;;  %v4121_v12 = vadd.f32 %v4119_v18, %v5614_v57  ;;  %v5196_v18 = vmov 10  }
0x1ca7   :  { %v4125_v21 = vrot.slane %v4124_v19, 4  ;;  %5009 = vset.pattern.permute.xlu0 %v5196_v18 }
0x1ca8   :  { %v4123_v50 = vadd.f32 %v4121_v12, %v5737_v33 }
0x1ca9   :  { %v4126_v13 = vmax.f32 %v4124_v19, %v4125_v21  ;;  %v3876_v19 = vsub.s32 6, %v5329_v22 }
0x1caa   :  { %v4131_v23 = vsel %vm3581_vm0, %v4123_v50, -inf }
0x1cab   :  { %v4127_v24 = vrot.slane %v4126_v13, 2  ;;  %v4132_v26 = vrot.slane %v4131_v23, 4  ;;  %v5767_v21 = vrot.slane %v5586_v46, %v3876_v19 }
0x1cad   :  { %v4128_v28 = vmax.f32 %v4126_v13, %v4127_v24  ;;  %v4133_v30 = vmax.f32 %v4131_v23, %v4132_v26  ;;  %v5773_v26 = vrot.slane %v5588_v48, %v3876_v19 }
0x1caf   :  { %v4129_v31 = vrot.slane %v4128_v28, 1  ;;  %v4134_v32 = vrot.slane %v4133_v30, 2 }
0x1cb1   :  { %v4130_v35 = vmax.f32 %v4128_v28, %v4129_v31  ;;  %v4135_v38 = vmax.f32 %v4133_v30, %v4134_v32 }
0x1cb3   :  { %vm4138_vm3 = vcmp.eq.f32.partialorder %v4122_v11, %v4130_v35  ;;  %v4136_v43 = vrot.slane %v4135_v38, 1 }
0x1cb4   :  { %v4140_v44 = vsel %vm4138_vm3, %v5329_v22, 3 }
0x1cb5   :  { %v4142_v29 = vsel %vm3581_vm0, %v4140_v44, 2147483647  ;;  %v4137_v45 = vmax.f32 %v4135_v38, %v4136_v43 }
0x1cb6   :  { %v4143_v49 = vrot.slane %v4142_v29, 4 }
0x1cb7   :  { %vm4139_vm5 = vcmp.eq.f32.partialorder %v4123_v50, %v4137_v45  ;;  %v4164_v51 = vsel %vm2937_vm14, %v4137_v45, %v4130_v35 }
0x1cb8   :  { %vm4144_vm6 = vcmp.lt.s32.totalorder %v4142_v29, %v4143_v49  ;;  %v4141_v52 = vsel %vm4139_vm5, %v5329_v22, 3  ;;  %v5751_v42 = vsel %vm3852_vm4, %v4164_v51, %v4105_v39  ;;  %v3636_v39 = vrot.slane %v5662_v47, %v5333_v27 }
0x1cb9   :  { %v4145_v58 = vsel %vm4144_vm6, %v4142_v29, %v4143_v49  ;;  %v4152_v59 = vsel %vm3581_vm0, %v4141_v52, 2147483647  ;;  %v4170_v40 = vrot.slane %v5751_v42, %v5333_v27  ;;  %v4177_v25 = vrot.slane %v5751_v42, %v5595_v53 }
0x1cba   :  { %v4146_v61 = vrot.slane %v4145_v58, 2  ;;  %v4153_v0 = vrot.slane %v4152_v59, 4  ;;  %vm2942_vm6 = vcmask 17408  }
0x1cbb   :  { %4172 = vbcast.lane.b32.xlu1 %v4170_v40, 256 }
0x1cbc   :  { %vm4147_vm9 = vcmp.lt.s32.totalorder %v4145_v58, %v4146_v61  ;;  %vm4154_vm10 = vcmp.lt.s32.totalorder %v4152_v59, %v4153_v0 }
0x1cbd   :  { %v4155_v63 = vsel %vm4154_vm10, %v4152_v59, %v4153_v0  ;;  %v4148_v62 = vsel %vm4147_vm9, %v4145_v58, %v4146_v61 }
0x1cbe   :  { %v4156_v60 = vrot.slane %v4155_v63, 2  ;;  %v4149_v54 = vrot.slane %v4148_v62, 1 }
0x1cbf   :  { %4179 = vbcast.lane.b32.xlu1 %v4177_v25, 256 }
0x1cc0   :  { %vm4157_vm11 = vcmp.lt.s32.totalorder %v4155_v63, %v4156_v60  ;;  %vm4150_vm12 = vcmp.lt.s32.totalorder %v4148_v62, %v4149_v54 }
0x1cc1   :  { %v4158_v1 = vsel %vm4157_vm11, %v4155_v63, %v4156_v60  ;;  %v4151_v7 = vsel %vm4150_vm12, %v4148_v62, %v4149_v54  ;;  %v5783_v54 = vpop.permute.xlu0 %3925 }
0x1cc2   :  { %v4159_v2 = vrot.slane %v4158_v1, 1  ;;  %vm3927_vm2 = vcmp.eq.s32.totalorder %v5783_v54, 1 }
0x1cc3   :  { %3638 = vbcast.lane.b32.xlu1 %v3636_v39, 256 }
0x1cc4   :  { %vm4160_vm15 = vcmp.lt.s32.totalorder %v4158_v1, %v4159_v2 }
0x1cc5   :  { %v4161_v9 = vsel %vm4160_vm15, %v4158_v1, %v4159_v2 }
0x1cc6   :  { %v5763_v11 = vsel %vm2937_vm14, %v4161_v9, %v4151_v7 }
0x1cc7   :  { %3645 = vbcast.lane.b32.xlu1 %v3643_v36, 256 }
0x1d2d   :  { %v4173_v12 = vpop.permute.xlu1 %4172 }
0x1d2e   :  { %v4181_v50 = vadd.f32 %v4173_v12, %v5614_v57 }
0x1d30   :  { %v4183_v13 = vadd.f32 %v4181_v50, %v5767_v21 }
0x1d31   :  { %v4180_v23 = vpop.permute.xlu1 %4179 }
0x1d32   :  { %v4185_v24 = vsel %vm3581_vm0, %v4183_v13, -inf  ;;  %v4182_v28 = vadd.f32 %v4180_v23, %v5614_v57 }
0x1d33   :  { %v4186_v30 = vrot.slane %v4185_v24, 4 }
0x1d34   :  { %v4184_v31 = vadd.f32 %v4182_v28, %v5773_v26 }
0x1d35   :  { %v4187_v32 = vmax.f32 %v4185_v24, %v4186_v30  ;;  %v3639_v35 = vpop.permute.xlu1 %3638 }
0x1d36   :  { %v4192_v38 = vsel %vm3581_vm0, %v4184_v31, -inf  ;;  %v3647_v43 = vadd.f32 %v3639_v35, %v5614_v57 }
0x1d37   :  { %v4188_v44 = vrot.slane %v4187_v32, 2  ;;  %v4193_v29 = vrot.slane %v4192_v38, 4 }
0x1d38   :  { %v3657_v45 = vadd.f32 %v5670_v16, %v3647_v43 }
0x1d39   :  { %v4189_v49 = vmax.f32 %v4187_v32, %v4188_v44  ;;  %v4194_v51 = vmax.f32 %v4192_v38, %v4193_v29  ;;  %v3646_v52 = vpop.permute.xlu1 %3645 }
0x1d3a   :  { %v3659_v58 = vsel %vm3581_vm0, %v3657_v45, -inf  ;;  %v3648_v59 = vadd.f32 %v3646_v52, %v5614_v57 }
0x1d3b   :  { %v4190_v40 = vrot.slane %v4189_v49, 1  ;;  %v4195_v61 = vrot.slane %v4194_v51, 2  ;;  %v3660_v0 = vrot.slane %v3659_v58, 4 }
0x1d3c   :  { %v3658_v63 = vadd.f32 %v5666_v34, %v3648_v59 }
0x1d3d   :  { %v4191_v25 = vmax.f32 %v4189_v49, %v4190_v40  ;;  %v4196_v62 = vmax.f32 %v4194_v51, %v4195_v61  ;;  %v3661_v60 = vmax.f32 %v3659_v58, %v3660_v0 }
0x1d3e   :  { %v3666_v39 = vsel %vm3581_vm0, %v3658_v63, -inf }
0x1d3f   :  { %vm4199_vm1 = vcmp.eq.f32.partialorder %v4183_v13, %v4191_v25  ;;  %v4197_v16 = vrot.slane %v4196_v62, 1  ;;  %v3662_v1 = vrot.slane %v3661_v60, 2  ;;  %v3667_v2 = vrot.slane %v3666_v39, 4  ;;  %v5793_v13 = vld [vmem:[%s6166_s3 + $0x14] ss:$0 sm:$0xff] }
0x1d40   :  { %v4201_v36 = vsel %vm4199_vm1, %v5329_v22, 3  ;;  %vm2959_vm1 = vcmask 1042432  }
0x1d41   :  { %v4203_v7 = vsel %vm3581_vm0, %v4201_v36, 2147483647  ;;  %v4198_v9 = vmax.f32 %v4196_v62, %v4197_v16  ;;  %v3663_v18 = vmax.f32 %v3661_v60, %v3662_v1  ;;  %v3668_v34 = vmax.f32 %v3666_v39, %v3667_v2  ;;  %4842 = vmatpush3.msk.msra.mxu0 %vm2959_vm1, %v5614_v57  ;;  %4832 = vmatpush3.msk.msra.mxu1 %vm2959_vm1, %v5614_v57 }
0x1d42   :  { %v4204_v19 = vrot.slane %v4203_v7, 4  ;;  %4836 = vmatprep.subr.mxu1 %v5182_v15  ;;  %4851 = vmatprep.subr.mxu0 %v5182_v15 }
0x1d43   :  { %vm4200_vm3 = vcmp.eq.f32.partialorder %v4184_v31, %v4198_v9  ;;  %v3664_v12 = vrot.slane %v3663_v18, 1  ;;  %v3669_v50 = vrot.slane %v3668_v34, 2  ;;  %v4225_v23 = vsel %vm2937_vm14, %v4198_v9, %v4191_v25 }
0x1d44   :  { %vm4205_vm5 = vcmp.lt.s32.totalorder %v4203_v7, %v4204_v19  ;;  %v4202_v24 = vsel %vm4200_vm3, %v5329_v22, 3  ;;  %v4227_v28 = vsel %vm3927_vm2, %v4225_v23, %v5751_v42  ;;  %v5818_v23 = vld [vmem:[%s6164_s1] sm:$0x3] }
0x1d45   :  { %v4206_v30 = vsel %vm4205_vm5, %v4203_v7, %v4204_v19  ;;  %v4213_v31 = vsel %vm3581_vm0, %v4202_v24, 2147483647  ;;  %v5800_v32 = vmax.f32 %v3663_v18, %v3664_v12  ;;  %v3670_v35 = vmax.f32 %v3668_v34, %v3669_v50 }
0x1d46   :  { %v4207_v38 = vrot.slane %v4206_v30, 2  ;;  %v4214_v43 = vrot.slane %v4213_v31, 4  ;;  %v5803_v44 = vadd.f32 %v5793_v13, %v4227_v28  ;;  %vm2918_vm5 = vcmask 41984  }
0x1d47   :  { %v3673_v29 = vsub.f32 %v3657_v45, %v5800_v32  ;;  %v3671_v49 = vrot.slane %v3670_v35, 1 }
0x1d48   :  { %vm4208_vm9 = vcmp.lt.s32.totalorder %v4206_v30, %v4207_v38  ;;  %vm4215_vm10 = vcmp.lt.s32.totalorder %v4213_v31, %v4214_v43  ;;  %v4229_v22 = vsel %vm2942_vm6, %v5803_v44, -inf }
0x1d49   :  { %v4216_v42 = vsel %vm4215_vm10, %v4213_v31, %v4214_v43  ;;  %v3675_v51 = vmul.f32 1.442695, %v3673_v29  ;;  %v3672_v52 = vmax.f32 %v3670_v35, %v3671_v49  ;;  %4230 = vmax.xlane.f32.xlu0 %v4229_v22  ;;  %v4209_v58 = vsel %vm4208_vm9, %v4206_v30, %v4207_v38 }
0x1d4a   :  { %v4217_v59 = vrot.slane %v4216_v42, 2  ;;  %v4210_v40 = vrot.slane %v4209_v58, 1  ;;  %v5198_v35 = vmov 11   ;;  %v5199_v43 = vmov 9  }
0x1d4b   :  { %5091 = vpow2.f32 %v3675_v51  ;;  %v3674_v61 = vsub.f32 %v3658_v63, %v3672_v52  ;;  %5008 = vset.pattern.permute.xlu1 %v5199_v43 }
0x1d4c   :  { %vm4218_vm11 = vcmp.lt.s32.totalorder %v4216_v42, %v4217_v59  ;;  %vm4211_vm12 = vcmp.lt.s32.totalorder %v4209_v58, %v4210_v40 }
0x1d4d   :  { %v3677_v0 = vmul.f32 1.442695, %v3674_v61  ;;  %v4219_v25 = vsel %vm4218_vm11, %v4216_v42, %v4217_v59  ;;  %v4212_v62 = vsel %vm4211_vm12, %v4209_v58, %v4210_v40 }
0x1d4e   :  { %v4220_v45 = vrot.slane %v4219_v25, 1 }
0x1d4f   :  { %5093 = vpow2.f32 %v3677_v0 }
0x1d50   :  { %vm4221_vm15 = vcmp.lt.s32.totalorder %v4219_v25, %v4220_v45 }
0x1d51   :  { %v4222_v60 = vsel %vm4221_vm15, %v4219_v25, %v4220_v45 }
0x1d52   :  { %v5809_v39 = vsel %vm2937_vm14, %v4222_v60, %v4212_v62 }
0x1d55   :  { %v5092_v16 = vpop.eup %5091 }
0x1d56   :  { %v3679_v1 = vsel %vm3581_vm0, %v5092_v16, 0.0 }
0x1d57   :  { %v3680_v2 = vrot.slane %v3679_v1, 4 }
0x1d59   :  { %v5094_v36 = vpop.eup %5093  ;;  %v3681_v7 = vadd.f32 %v3680_v2, %v3679_v1 }
0x1d5a   :  { %v3686_v63 = vsel %vm3581_vm0, %v5094_v36, 0.0 }
0x1d5b   :  { %v3682_v9 = vrot.slane %v3681_v7, 2  ;;  %v3687_v18 = vrot.slane %v3686_v63, 4 }
0x1d5d   :  { %v3683_v34 = vadd.f32 %v3682_v9, %v3681_v7  ;;  %v3688_v19 = vadd.f32 %v3687_v18, %v3686_v63 }
0x1d5f   :  { %v3684_v12 = vrot.slane %v3683_v34, 1  ;;  %v3689_v50 = vrot.slane %v3688_v19, 2  ;;  %2915 = vrot.lane.b32.xlu0 %v5325_v14, %s5197_s8 }
0x1d61   :  { %v3685_v24 = vadd.f32 %v3684_v12, %v3683_v34  ;;  %v3690_v28 = vadd.f32 %v3689_v50, %v3688_v19  ;;  %v5200_v34 = vmov 12  }
0x1d63   :  { %5095 = vlog2.f32 %v3685_v24  ;;  %v3691_v30 = vrot.slane %v3690_v28, 1  ;;  %2950 = vperm.xlu0 %5009, %v5818_v23  }
0x1d65   :  { %v3692_v31 = vadd.f32 %v3691_v30, %v3690_v28  ;;  %v5201_v30 = vmov 13  }
0x1d67   :  { %5097 = vlog2.f32 %v3692_v31  ;;  %5010 = vset.pattern.permute.xlu0 %v5198_v35 }
0x1d68   :  { %3071 = vperm.xlu0 %5010, %v5818_v23  }
0x1d6d   :  { %v5096_v38 = vpop.eup %5095 }
0x1d6e   :  { %v3694_v29 = vmul.f32 0.6931472, %v5096_v38 }
0x1d70   :  { %v3697_v42 = vadd.f32 %v3694_v29, %v5800_v32 }
0x1d71   :  { %v5098_v49 = vpop.eup %5097 }
0x1d72   :  { %v3696_v22 = vmul.f32 0.6931472, %v5098_v49 }
0x1d74   :  { %v3698_v51 = vadd.f32 %v3696_v22, %v3672_v52 }
0x1d76   :  { %v3705_v58 = vsel %vm2937_vm14, %v3698_v51, %v3697_v42 }
0x1d77   :  { %v5833_v59 = vsel %vm3702_vm13, %v3705_v58, %v5662_v47  ;;  %vm2955_vm13 = vcmask 23552  }
0x1d78   :  { %v3711_v40 = vrot.slane %v5833_v59, %v5333_v27  ;;  %v3718_v61 = vrot.slane %v5833_v59, %v5595_v53 }
0x1d7a   :  { %3713 = vbcast.lane.b32.xlu1 %v3711_v40, 256 }
0x1d7e   :  { %3720 = vbcast.lane.b32.xlu1 %v3718_v61, 256 }
0x1dd6   :  { %v4231_v0 = vpop.xlane.xlu0 %4230 }
0x1dd7   :  { %vm4232_vm3 = vcmp.eq.f32.partialorder %v5803_v44, %v4231_v0 }
0x1dd8   :  { %v4233_v32 = vsel %vm4232_vm3, %v5264_v17, 3 }
0x1dd9   :  { %v5842_v52 = vsel %vm2942_vm6, %v4233_v32, 2147483647 }
0x1dda   :  { %v2916_v10 = vpop.permute.xlu0 %2915  ;;  %v4236_v47 = vshra.s32 %v5842_v52, 16 }
0x1ddb   :  { %v2919_v25 = vsel %vm2918_vm5, %v2916_v10, 0.0 }
0x1ddc   :  { %v5846_v45 = vcvt.s32.f32 %v4236_v47  ;;  %2920 = vadd.xlane.f32.xlu0 %v2919_v25 }
0x1dde   :  { %4239 = vmin.xlane.f32.xlu1 %v5846_v45 }
0x1de2   :  { %v5849_v62 = vpop.permute.xlu0 %2950 }
0x1de3   :  { %vm2952_vm11 = vcmp.eq.s32.totalorder %v5849_v62, %v5264_v17 }
0x1de4   :  { %v5903_v62 = vsel %vm2952_vm11, 1.0, %v5182_v15  ;;  %vm3162_vm11 = vcmask 1044484  }
0x1de7   :  { %v3072_v60 = vpop.permute.xlu0 %3071 }
0x1de8   :  { %vm3073_vm9 = vcmp.eq.s32.totalorder %v3072_v60, %v5264_v17 }
0x1de9   :  { %v5853_v44 = vsel %vm3073_vm9, 1.0, %v5182_v15 }
0x1dea   :  { %4844 = vmatmul.mubr.msk.f32.vlgmr.msra.gmra.mrb[22].mxu0 %vm2955_vm13, %v5853_v44 }
0x1deb   :  { %4852 = vmatpush3.msk.msra.mxu0 %vm2959_vm1, %v5614_v57  ;;  %4853 = vmatprep.mubr.msk.f32.mxu0 %vm5183_vm7, %v5182_v15 }
0x1dec   :  { %v3714_v16 = vpop.permute.xlu1 %3713 }
0x1ded   :  { %v3722_v1 = vadd.f32 %v3714_v16, %v5614_v57 }
0x1def   :  { %v3732_v2 = vadd.f32 %v5700_v4, %v3722_v1  ;;  %2925 = vperm.xlu1 %5008, %v5818_v23  }
0x1df0   :  { %v3721_v36 = vpop.permute.xlu1 %3720 }
0x1df1   :  { %v3734_v7 = vsel %vm3581_vm0, %v3732_v2, -inf  ;;  %v3723_v63 = vadd.f32 %v3721_v36, %v5614_v57 }
0x1df2   :  { %v3735_v9 = vrot.slane %v3734_v7, 4 }
0x1df3   :  { %v3733_v18 = vadd.f32 %v5706_v20, %v3723_v63  ;;  %5011 = vset.pattern.permute.xlu1 %v5200_v34 }
0x1df4   :  { %v3736_v19 = vmax.f32 %v3734_v7, %v3735_v9  ;;  %3190 = vperm.xlu1 %5011, %v5818_v23  }
0x1df5   :  { %v3741_v12 = vsel %vm3581_vm0, %v3733_v18, -inf }
0x1df6   :  { %v3737_v50 = vrot.slane %v3736_v19, 2  ;;  %v3742_v24 = vrot.slane %v3741_v12, 4 }
0x1df8   :  { %v3738_v4 = vmax.f32 %v3736_v19, %v3737_v50  ;;  %v3743_v28 = vmax.f32 %v3741_v12, %v3742_v24  ;;  %5012 = vset.pattern.permute.xlu1 %v5201_v30 }
0x1df9   :  { %3309 = vperm.xlu1 %5012, %v5818_v23  }
0x1dfa   :  { %v3739_v31 = vrot.slane %v3738_v4, 1  ;;  %v3744_v35 = vrot.slane %v3743_v28, 2 }
0x1dfc   :  { %v3740_v38 = vmax.f32 %v3738_v4, %v3739_v31  ;;  %v3745_v43 = vmax.f32 %v3743_v28, %v3744_v35  ;;  %v4235_v31 = vand.u32 65535, %v5842_v52 }
0x1dfe   :  { %v3748_v20 = vsub.f32 %v3732_v2, %v3740_v38  ;;  %v3746_v29 = vrot.slane %v3745_v43, 1 }
0x1e00   :  { %v3750_v49 = vmul.f32 1.442695, %v3748_v20  ;;  %v3747_v22 = vmax.f32 %v3745_v43, %v3746_v29  ;;  %v4237_v29 = vcvt.s32.f32 %v4235_v31 }
0x1e02   :  { %5099 = vpow2.f32 %v3750_v49  ;;  %v3749_v42 = vsub.f32 %v3733_v18, %v3747_v22 }
0x1e04   :  { %v3752_v51 = vmul.f32 1.442695, %v3749_v42 }
0x1e06   :  { %5101 = vpow2.f32 %v3752_v51 }
0x1e0c   :  { %v5100_v58 = vpop.eup %5099 }
0x1e0d   :  { %v3754_v40 = vsel %vm3581_vm0, %v5100_v58, 0.0 }
0x1e0e   :  { %v3755_v61 = vrot.slane %v3754_v40, 4 }
0x1e10   :  { %v5102_v0 = vpop.eup %5101  ;;  %v3756_v32 = vadd.f32 %v3755_v61, %v3754_v40 }
0x1e11   :  { %v3761_v10 = vsel %vm3581_vm0, %v5102_v0, 0.0 }
0x1e12   :  { %v3757_v47 = vrot.slane %v3756_v32, 2  ;;  %v3762_v25 = vrot.slane %v3761_v10, 4 }
0x1e14   :  { %v3758_v60 = vadd.f32 %v3757_v47, %v3756_v32  ;;  %v3763_v16 = vadd.f32 %v3762_v25, %v3761_v10 }
0x1e16   :  { %v3759_v1 = vrot.slane %v3758_v60, 1  ;;  %v3764_v2 = vrot.slane %v3763_v16, 2 }
0x1e18   :  { %v3760_v36 = vadd.f32 %v3759_v1, %v3758_v60  ;;  %v3765_v7 = vadd.f32 %v3764_v2, %v3763_v16 }
0x1e1a   :  { %5103 = vlog2.f32 %v3760_v36  ;;  %v3766_v63 = vrot.slane %v3765_v7, 1 }
0x1e1c   :  { %v3767_v9 = vadd.f32 %v3766_v63, %v3765_v7 }
0x1e1e   :  { %5105 = vlog2.f32 %v3767_v9  ;;  %v5942_v9 = vld [vmem:[%s6166_s3 + $0x15] sm:$0x7] }
0x1e24   :  { %v5104_v18 = vpop.eup %5103 }
0x1e25   :  { %v3769_v34 = vmul.f32 0.6931472, %v5104_v18 }
0x1e27   :  { %v3772_v50 = vadd.f32 %v3769_v34, %v3740_v38 }
0x1e28   :  { %v5106_v19 = vpop.eup %5105 }
0x1e29   :  { %v3771_v12 = vmul.f32 0.6931472, %v5106_v19 }
0x1e2b   :  { %v3773_v24 = vadd.f32 %v3771_v12, %v3747_v22 }
0x1e2d   :  { %v3780_v4 = vsel %vm2937_vm14, %v3773_v24, %v3772_v50 }
0x1e2e   :  { %v5876_v28 = vsel %vm3777_vm8, %v3780_v4, %v5833_v59 }
0x1e2f   :  { %v3786_v30 = vrot.slane %v5876_v28, %v5333_v27  ;;  %v3793_v1 = vrot.slane %v5876_v28, %v5595_v53 }
0x1e31   :  { %3788 = vbcast.lane.b32.xlu0 %v3786_v30, 256 }
0x1e69   :  { %v2921_v35 = vpop.xlane.xlu0 %2920 }
0x1e6a   :  { %v4962_v43 = vtrunc.f32 %v2921_v35 }
0x1e6b   :  { %v4240_v20 = vpop.xlane.xlu1 %4239 }
0x1e6c   :  { %vm4241_vm10 = vcmp.eq.f32.partialorder %v5846_v45, %v4240_v20  ;;  %v4963_v38 = vcvt.f32.s32 %v4962_v43  ;;  %v4246_v35 = vcvt.f32.s32 %v4240_v20 }
0x1e6d   :  { %v4242_v49 = vsel %vm4241_vm10, %v4237_v29, inf }
0x1e6e   :  { %4243 = vmin.xlane.f32.xlu1 %v4242_v49  ;;  %v5882_v22 = vadd.s32 4294967295, %v4963_v38  ;;  %v4247_v38 = vshll.u32 %v4246_v35, 16 }
0x1e6f   :  { %v2926_v41 = vpop.permute.xlu1 %2925 }
0x1e70   :  { %vm2927_vm8 = vcmp.eq.s32.totalorder %v2926_v41, %v5264_v17  ;;  %vm2946_vm12 = vcmp.eq.s32.totalorder %v5882_v22, 0  ;;  %vm3064_vm15 = vcmp.eq.s32.totalorder %v5882_v22, 1  ;;  %vm3183_vm3 = vcmp.eq.s32.totalorder %v5882_v22, 2 }
0x1e71   :  { %v5888_v59 = vsel %vm2927_vm8, 1.0, %v5182_v15  ;;  %v2947_v45 = vsel %vm2946_vm12, 1.0, %v5182_v15  ;;  %v3065_v51 = vsel %vm3064_vm15, 1.0, %v5182_v15  ;;  %v3184_v58 = vsel %vm3183_vm3, 1.0, %v5182_v15 }
0x1e72   :  { %4834 = vmatmul.mubr.msk.f32.vlgmr.msra.gmra.mrb[32].mxu1 %vm2955_vm13, %v5888_v59  ;;  %v2948_v42 = vmul.f32 %v5888_v59, %v2947_v45  ;;  %v3066_v40 = vmul.f32 %v5903_v62, %v3065_v51  ;;  %v3067_v61 = vsub.f32 1.0, %v3065_v51  ;;  %v3186_v32 = vsub.f32 1.0, %v3184_v58 }
0x1e73   :  { %v3191_v52 = vpop.permute.xlu1 %3190  ;;  %4837 = vmatpush3.msk.msra.mxu1 %vm2959_vm1, %v5614_v57  ;;  %4838 = vmatprep.mubr.msk.f32.mxu1 %vm5183_vm7, %v5182_v15  ;;  %v3185_v60 = vmul.f32 %v5853_v44, %v3184_v58 }
0x1e74   :  { %4846 = vmatprep.subr.mxu1 %v5182_v15  ;;  %vm3192_vm9 = vcmp.eq.s32.totalorder %v3191_v52, %v5264_v17  ;;  %v3068_v0 = vmul.f32 %v3067_v61, %v2948_v42 }
0x1e75   :  { %v5922_v47 = vsel %vm3192_vm9, 1.0, %v5182_v15  ;;  %vm3165_vm9 = vcmask 20483  }
0x1e76   :  { %4839 = vmatmul.mubr.msk.f32.vlgmr.msra.gmra.mrb[34].mxu1 %vm2955_vm13, %v5903_v62  ;;  %v3069_v25 = vadd.f32 %v3068_v0, %v3066_v40 }
0x1e77   :  { %4847 = vmatpush3.msk.msra.mxu1 %vm2959_vm1, %v5614_v57  ;;  %4848 = vmatprep.mubr.msk.f32.mxu1 %vm5183_vm7, %v5182_v15  ;;  %vm3540_vm7 = vcmp.eq.s32.totalorder %v5882_v22, 5 }
0x1e78   :  { %v3310_v10 = vpop.permute.xlu1 %3309  ;;  %v3187_v57 = vmul.f32 %v3186_v32, %v3069_v25 }
0x1e79   :  { %vm3311_vm10 = vcmp.eq.s32.totalorder %v3310_v10, %v5264_v17 }
0x1e7a   :  { %v5927_v16 = vsel %vm3311_vm10, 1.0, %v5182_v15  ;;  %4849 = vmatmul.mubr.msk.f32.vlgmr.msra.gmra.mrb[36].mxu1 %vm2955_vm13, %v5922_v47  ;;  %v5935_v2 = vadd.f32 %v3187_v57, %v3185_v60  ;;  %vm3281_vm10 = vcmask 1045509  }
0x1e7b   :  { %4854 = vmatmul.mubr.msk.f32.vlgmr.msra.gmra.mrb[24].mxu0 %vm2955_vm13, %v5927_v16  ;;  %vm3421_vm13 = vcmp.eq.s32.totalorder %v5882_v22, 4 }
0x1e7c   :  { %v3422_v54 = vsel %vm3421_vm13, 1.0, %v5182_v15 }
0x1e7f   :  { %3795 = vbcast.lane.b32.xlu1 %v3793_v1, 256 }
0x1ea3   :  { %v3789_v63 = vpop.permute.xlu0 %3788 }
0x1ea4   :  { %v3797_v18 = vadd.f32 %v5942_v9, %v3789_v63 }
0x1ea6   :  { %v3807_v34 = vadd.f32 %v5731_v5, %v3797_v18 }
0x1ea8   :  { %v3809_v19 = vsel %vm3581_vm0, %v3807_v34, -inf }
0x1ea9   :  { %v3810_v12 = vrot.slane %v3809_v19, 4 }
0x1eab   :  { %v3811_v50 = vmax.f32 %v3809_v19, %v3810_v12 }
0x1ead   :  { %v3812_v24 = vrot.slane %v3811_v50, 2 }
0x1eaf   :  { %v3813_v4 = vmax.f32 %v3811_v50, %v3812_v24 }
0x1eb1   :  { %v3814_v30 = vrot.slane %v3813_v4, 1 }
0x1eb3   :  { %v3815_v31 = vmax.f32 %v3813_v4, %v3814_v30 }
0x1eb5   :  { %v3823_v43 = vsub.f32 %v3807_v34, %v3815_v31 }
0x1eb7   :  { %v3825_v41 = vmul.f32 1.442695, %v3823_v43 }
0x1eb9   :  { %5107 = vpow2.f32 %v3825_v41 }
0x1ebd   :  { %v5937_v36 = vpop.f32.mrb[22].mxu0 }
0x1ebe   :  { %v4845_v7 = vpop.f32.mrb[23].mxu0 }
0x1ec3   :  { %v5108_v1 = vpop.eup %5107 }
0x1efb   :  { %v4244_v29 = vpop.xlane.xlu1 %4243 }
0x1efc   :  { %v4245_v49 = vcvt.f32.s32 %v4244_v29 }
0x1efe   :  { %v5947_v52 = vadd.s32 %v4247_v38, %v4245_v49 }
0x1eff   :  { %v3796_v45 = vpop.permute.xlu1 %3795 }
0x1f00   :  { %v3798_v5 = vadd.f32 %v5942_v9, %v3796_v45  ;;  %v5954_v42 = vsel %vm3540_vm7, %v5947_v52, 0 }
0x1f01   :  { %vm4256_vm1 = vcmp.eq.s32.totalorder %v5264_v17, %v5954_v42 }
0x1f02   :  { %v3808_v20 = vadd.f32 %v5737_v33, %v3798_v5  ;;  %v4258_v51 = vsel %vm4256_vm1, %v5809_v39, 0  ;;  %v3829_v33 = vsel %vm3581_vm0, %v5108_v1, 0.0  ;;  %vm3284_vm1 = vcmask 21508  }
0x1f03   :  { %v4259_v58 = vsel %vm2942_vm6, %v4258_v51, 0  ;;  %v3830_v39 = vrot.slane %v3829_v33, 4 }
0x1f04   :  { %v3816_v40 = vsel %vm3581_vm0, %v3808_v20, -inf  ;;  %v4261_v61 = vshrl.u32 %v4259_v58, 16  ;;  %v4260_v0 = vand.u32 65535, %v4259_v58 }
0x1f05   :  { %v3817_v32 = vrot.slane %v3816_v40, 4  ;;  %v3831_v12 = vadd.f32 %v3830_v39, %v3829_v33 }
0x1f06   :  { %v4263_v10 = vcvt.s32.f32 %v4261_v61  ;;  %v4262_v25 = vcvt.s32.f32 %v4260_v0 }
0x1f07   :  { %v3818_v60 = vmax.f32 %v3816_v40, %v3817_v32  ;;  %v3832_v50 = vrot.slane %v3831_v12, 2  ;;  %v5202_v32 = vmov 14  }
0x1f08   :  { %4266 = vadd.xlane.f32.xlu0 %v4263_v10  ;;  %4264 = vadd.xlane.f32.xlu1 %v4262_v25 }
0x1f09   :  { %v3819_v57 = vrot.slane %v3818_v60, 2  ;;  %v3833_v24 = vadd.f32 %v3832_v50, %v3831_v12  ;;  %5013 = vset.pattern.permute.xlu0 %v5202_v32  ;;  %v3392_v32 = vrot.slane %v5927_v16, 4 }
0x1f0b   :  { %v3820_v7 = vmax.f32 %v3818_v60, %v3819_v57  ;;  %v3834_v35 = vrot.slane %v3833_v24, 1 }
0x1f0d   :  { %v3821_v63 = vrot.slane %v3820_v7, 1  ;;  %v3835_v38 = vadd.f32 %v3834_v35, %v3833_v24  ;;  %v3153_v35 = vrot.slane %v5853_v44, 5 }
0x1f0f   :  { %v3822_v18 = vmax.f32 %v3820_v7, %v3821_v63 }
0x1f11   :  { %v3824_v34 = vsub.f32 %v3808_v20, %v3822_v18 }
0x1f13   :  { %v3827_v19 = vmul.f32 1.442695, %v3824_v34 }
0x1f15   :  { %5109 = vpow2.f32 %v3827_v19 }
0x1f16   :  { %5111 = vlog2.f32 %v3835_v38  ;;  %v3273_v38 = vrot.slane %v5922_v47, 5 }
0x1f1f   :  { %v5110_v4 = vpop.eup %5109 }
0x1f20   :  { %v3836_v30 = vsel %vm3581_vm0, %v5110_v4, 0.0  ;;  %v5112_v51 = vpop.eup %5111 }
0x1f21   :  { %v3837_v43 = vrot.slane %v3836_v30, 4  ;;  %v3844_v20 = vmul.f32 0.6931472, %v5112_v51 }
0x1f23   :  { %v3838_v29 = vadd.f32 %v3837_v43, %v3836_v30  ;;  %v3847_v61 = vadd.f32 %v3844_v20, %v3815_v31  ;;  %v3157_v20 = vmul.f32 %v3153_v35, %v5586_v46 }
0x1f25   :  { %v3839_v49 = vrot.slane %v3838_v29, 2 }
0x1f27   :  { %v3840_v41 = vadd.f32 %v3839_v49, %v3838_v29 }
0x1f29   :  { %v3841_v45 = vrot.slane %v3840_v41, 1 }
0x1f2b   :  { %v3842_v5 = vadd.f32 %v3841_v45, %v3840_v41 }
0x1f2d   :  { %5113 = vlog2.f32 %v3842_v5 }
0x1f37   :  { %v5114_v58 = vpop.eup %5113 }
0x1f38   :  { %v3846_v40 = vmul.f32 0.6931472, %v5114_v58 }
0x1f3a   :  { %v3848_v0 = vadd.f32 %v3846_v40, %v3822_v18  ;;  %v3277_v40 = vmul.f32 %v3273_v38, %v5588_v48 }
0x1f3c   :  { %v3855_v10 = vsel %vm2937_vm14, %v3848_v0, %v3847_v61 }
0x1f3d   :  { %v5968_v25 = vsel %vm3852_vm4, %v3855_v10, %v5876_v28  ;;  %vm4250_vm4 = vcmp.ge.s32.totalorder %v5882_v22, 5  ;;  %v3280_v10 = vrot.slane %v3277_v40, 7 }
0x1f3e   :  { %v3868_v60 = vrot.slane %v5968_v25, %v5595_v53  ;;  %v3861_v57 = vrot.slane %v5968_v25, %v5333_v27  ;;  %v3154_v27 = vrot.slane %v5853_v44, 6 }
0x1f40   :  { %3870 = vbcast.lane.b32.xlu1 %v3868_v60, 256  ;;  %3863 = vbcast.lane.b32.xlu0 %v3861_v57, 256  ;;  %v3158_v30 = vmul.f32 %v3154_v27, %v5588_v48 }
0x1f42   :  { %v3161_v45 = vrot.slane %v3158_v30, 7 }
0x1f44   :  { %v3163_v58 = vsel %vm3162_vm11, %v3161_v45, %v3157_v20  ;;  %vm3403_vm11 = vcmask 22533  }
0x1f45   :  { %v5974_v1 = vpop.f32.mrb[32].mxu1  ;;  %v3166_v0 = vsel %vm3165_vm9, %v3163_v58, 0.0  ;;  %vm3522_vm9 = vcmask 23558  }
0x1f46   :  { %v4835_v31 = vpop.f32.mrb[33].mxu1 }
0x1f49   :  { %v3144_v7 = vpop.f32.mrb[34].mxu1 }
0x1f4a   :  { %v4840_v63 = vpop.f32.mrb[35].mxu1  ;;  %v3148_v61 = vmul.f32 %v5853_v44, %v3144_v7  ;;  %v3267_v44 = vmul.f32 %v5922_v47, %v5937_v36 }
0x1f4b   :  { %v3396_v63 = vmul.f32 %v3392_v32, %v5588_v48 }
0x1f4c   :  { %v3149_v57 = vsel %vm2942_vm6, %v3148_v61, 0.0  ;;  %v3268_v27 = vsel %vm2942_vm6, %v3267_v44, 0.0 }
0x1f4d   :  { %v5976_v33 = vpop.f32.mrb[36].mxu1 }
0x1f4e   :  { %v4850_v18 = vpop.f32.mrb[37].mxu1  ;;  %v5978_v39 = vpop.f32.mrb[24].mxu0 }
0x1f4f   :  { %v4855_v8 = vpop.f32.mrb[25].mxu0  ;;  %v3391_v18 = vrot.slane %v5927_v16, 3 }
0x1f50   :  { %v3399_v8 = vrot.slane %v3396_v63, 7 }
0x1f95   :  { %v4267_v28 = vpop.xlane.xlu0 %4266  ;;  %v4265_v34 = vpop.xlane.xlu1 %4264 }
0x1f96   :  { %v4269_v19 = vcvt.f32.s32 %v4267_v28  ;;  %v4268_v12 = vcvt.f32.s32 %v4265_v34 }
0x1f98   :  { %v4270_v53 = vshll.u32 %v4269_v19, 16 }
0x1f9a   :  { %v4271_v50 = vadd.s32 %v4270_v53, %v4268_v12  ;;  %v3395_v12 = vmul.f32 %v3391_v18, %v5586_v46 }
0x1f9c   :  { %v4272_v24 = vsel %vm4250_vm4, %v4271_v50, %v5954_v42 }
0x1f9d   :  { %v5989_v4 = vsel %vm3421_vm13, %v5947_v52, %v4272_v24  ;;  %vm3519_vm13 = vcmask 1047559  }
0x1f9e   :  { %vm4280_vm8 = vcmp.eq.s32.totalorder %v5264_v17, %v5989_v4 }
0x1f9f   :  { %v4282_v43 = vsel %vm4280_vm8, %v5763_v11, 0  ;;  %v3272_v11 = vrot.slane %v5922_v47, 4  ;;  %vm3400_vm8 = vcmask 1046534  }
0x1fa0   :  { %v4283_v29 = vsel %vm2942_vm6, %v4282_v43, 0  ;;  %v3401_v36 = vsel %vm3400_vm8, %v3399_v8, %v3395_v12  ;;  %v3386_v43 = vmul.f32 %v5927_v16, %v5976_v33  ;;  %vm4298_vm8 = vcmp.ge.s32.totalorder %v5882_v22, 3 }
0x1fa1   :  { %v4285_v49 = vshrl.u32 %v4283_v29, 16  ;;  %v4284_v41 = vand.u32 65535, %v4283_v29  ;;  %v3276_v60 = vmul.f32 %v3272_v11, %v5586_v46  ;;  %v3404_v38 = vsel %vm3403_vm11, %v3401_v36, 0.0 }
0x1fa2   :  { %v3387_v45 = vsel %vm2942_vm6, %v3386_v43, 0.0 }
0x1fa3   :  { %v4287_v5 = vcvt.s32.f32 %v4285_v49  ;;  %v4286_v51 = vcvt.s32.f32 %v4284_v41  ;;  %v3282_v31 = vsel %vm3281_vm10, %v3280_v10, %v3276_v60  ;;  %vm3047_vm10 = vcmask 1043459  }
0x1fa4   :  { %v3285_v7 = vsel %vm3284_vm1, %v3282_v31, 0.0  ;;  %vm3050_vm1 = vcmask 19458  }
0x1fa5   :  { %4290 = vadd.xlane.f32.xlu0 %v4287_v5  ;;  %4288 = vadd.xlane.f32.xlu1 %v4286_v51 }
0x1fa9   :  { %3167 = vadd.xlane.f32.xlu1 %v3166_v0 }
0x1fad   :  { %3150 = vadd.xlane.f32.xlu1 %v3149_v57 }
0x1fb1   :  { %3286 = vadd.xlane.f32.xlu1 %v3285_v7 }
0x1fb2   :  { %v3864_v28 = vpop.permute.xlu0 %3863  ;;  %v3871_v34 = vpop.permute.xlu1 %3870 }
0x1fb3   :  { %v3872_v19 = vadd.f32 %v5942_v9, %v3864_v28  ;;  %v3873_v53 = vadd.f32 %v5942_v9, %v3871_v34 }
0x1fb5   :  { %v3882_v50 = vadd.f32 %v5767_v21, %v3872_v19  ;;  %v3883_v24 = vadd.f32 %v5773_v26, %v3873_v53  ;;  %3269 = vadd.xlane.f32.xlu1 %v3268_v27 }
0x1fb7   :  { %v3884_v30 = vsel %vm3581_vm0, %v3882_v50, -inf  ;;  %v3891_v35 = vsel %vm3581_vm0, %v3883_v24, -inf }
0x1fb8   :  { %v3885_v29 = vrot.slane %v3884_v30, 4  ;;  %v3892_v9 = vrot.slane %v3891_v35, 4 }
0x1fb9   :  { %3405 = vadd.xlane.f32.xlu1 %v3404_v38 }
0x1fba   :  { %v3886_v49 = vmax.f32 %v3884_v30, %v3885_v29  ;;  %v3893_v41 = vmax.f32 %v3891_v35, %v3892_v9 }
0x1fbb   :  { %3428 = vperm.xlu0 %5013, %v5818_v23  }
0x1fbc   :  { %v3887_v21 = vrot.slane %v3886_v49, 2  ;;  %v3894_v26 = vrot.slane %v3893_v41, 2 }
0x1fbd   :  { %3388 = vadd.xlane.f32.xlu1 %v3387_v45 }
0x1fbe   :  { %v3888_v5 = vmax.f32 %v3886_v49, %v3887_v21  ;;  %v3895_v51 = vmax.f32 %v3893_v41, %v3894_v26 }
0x1fbf   :  { %5014 = vset.pattern.permute.xlu0 %v5195_v6 }
0x1fc0   :  { %v3889_v20 = vrot.slane %v3888_v5, 1  ;;  %v3896_v58 = vrot.slane %v3895_v51, 1 }
0x1fc2   :  { %v3890_v33 = vmax.f32 %v3888_v5, %v3889_v20  ;;  %v3897_v40 = vmax.f32 %v3895_v51, %v3896_v58 }
0x1fc4   :  { %v3898_v11 = vsub.f32 %v3882_v50, %v3890_v33  ;;  %v3899_v61 = vsub.f32 %v3883_v24, %v3897_v40 }
0x1fc6   :  { %v3900_v0 = vmul.f32 1.442695, %v3898_v11  ;;  %v3902_v32 = vmul.f32 1.442695, %v3899_v61 }
0x1fc8   :  { %5115 = vpow2.f32 %v3900_v0 }
0x1fc9   :  { %5117 = vpow2.f32 %v3902_v32 }
0x1fd2   :  { %v5116_v23 = vpop.eup %5115 }
0x1fd3   :  { %v5118_v10 = vpop.eup %5117  ;;  %v3904_v60 = vsel %vm3581_vm0, %v5116_v23, 0.0 }
0x1fd4   :  { %v3905_v57 = vrot.slane %v3904_v60, 4  ;;  %v3911_v31 = vsel %vm3581_vm0, %v5118_v10, 0.0  ;;  %vm3302_vm0 = vcmp.eq.s32.totalorder %v5882_v22, 3 }
0x1fd5   :  { %v3912_v63 = vrot.slane %v3911_v31, 4  ;;  %v3303_v49 = vsel %vm3302_vm0, 1.0, %v5182_v15 }
0x1fd6   :  { %v3906_v18 = vadd.f32 %v3905_v57, %v3904_v60  ;;  %v3305_v41 = vsub.f32 1.0, %v3303_v49  ;;  %v3304_v21 = vmul.f32 %v5922_v47, %v3303_v49  ;;  %v3541_v47 = vsel %vm3540_vm7, 1.0, %v5182_v15 }
0x1fd7   :  { %v3913_v6 = vadd.f32 %v3912_v63, %v3911_v31  ;;  %v3543_v61 = vsub.f32 1.0, %v3541_v47 }
0x1fd8   :  { %v3907_v44 = vrot.slane %v3906_v18, 2  ;;  %v3306_v26 = vmul.f32 %v3305_v41, %v5935_v2 }
0x1fd9   :  { %v3914_v7 = vrot.slane %v3913_v6, 2 }
0x1fda   :  { %v3908_v8 = vadd.f32 %v3907_v44, %v3906_v18  ;;  %v3307_v5 = vadd.f32 %v3306_v26, %v3304_v21 }
0x1fdb   :  { %v3915_v28 = vadd.f32 %v3914_v7, %v3913_v6 }
0x1fdc   :  { %v3909_v34 = vrot.slane %v3908_v8, 1 }
0x1fdd   :  { %v3916_v19 = vrot.slane %v3915_v28, 1 }
0x1fde   :  { %v3910_v53 = vadd.f32 %v3909_v34, %v3908_v8 }
0x1fdf   :  { %v3917_v12 = vadd.f32 %v3916_v19, %v3915_v28  ;;  %v3039_v19 = vrot.slane %v5903_v62, 7 }
0x1fe0   :  { %5119 = vlog2.f32 %v3910_v53 }
0x1fe1   :  { %5121 = vlog2.f32 %v3917_v12 }
0x1fea   :  { %v5120_v27 = vpop.eup %5119 }
0x1feb   :  { %v5122_v50 = vpop.eup %5121  ;;  %v3919_v24 = vmul.f32 0.6931472, %v5120_v27  ;;  %v3043_v27 = vmul.f32 %v3039_v19, %v5588_v48 }
0x1fec   :  { %v3921_v36 = vmul.f32 0.6931472, %v5122_v50  ;;  %v3038_v50 = vrot.slane %v5903_v62, 6 }
0x1fed   :  { %v3922_v30 = vadd.f32 %v3919_v24, %v3890_v33  ;;  %v3423_v33 = vmul.f32 %v5927_v16, %v3422_v54 }
0x1fee   :  { %v3923_v35 = vadd.f32 %v3921_v36, %v3897_v40 }
0x1ff0   :  { %v3930_v43 = vsel %vm2937_vm14, %v3923_v35, %v3922_v30  ;;  %vm4274_vm14 = vcmp.ge.s32.totalorder %v5882_v22, 4  ;;  %v3042_v35 = vmul.f32 %v3038_v50, %v5586_v46 }
0x1ff1   :  { %v3932_v29 = vsel %vm3927_vm2, %v3930_v43, %v5968_v25 }
0x1ff2   :  { %v6029_v9 = vadd.f32 %v5793_v13, %v3932_v29  ;;  %v3424_v13 = vsub.f32 1.0, %v3422_v54  ;;  %v3033_v29 = vmul.f32 %v5903_v62, %v5974_v1 }
0x1ff4   :  { %v3934_v38 = vsel %vm2942_vm6, %v6029_v9, -inf  ;;  %v3425_v40 = vmul.f32 %v3424_v13, %v3307_v5 }
0x1ff5   :  { %3935 = vmax.xlane.f32.xlu0 %v3934_v38 }
0x1ff6   :  { %v3426_v32 = vadd.f32 %v3425_v40, %v3423_v33 }
0x1ff8   :  { %v3544_v31 = vmul.f32 %v3543_v61, %v3426_v32 }
0x2032   :  { %v4291_v25 = vpop.xlane.xlu0 %4290  ;;  %v4289_v45 = vpop.xlane.xlu1 %4288 }
0x2033   :  { %v4293_v51 = vcvt.f32.s32 %v4291_v25  ;;  %v4292_v58 = vcvt.f32.s32 %v4289_v45 }
0x2035   :  { %v4294_v20 = vshll.u32 %v4293_v51, 16 }
0x2036   :  { %v3168_v30 = vpop.xlane.xlu1 %3167 }
0x2037   :  { %v4295_v11 = vadd.s32 %v4294_v20, %v4292_v58  ;;  %v3170_v26 = vrot.slane %v3168_v30, 3 }
0x2039   :  { %v4296_v2 = vsel %vm4274_vm14, %v4295_v11, %v5989_v4 }
0x203a   :  { %v3429_v0 = vpop.permute.xlu0 %3428  ;;  %v6053_v23 = vsel %vm3302_vm0, %v5947_v52, %v4296_v2  ;;  %v3151_v49 = vpop.xlane.xlu1 %3150 }
0x203b   :  { %vm3430_vm2 = vcmp.eq.s32.totalorder %v3429_v0, %v5264_v17  ;;  %vm4304_vm7 = vcmp.eq.s32.totalorder %v5264_v17, %v6053_v23  ;;  %v3172_v13 = vadd.f32 %v3170_v26, %v3151_v49 }
0x203c   :  { %v4484_v16 = vsel %vm3430_vm2, 1.0, %v5182_v15  ;;  %v4306_v7 = vsel %vm4304_vm7, %v5725_v3, 0  ;;  %v3046_v3 = vrot.slane %v3043_v27, 7  ;;  %vm4275_vm2 = vcmp.eq.s32.totalorder %v5264_v17, 4 }
0x203d   :  { %v3510_v10 = vrot.slane %v4484_v16, 2  ;;  %v3511_v60 = vrot.slane %v4484_v16, 3  ;;  %v3542_v57 = vmul.f32 %v4484_v16, %v3541_v47  ;;  %v3505_v28 = vmul.f32 %v4484_v16, %v5978_v39 }
0x203e   :  { %v4307_v34 = vsel %vm2942_vm6, %v4306_v7, 0  ;;  %v3048_v43 = vsel %vm3047_vm10, %v3046_v3, %v3042_v35  ;;  %v3287_v41 = vpop.xlane.xlu1 %3286  ;;  %v2941_v7 = vmul.f32 %v5888_v59, %v5599_v55  ;;  %vm4299_vm7 = vcmp.eq.s32.totalorder %v5264_v17, 3 }
0x203f   :  { %v3515_v63 = vmul.f32 %v3511_v60, %v5588_v48  ;;  %v6060_v18 = vadd.f32 %v3544_v31, %v3542_v57  ;;  %v3514_v6 = vmul.f32 %v3510_v10, %v5586_v46  ;;  %v4309_v53 = vshrl.u32 %v4307_v34, 16 }
0x2040   :  { %v3506_v12 = vsel %vm2942_vm6, %v3505_v28, 0.0  ;;  %v4308_v36 = vand.u32 65535, %v4307_v34  ;;  %v3051_v38 = vsel %vm3050_vm1, %v3048_v43, 0.0  ;;  %v3034_v48 = vsel %vm2942_vm6, %v3033_v29, 0.0  ;;  %v5128_v28 = vld [vmem:[%s6166_s3 + $0x14] ss:$0 sm:$0xff] }
0x2041   :  { %v3518_v44 = vrot.slane %v3515_v63, 7  ;;  %v4311_v24 = vcvt.s32.f32 %v4309_v53  ;;  %v3289_v25 = vrot.slane %v3287_v41, 4  ;;  %s5208_s3 = smov 127   ;;  %vm4346_vm10 = vcmp.ge.s32.totalorder %v5882_v22, 1 }
0x2042   :  { %v4310_v39 = vcvt.s32.f32 %v4308_v36  ;;  %v3270_v21 = vpop.xlane.xlu1 %3269  ;;  %vm4347_vm1 = vcmp.eq.s32.totalorder %v5264_v17, 1 }
0x2043   :  { %v3520_v8 = vsel %vm3519_vm13, %v3518_v44, %v3514_v6  ;;  %v3291_v46 = vadd.f32 %v3289_v25, %v3270_v21  ;;  %vm4323_vm13 = vcmp.eq.s32.totalorder %v5264_v17, 2 }
0x2044   :  { %v3523_v15 = vsel %vm3522_vm9, %v3520_v8, 0.0  ;;  %vm4278_vm9 = vmand %vm4275_vm2, %vm4274_vm14 }
0x2045   :  { %3524 = vadd.xlane.f32.xlu1 %v3523_v15  ;;  %v2943_v15 = vsel %vm2942_vm6, %v2941_v7, 0.0  ;;  %vm4350_vm14 = vmand %vm4347_vm1, %vm4346_vm10 }
0x2046   :  { %v3406_v54 = vpop.xlane.xlu1 %3405 }
0x2047   :  { %v3408_v5 = vrot.slane %v3406_v54, 5 }
0x2049   :  { %3507 = vadd.xlane.f32.xlu1 %v3506_v12 }
0x204a   :  { %v3389_v45 = vpop.xlane.xlu1 %3388 }
0x204b   :  { %v3410_v62 = vadd.f32 %v3408_v5, %v3389_v45 }
0x204d   :  { %4314 = vadd.xlane.f32.xlu1 %v4311_v24 }
0x2051   :  { %4312 = vadd.xlane.f32.xlu1 %v4310_v39 }
0x2055   :  { %3052 = vadd.xlane.f32.xlu1 %v3051_v38 }
0x2059   :  { %3035 = vadd.xlane.f32.xlu1 %v3034_v48 }
0x206a   :  { %3174 = vrot.lane.b32.xlu1 %v3172_v13, %s5203_s2 }
0x206e   :  { %3293 = vrot.lane.b32.xlu1 %v3291_v46, %s5204_s11 }
0x2072   :  { %3412 = vrot.lane.b32.xlu1 %v3410_v62, %s5205_s12 }
0x2082   :  { %v6074_v58 = vpop.xlane.xlu0 %3935 }
0x2083   :  { %v3937_v40 = vsub.f32 %v6029_v9, %v6074_v58 }
0x2085   :  { %v3938_v2 = vmul.f32 1.442695, %v3937_v40 }
0x2087   :  { %5123 = vpow2.f32 %v3938_v2 }
0x2091   :  { %v5124_v6 = vpop.eup %5123 }
0x2092   :  { %v3940_v44 = vsel %vm2942_vm6, %v5124_v6, 0.0 }
0x20d2   :  { %v3525_v1 = vpop.xlane.xlu1 %3524 }
0x20d3   :  { %v3527_v51 = vrot.slane %v3525_v1, 6 }
0x20d6   :  { %v3508_v20 = vpop.xlane.xlu1 %3507 }
0x20d7   :  { %v3529_v33 = vadd.f32 %v3527_v51, %v3508_v20 }
0x20d9   :  { %3531 = vrot.lane.b32.xlu0 %v3529_v33, %s5206_s13 }
0x20da   :  { %v4315_v11 = vpop.xlane.xlu1 %4314 }
0x20db   :  { %v4317_v47 = vcvt.f32.s32 %v4315_v11 }
0x20dd   :  { %v4318_v0 = vshll.u32 %v4317_v47, 16 }
0x20de   :  { %v4313_v61 = vpop.xlane.xlu1 %4312 }
0x20df   :  { %v4316_v32 = vcvt.f32.s32 %v4313_v61 }
0x20e1   :  { %v4319_v16 = vadd.s32 %v4318_v0, %v4316_v32 }
0x20e2   :  { %v3053_v34 = vpop.xlane.xlu1 %3052 }
0x20e3   :  { %v4320_v10 = vsel %vm4298_vm8, %v4319_v16, %v6053_v23  ;;  %v3055_v55 = vrot.slane %v3053_v34, 2 }
0x20e4   :  { %v6085_v60 = vsel %vm3183_vm3, %v5947_v52, %v4320_v10  ;;  %vm4322_vm3 = vcmp.ge.s32.totalorder %v5882_v22, 2 }
0x20e5   :  { %vm4328_vm11 = vcmp.eq.s32.totalorder %v5264_v17, %v6085_v60 }
0x20e6   :  { %v4330_v9 = vsel %vm4328_vm11, %v5695_v37, 0  ;;  %v3550_v37 = vmul.f32 %v5128_v28, %v6060_v18  ;;  %v3036_v12 = vpop.xlane.xlu1 %3035  ;;  %vm4370_vm11 = vcmp.ge.s32.totalorder %v5882_v22, 0 }
0x20e7   :  { %v4331_v57 = vsel %vm2942_vm6, %v4330_v9, 0  ;;  %v3057_v50 = vadd.f32 %v3055_v55, %v3036_v12 }
0x20e8   :  { %v4333_v31 = vshrl.u32 %v4331_v57, 16  ;;  %v4332_v8 = vand.u32 65535, %v4331_v57  ;;  %v3551_v53 = vsel %vm2942_vm6, %v3550_v37, 0.0 }
0x20ea   :  { %v4335_v63 = vcvt.s32.f32 %v4333_v31  ;;  %v4334_v19 = vcvt.s32.f32 %v4332_v8  ;;  %v3175_v27 = vpop.permute.xlu1 %3174 }
0x20eb   :  { %v3177_v36 = vmul.f32 %v3175_v27, %v5325_v14 }
0x20ec   :  { %4338 = vadd.xlane.f32.xlu1 %v4335_v63 }
0x20ee   :  { %v3294_v59 = vpop.permute.xlu1 %3293 }
0x20ef   :  { %v3296_v24 = vmul.f32 %v3294_v59, %v5325_v14 }
0x20f0   :  { %3941 = vadd.xlane.f32.xlu1 %v3940_v44 }
0x20f2   :  { %v3413_v3 = vpop.permute.xlu1 %3412 }
0x20f3   :  { %v3415_v18 = vmul.f32 %v3413_v3, %v5325_v14 }
0x20f4   :  { %2944 = vadd.xlane.f32.xlu1 %v2943_v15 }
0x20f8   :  { %3552 = vadd.xlane.f32.xlu1 %v3551_v53  ;;  %4336 = vadd.xlane.f32.xlu0 %v4334_v19 }
0x2109   :  { %3059 = vrot.lane.b32.xlu1 %v3057_v50, %s5207_s16 }
0x210d   :  { %3298 = vrot.lane.b32.xlu1 %v3296_v24, %s5197_s8 }
0x210e   :  { %3179 = vrot.lane.b32.xlu0 %v3177_v36, %s5208_s3 }
0x2111   :  { %3417 = vrot.lane.b32.xlu1 %v3415_v18, %s5209_s17 }
0x214b   :  { %v3532_v30 = vpop.permute.xlu0 %3531 }
0x214c   :  { %v3534_v39 = vmul.f32 %v3532_v30, %v5325_v14 }
0x214e   :  { %3536 = vrot.lane.b32.xlu0 %v3534_v39, %s5210_s18 }
0x2179   :  { %v4339_v35 = vpop.xlane.xlu1 %4338 }
0x217a   :  { %v4341_v43 = vcvt.f32.s32 %v4339_v35 }
0x217c   :  { %v4342_v38 = vshll.u32 %v4341_v43, 16 }
0x217d   :  { %v3942_v5 = vpop.xlane.xlu1 %3941 }
0x217e   :  { %5125 = vlog2.f32 %v3942_v5 }
0x2181   :  { %v2945_v62 = vpop.xlane.xlu1 %2944 }
0x2185   :  { %v4337_v29 = vpop.xlane.xlu0 %4336  ;;  %v3553_v1 = vpop.xlane.xlu1 %3552 }
0x2186   :  { %v4340_v49 = vcvt.f32.s32 %v4337_v29 }
0x2188   :  { %v4343_v48 = vadd.s32 %v4342_v38, %v4340_v49  ;;  %v5126_v2 = vpop.eup %5125 }
0x2189   :  { %v3060_v51 = vpop.permute.xlu1 %3059  ;;  %v3180_v40 = vpop.permute.xlu0 %3179  ;;  %v3944_v0 = vmul.f32 0.6931472, %v5126_v2 }
0x218a   :  { %v4344_v41 = vsel %vm4322_vm3, %v4343_v48, %v6085_v60  ;;  %v3062_v20 = vmul.f32 %v3060_v51, %v5325_v14 }
0x218b   :  { %v6113_v21 = vsel %vm3064_vm15, %v5947_v52, %v4344_v41  ;;  %v3945_v9 = vadd.f32 %v3944_v0, %v6074_v58 }
0x218c   :  { %vm4352_vm0 = vcmp.eq.s32.totalorder %v5264_v17, %v6113_v21  ;;  %v3063_v33 = vadd.f32 %v3062_v20, %v2945_v62 }
0x218d   :  { %v4354_v26 = vsel %vm4352_vm0, %v5653_v56, 0  ;;  %v3299_v11 = vpop.permute.xlu1 %3298  ;;  %vm4371_vm0 = vcmp.eq.s32.totalorder %v5264_v17, 0 }
0x218e   :  { %v4355_v54 = vsel %vm2942_vm6, %v4354_v26, 0  ;;  %v3182_v47 = vadd.f32 %v3180_v40, %v3063_v33  ;;  %vm4251_vm6 = vcmp.eq.s32.totalorder %v5264_v17, 5 }
0x218f   :  { %v4357_v13 = vshrl.u32 %v4355_v54, 16  ;;  %v4356_v25 = vand.u32 65535, %v4355_v54  ;;  %vm4254_vm15 = vmand %vm4251_vm6, %vm4250_vm4 }
0x2190   :  { %v3301_v56 = vadd.f32 %v3299_v11, %v3182_v47  ;;  %v4255_v7 = vsel %vm4254_vm15, %v5954_v42, 0  ;;  %vm4302_vm4 = vmand %vm4299_vm7, %vm4298_vm8 }
0x2191   :  { %v4359_v46 = vcvt.s32.f32 %v4357_v13  ;;  %v4358_v45 = vcvt.s32.f32 %v4356_v25  ;;  %v3418_v61 = vpop.permute.xlu1 %3417  ;;  %v4279_v8 = vsel %vm4278_vm9, %v5989_v4, %v4255_v7  ;;  %vm4326_vm6 = vmand %vm4323_vm13, %vm4322_vm3 }
0x2192   :  { %v3420_v32 = vadd.f32 %v3418_v61, %v3301_v56  ;;  %v4303_v42 = vsel %vm4302_vm4, %v6053_v23, %v4279_v8  ;;  %vm4374_vm8 = vmand %vm4371_vm0, %vm4370_vm11 }
0x2193   :  { %4362 = vadd.xlane.f32.xlu1 %v4359_v46  ;;  %4360 = vadd.xlane.f32.xlu0 %v4358_v45  ;;  %v4327_v37 = vsel %vm4326_vm6, %v6085_v60, %v4303_v42 }
0x2194   :  { %v4351_v4 = vsel %vm4350_vm14, %v6113_v21, %v4327_v37 }
0x21c0   :  { %v3537_v16 = vpop.permute.xlu0 %3536 }
0x21c1   :  { %v3539_v10 = vadd.f32 %v3537_v16, %v3420_v32 }
0x21c3   :  { %v3554_v57 = vadd.f32 %v3553_v1, %v3539_v10 }
0x21c5   :  { %v3946_v31 = vsub.f32 %v3554_v57, %v3945_v9 }
0x21c7   :  { %3948 = vrot.lane.b32.xlu0 %v3946_v31, %s5209_s17 }
0x2220   :  { %v4361_v14 = vpop.xlane.xlu0 %4360  ;;  %v4363_v63 = vpop.xlane.xlu1 %4362 }
0x2221   :  { %v4365_v6 = vcvt.f32.s32 %v4363_v63  ;;  %v4364_v44 = vcvt.f32.s32 %v4361_v14 }
0x2223   :  { %v4366_v58 = vshll.u32 %v4365_v6, 16 }
0x2225   :  { %v4367_v15 = vadd.s32 %v4366_v58, %v4364_v44 }
0x2227   :  { %v4368_v28 = vsel %vm4346_vm10, %v4367_v15, %v6113_v21 }
0x2228   :  { %v4369_v34 = vsel %vm2946_vm12, %v5947_v52, %v4368_v28 }
0x2229   :  { %v4375_v17 = vsel %vm4374_vm8, %v4369_v34, %v4351_v4 }
0x222a   :  { %4376 = vst.msk [vmem:[#allocation5] sm:$0x3] %vm2918_vm5, %v4375_v17 }
0x222b   :  { %5162 = shalt.err (!%p5159_p12)
}
0x222c   :  { %s5163_s24 = scalar_lea.hbm %s6168_s5, 32 }
0x222d   :  { %p5164_p13 = scmp.ne.s32.totalorder %s6168_s5, %s5163_s24  ;;  %p5167_p0 = scmp.lt.u32.totalorder %s5163_s24, %s6168_s5 }
0x222f   :  { %p5169_p1 = pnand %p5167_p0, %p5164_p13 }
0x2231   :  { %5172 = shalt.err (!%p5169_p1)
}
0x2232   :  { %4388 = dma.vmem_to_hbm [thread:$0]  %s4386_s20, 32, %s6168_s5, [#allocation4]   ;;  %vm3951_vm5 = vcmask 1024  }
0x2239   :  { %v3949_v22 = vpop.permute.xlu0 %3948 }
0x223a   :  { %3952 = vst.msk [vmem:[%s6167_s4] sm:$0x3] %vm3951_vm5, %v3949_v22 }
0x223b   :  { %5175 = dma.done.wait [#allocation4], 32  }
0x223c   :  { %5176 = vsyncadd [#allocation4], 4294967264 }
0x223d   :  { %4394 = vsyncpa [#allocation3], 1 }
0x223e   :  { %4395 = vsyncpa [#allocation4], 1 }

</bundles_post_ra>
